<compile_context>
chip_gen: v6e
topology: v6e:2x2x1
jax: 0.10.0
libtpu: 0.0.40
codegen_flags: <defaults>
</compile_context>

<pallas_src>
import jax
import jax.numpy as jnp
from jax import lax
from jax.experimental import pallas as pl
from jax.experimental.pallas import tpu as pltpu  # noqa: F401  (defaults suffice; kept for clarity)

M_MODELS = 5          # Boost_CNN5 ensembles 5 TextCNN1 models
KSIZES = (2, 3)       # conv kernel sizes per branch


# ---------------------------------------------------------------------------
# In-kernel helper: Conv1d(k) + bias + ReLU + max-over-time for one
# (model, branch), all batch items at once.
# ---------------------------------------------------------------------------
def _conv_relu_maxpool(emb2d, L, B, w_m, b_m):
    # emb2d : (B*L, E) embeddings, rows batch-major (row = b*L + t)
    # w_m   : (k*E, C) conv filters in im2col layout [j=0 rows | j=1 rows | ...]
    # b_m   : (1, C)   conv bias
    # returns: list of B arrays of shape (1, C) — pooled features per batch item
    BL, E = emb2d.shape
    KE, C = w_m.shape
    k = KE // E
    Lout = L - k + 1

    # Shifted-projection convolution: one (B*L, E) x (E, C) matmul per tap j.
    projs = [jnp.dot(emb2d, w_m[j * E:(j + 1) * E, :],
                     preferred_element_type=jnp.float32)
             for j in range(k)]                                   # each (B*L, C)

    feats = []
    for b in range(B):
        # conv output at (b, t) = sum_j P_j[b*L + t + j]   (static aligned-ish slices)
        s = projs[0][b * L: b * L + Lout, :]
        for j in range(1, k):
            s = s + projs[j][b * L + j: b * L + j + Lout, :]
        s = jnp.maximum(s + b_m, 0.0)                             # bias + ReLU
        feats.append(jnp.max(s, axis=0, keepdims=True))           # max over time -> (1, C)
    return feats


# ---------------------------------------------------------------------------
# The single fused kernel: one-hot embedding, 4 conv branches x 5 models,
# ensemble fc-sum — everything VMEM-resident, no grid.
# ---------------------------------------------------------------------------
def boost_cnn5_kernel(xids_ref, yids_ref, embed_ref,
                      wx2_ref, bx2_ref, wx3_ref, bx3_ref,
                      wy2_ref, by2_ref, wy3_ref, by3_ref,
                      fcw_ref, fcb_ref, out_ref):
    M, V, E = embed_ref.shape
    B, Ncls = out_ref.shape
    BLx = xids_ref.shape[0]
    BLy = yids_ref.shape[0]
    Lx, Ly = BLx // B, BLy // B

    # Embedding gather as one-hot matmul (exact in f32; keeps everything on MXU).
    def one_hot(ids_ref):
        BL = ids_ref.shape[0]
        cols = lax.broadcasted_iota(jnp.int32, (BL, V), 1)
        return (ids_ref[...] == cols).astype(jnp.float32)         # (BL, V)

    x_oh = one_hot(xids_ref)
    y_oh = one_hot(yids_ref)

    # Per-batch feature pieces; lane order = model-major, branch [x2, x3, y2, y3]
    # — this matches the flattened fc weight layout (M*F, Ncls).
    h_pieces = [[] for _ in range(B)]
    for m in range(M):                                            # M=5, unrolled
        emb_m = embed_ref[m]                                      # (V, E)
        xe = jnp.dot(x_oh, emb_m, preferred_element_type=jnp.float32)   # (B*Lx, E)
        ye = jnp.dot(y_oh, emb_m, preferred_element_type=jnp.float32)   # (B*Ly, E)
        for emb2d, L, w_m, b_m in (
                (xe, Lx, wx2_ref[m], bx2_ref[m]),
                (xe, Lx, wx3_ref[m], bx3_ref[m]),
                (ye, Ly, wy2_ref[m], by2_ref[m]),
                (ye, Ly, wy3_ref[m], by3_ref[m])):
            feats_b = _conv_relu_maxpool(emb2d, L, B, w_m, b_m)
            for b in range(B):
                h_pieces[b].append(feats_b[b])

    # Ensemble fc-sum: lane-dense (1, M*F) feature row per batch item, single
    # K = M*F contraction; per-model fc biases are pre-summed in the wrapper.
    fcw = fcw_ref[...]                                            # (M*F, Ncls)
    fcb = fcb_ref[...]                                            # (1, Ncls)
    for b in range(B):
        h_b = jnp.concatenate(h_pieces[b], axis=-1)               # (1, M*F)
        out_ref[pl.ds(b, 1), :] = (
            jnp.dot(h_b, fcw, preferred_element_type=jnp.float32) + fcb)


@jax.jit
def boost_cnn5_forward(params, x_ids, y_ids):
    B = x_ids.shape[0]
    M, F, Ncls = params["fc_w"].shape
    # batch-major flattening of token ids -> (B*L, 1) int32 columns
    xids = x_ids.astype(jnp.int32).reshape(-1, 1)
    yids = y_ids.astype(jnp.int32).reshape(-1, 1)
    fcw = params["fc_w"].reshape(M * F, Ncls)       # model-major rows, matches h lane order
    fcb = jnp.sum(params["fc_b"], axis=0)           # ensemble bias sum, (1, Ncls)
    return pl.pallas_call(
        boost_cnn5_kernel,
        out_shape=jax.ShapeDtypeStruct((B, Ncls), jnp.float32),
    )(xids, yids, params["embed"],
      params["conv_w_x_2"], params["conv_b_x_2"],
      params["conv_w_x_3"], params["conv_b_x_3"],
      params["conv_w_y_2"], params["conv_b_y_2"],
      params["conv_w_y_3"], params["conv_b_y_3"],
      fcw, fcb)


# ---------------------------------------------------------------------------
# Pure-JAX reference for correctness checking.
# ---------------------------------------------------------------------------
def unfold(x_emb, k):
    # (..., L, E) -> (..., L-k+1, k*E)
    L = x_emb.shape[-2]
    Lout = L - k + 1
    return jnp.concatenate([x_emb[..., j:j + Lout, :] for j in range(k)], axis=-1)


def reference_forward(params, x_ids, y_ids):
    feats = []
    for branch, ids in (("x", x_ids), ("y", y_ids)):
        emb = jnp.take(params["embed"], ids, axis=1)              # (M, B, L, E)
        for k in KSIZES:
            xu = unfold(emb, k)                                   # (M, B, Lout, k*E)
            s = jnp.einsum("mbtk,mkc->mbtc", xu, params[f"conv_w_{branch}_{k}"])
            s = s + params[f"conv_b_{branch}_{k}"][:, :, None, :]
            s = jnp.maximum(s, 0.0)
            feats.append(jnp.max(s, axis=2))                      # (M, B, C)
    h = jnp.concatenate(feats, axis=-1)                           # (M, B, F)
    logits = jnp.einsum("mbf,mfc->mbc", h, params["fc_w"]) + params["fc_b"]
    return jnp.sum(logits, axis=0)                                # ensemble sum


if __name__ == "__main__":
    key = jax.random.PRNGKey(0)
    V, E, C, Ncls = 100, 32, 32, 8      # vocab, embed dim, conv channels, classes
    B, Lx, Ly = 2, 8, 16                # batch, title len, content len

    k_embed, k_conv, k_fc, k_x, k_y = jax.random.split(key, 5)

    params = {}
    params["embed"] = 0.1 * jax.random.normal(k_embed, (M_MODELS, V, E), jnp.float32)

    conv_keys = jax.random.split(k_conv, 2 * len(KSIZES) * 2)
    ki = 0
    for branch in ("x", "y"):
        for k in KSIZES:
            params[f"conv_w_{branch}_{k}"] = jax.random.normal(
                conv_keys[ki], (M_MODELS, k * E, C), jnp.float32) / jnp.sqrt(k * E)
            params[f"conv_b_{branch}_{k}"] = 0.01 * jax.random.normal(
                conv_keys[ki + 1], (M_MODELS, 1, C), jnp.float32)
            ki += 2

    F = 2 * len(KSIZES) * C
    kw, kb = jax.random.split(k_fc)
    params["fc_w"] = jax.random.normal(kw, (M_MODELS, F, Ncls), jnp.float32) / jnp.sqrt(F)
    params["fc_b"] = 0.01 * jax.random.normal(kb, (M_MODELS, 1, Ncls), jnp.float32)

    x_ids = jax.random.randint(k_x, (B, Lx), 0, V, dtype=jnp.int32)
    y_ids = jax.random.randint(k_y, (B, Ly), 0, V, dtype=jnp.int32)

    out = boost_cnn5_forward(params, x_ids, y_ids)
    out = jax.block_until_ready(out)
    assert out.shape == (B, Ncls), out.shape

    ref = reference_forward(params, x_ids, y_ids)
    assert jnp.allclose(out, ref, atol=1e-4, rtol=1e-4), (out, ref)

    print("KERNEL_OK")
</pallas_src>

<mosaic_0001>
module attributes {stable_mosaic.version = 11 : i64} {
  func.func @boost_cnn5_kernel(%arg0: memref<16x1xi32, #tpu.memory_space<vmem>>, %arg1: memref<32x1xi32, #tpu.memory_space<vmem>>, %arg2: memref<5x100x32xf32, #tpu.memory_space<vmem>>, %arg3: memref<5x64x32xf32, #tpu.memory_space<vmem>>, %arg4: memref<5x1x32xf32, #tpu.memory_space<vmem>>, %arg5: memref<5x96x32xf32, #tpu.memory_space<vmem>>, %arg6: memref<5x1x32xf32, #tpu.memory_space<vmem>>, %arg7: memref<5x64x32xf32, #tpu.memory_space<vmem>>, %arg8: memref<5x1x32xf32, #tpu.memory_space<vmem>>, %arg9: memref<5x96x32xf32, #tpu.memory_space<vmem>>, %arg10: memref<5x1x32xf32, #tpu.memory_space<vmem>>, %arg11: memref<640x8xf32, #tpu.memory_space<vmem>>, %arg12: memref<1x8xf32, #tpu.memory_space<vmem>>, %arg13: memref<2x8xf32, #tpu.memory_space<vmem>>) attributes {dimension_semantics = [], scalar_prefetch = 0 : i64, scratch_operands = 0 : i64, tpu.core_type = #tpu.core_type<tc>} {
    %0 = tpu.iota {dimensions = array<i32: 1>} : vector<16x100xi32>
    %c0 = arith.constant 0 : index
    %c0_0 = arith.constant 0 : index
    %1 = vector.load %arg0[%c0, %c0_0] : memref<16x1xi32, #tpu.memory_space<vmem>>, vector<16x1xi32>
    %2 = vector.broadcast %1 : vector<16x1xi32> to vector<16x100xi32>
    %3 = arith.cmpi eq, %2, %0 : vector<16x100xi32>
    %4 = arith.extui %3 : vector<16x100xi1> to vector<16x100xi32>
    %5 = arith.sitofp %4 : vector<16x100xi32> to vector<16x100xf32>
    %6 = tpu.iota {dimensions = array<i32: 1>} : vector<32x100xi32>
    %c0_1 = arith.constant 0 : index
    %c0_2 = arith.constant 0 : index
    %7 = vector.load %arg1[%c0_1, %c0_2] : memref<32x1xi32, #tpu.memory_space<vmem>>, vector<32x1xi32>
    %8 = vector.broadcast %7 : vector<32x1xi32> to vector<32x100xi32>
    %9 = arith.cmpi eq, %8, %6 : vector<32x100xi32>
    %10 = arith.extui %9 : vector<32x100xi1> to vector<32x100xi32>
    %11 = arith.sitofp %10 : vector<32x100xi32> to vector<32x100xf32>
    %c0_3 = arith.constant 0 : index
    %c0_4 = arith.constant 0 : index
    %c0_5 = arith.constant 0 : index
    %12 = vector.load %arg2[%c0_3, %c0_4, %c0_5] : memref<5x100x32xf32, #tpu.memory_space<vmem>>, vector<1x100x32xf32>
    %13 = vector.shape_cast %12 : vector<1x100x32xf32> to vector<100x32xf32>
    %cst = arith.constant dense<0.000000e+00> : vector<16x32xf32>
    %14 = tpu.matmul %5, %13, %cst {dimension_numbers = #tpu.dot_dimension_numbers<[1], [0], [0], [1], [0, 0, 1, 1], [], []>} : vector<16x100xf32>, vector<100x32xf32>, vector<16x32xf32> -> vector<16x32xf32>
    %cst_6 = arith.constant dense<0.000000e+00> : vector<32x32xf32>
    %15 = tpu.matmul %11, %13, %cst_6 {dimension_numbers = #tpu.dot_dimension_numbers<[1], [0], [0], [1], [0, 0, 1, 1], [], []>} : vector<32x100xf32>, vector<100x32xf32>, vector<32x32xf32> -> vector<32x32xf32>
    %c0_7 = arith.constant 0 : index
    %c0_8 = arith.constant 0 : index
    %c0_9 = arith.constant 0 : index
    %16 = vector.load %arg3[%c0_7, %c0_8, %c0_9] : memref<5x64x32xf32, #tpu.memory_space<vmem>>, vector<1x64x32xf32>
    %17 = vector.shape_cast %16 : vector<1x64x32xf32> to vector<64x32xf32>
    %c0_10 = arith.constant 0 : index
    %c0_11 = arith.constant 0 : index
    %c0_12 = arith.constant 0 : index
    %18 = vector.load %arg4[%c0_10, %c0_11, %c0_12] : memref<5x1x32xf32, #tpu.memory_space<vmem>>, vector<1x1x32xf32>
    %19 = vector.shape_cast %18 : vector<1x1x32xf32> to vector<1x32xf32>
    %c0_13 = arith.constant 0 : index
    %c0_14 = arith.constant 0 : index
    %c0_15 = arith.constant 0 : index
    %20 = vector.load %arg5[%c0_13, %c0_14, %c0_15] : memref<5x96x32xf32, #tpu.memory_space<vmem>>, vector<1x96x32xf32>
    %21 = vector.shape_cast %20 : vector<1x96x32xf32> to vector<96x32xf32>
    %c0_16 = arith.constant 0 : index
    %c0_17 = arith.constant 0 : index
    %c0_18 = arith.constant 0 : index
    %22 = vector.load %arg6[%c0_16, %c0_17, %c0_18] : memref<5x1x32xf32, #tpu.memory_space<vmem>>, vector<1x1x32xf32>
    %23 = vector.shape_cast %22 : vector<1x1x32xf32> to vector<1x32xf32>
    %c0_19 = arith.constant 0 : index
    %c0_20 = arith.constant 0 : index
    %c0_21 = arith.constant 0 : index
    %24 = vector.load %arg7[%c0_19, %c0_20, %c0_21] : memref<5x64x32xf32, #tpu.memory_space<vmem>>, vector<1x64x32xf32>
    %25 = vector.shape_cast %24 : vector<1x64x32xf32> to vector<64x32xf32>
    %c0_22 = arith.constant 0 : index
    %c0_23 = arith.constant 0 : index
    %c0_24 = arith.constant 0 : index
    %26 = vector.load %arg8[%c0_22, %c0_23, %c0_24] : memref<5x1x32xf32, #tpu.memory_space<vmem>>, vector<1x1x32xf32>
    %27 = vector.shape_cast %26 : vector<1x1x32xf32> to vector<1x32xf32>
    %c0_25 = arith.constant 0 : index
    %c0_26 = arith.constant 0 : index
    %c0_27 = arith.constant 0 : index
    %28 = vector.load %arg9[%c0_25, %c0_26, %c0_27] : memref<5x96x32xf32, #tpu.memory_space<vmem>>, vector<1x96x32xf32>
    %29 = vector.shape_cast %28 : vector<1x96x32xf32> to vector<96x32xf32>
    %c0_28 = arith.constant 0 : index
    %c0_29 = arith.constant 0 : index
    %c0_30 = arith.constant 0 : index
    %30 = vector.load %arg10[%c0_28, %c0_29, %c0_30] : memref<5x1x32xf32, #tpu.memory_space<vmem>>, vector<1x1x32xf32>
    %31 = vector.shape_cast %30 : vector<1x1x32xf32> to vector<1x32xf32>
    %32 = vector.extract_strided_slice %17 {offsets = [0, 0], sizes = [32, 32], strides = [1, 1]} : vector<64x32xf32> to vector<32x32xf32>
    %cst_31 = arith.constant dense<0.000000e+00> : vector<16x32xf32>
    %33 = tpu.matmul %14, %32, %cst_31 {dimension_numbers = #tpu.dot_dimension_numbers<[1], [0], [0], [1], [0, 0, 1, 1], [], []>} : vector<16x32xf32>, vector<32x32xf32>, vector<16x32xf32> -> vector<16x32xf32>
    %34 = vector.extract_strided_slice %17 {offsets = [32, 0], sizes = [32, 32], strides = [1, 1]} : vector<64x32xf32> to vector<32x32xf32>
    %cst_32 = arith.constant dense<0.000000e+00> : vector<16x32xf32>
    %35 = tpu.matmul %14, %34, %cst_32 {dimension_numbers = #tpu.dot_dimension_numbers<[1], [0], [0], [1], [0, 0, 1, 1], [], []>} : vector<16x32xf32>, vector<32x32xf32>, vector<16x32xf32> -> vector<16x32xf32>
    %36 = vector.extract_strided_slice %33 {offsets = [0, 0], sizes = [7, 32], strides = [1, 1]} : vector<16x32xf32> to vector<7x32xf32>
    %37 = vector.extract_strided_slice %35 {offsets = [1, 0], sizes = [7, 32], strides = [1, 1]} : vector<16x32xf32> to vector<7x32xf32>
    %38 = arith.addf %36, %37 : vector<7x32xf32>
    %39 = vector.broadcast %19 : vector<1x32xf32> to vector<7x32xf32>
    %40 = arith.addf %38, %39 : vector<7x32xf32>
    %cst_33 = arith.constant 0.000000e+00 : f32
    %41 = vector.broadcast %cst_33 : f32 to vector<7x32xf32>
    %42 = arith.maximumf %40, %41 : vector<7x32xf32>
    %cst_34 = arith.constant dense<0xFF800000> : vector<32xf32>
    %43 = vector.multi_reduction <maximumf>, %42, %cst_34 [0] : vector<7x32xf32> to vector<32xf32>
    %44 = vector.shape_cast %43 : vector<32xf32> to vector<1x32xf32>
    %45 = vector.extract_strided_slice %33 {offsets = [8, 0], sizes = [7, 32], strides = [1, 1]} : vector<16x32xf32> to vector<7x32xf32>
    %46 = vector.extract_strided_slice %35 {offsets = [9, 0], sizes = [7, 32], strides = [1, 1]} : vector<16x32xf32> to vector<7x32xf32>
    %47 = arith.addf %45, %46 : vector<7x32xf32>
    %48 = vector.broadcast %19 : vector<1x32xf32> to vector<7x32xf32>
    %49 = arith.addf %47, %48 : vector<7x32xf32>
    %cst_35 = arith.constant 0.000000e+00 : f32
    %50 = vector.broadcast %cst_35 : f32 to vector<7x32xf32>
    %51 = arith.maximumf %49, %50 : vector<7x32xf32>
    %cst_36 = arith.constant dense<0xFF800000> : vector<32xf32>
    %52 = vector.multi_reduction <maximumf>, %51, %cst_36 [0] : vector<7x32xf32> to vector<32xf32>
    %53 = vector.shape_cast %52 : vector<32xf32> to vector<1x32xf32>
    %54 = vector.extract_strided_slice %21 {offsets = [0, 0], sizes = [32, 32], strides = [1, 1]} : vector<96x32xf32> to vector<32x32xf32>
    %cst_37 = arith.constant dense<0.000000e+00> : vector<16x32xf32>
    %55 = tpu.matmul %14, %54, %cst_37 {dimension_numbers = #tpu.dot_dimension_numbers<[1], [0], [0], [1], [0, 0, 1, 1], [], []>} : vector<16x32xf32>, vector<32x32xf32>, vector<16x32xf32> -> vector<16x32xf32>
    %56 = vector.extract_strided_slice %21 {offsets = [32, 0], sizes = [32, 32], strides = [1, 1]} : vector<96x32xf32> to vector<32x32xf32>
    %cst_38 = arith.constant dense<0.000000e+00> : vector<16x32xf32>
    %57 = tpu.matmul %14, %56, %cst_38 {dimension_numbers = #tpu.dot_dimension_numbers<[1], [0], [0], [1], [0, 0, 1, 1], [], []>} : vector<16x32xf32>, vector<32x32xf32>, vector<16x32xf32> -> vector<16x32xf32>
    %58 = vector.extract_strided_slice %21 {offsets = [64, 0], sizes = [32, 32], strides = [1, 1]} : vector<96x32xf32> to vector<32x32xf32>
    %cst_39 = arith.constant dense<0.000000e+00> : vector<16x32xf32>
    %59 = tpu.matmul %14, %58, %cst_39 {dimension_numbers = #tpu.dot_dimension_numbers<[1], [0], [0], [1], [0, 0, 1, 1], [], []>} : vector<16x32xf32>, vector<32x32xf32>, vector<16x32xf32> -> vector<16x32xf32>
    %60 = vector.extract_strided_slice %55 {offsets = [0, 0], sizes = [6, 32], strides = [1, 1]} : vector<16x32xf32> to vector<6x32xf32>
    %61 = vector.extract_strided_slice %57 {offsets = [1, 0], sizes = [6, 32], strides = [1, 1]} : vector<16x32xf32> to vector<6x32xf32>
    %62 = arith.addf %60, %61 : vector<6x32xf32>
    %63 = vector.extract_strided_slice %59 {offsets = [2, 0], sizes = [6, 32], strides = [1, 1]} : vector<16x32xf32> to vector<6x32xf32>
    %64 = arith.addf %62, %63 : vector<6x32xf32>
    %65 = vector.broadcast %23 : vector<1x32xf32> to vector<6x32xf32>
    %66 = arith.addf %64, %65 : vector<6x32xf32>
    %cst_40 = arith.constant 0.000000e+00 : f32
    %67 = vector.broadcast %cst_40 : f32 to vector<6x32xf32>
    %68 = arith.maximumf %66, %67 : vector<6x32xf32>
    %cst_41 = arith.constant dense<0xFF800000> : vector<32xf32>
    %69 = vector.multi_reduction <maximumf>, %68, %cst_41 [0] : vector<6x32xf32> to vector<32xf32>
    %70 = vector.shape_cast %69 : vector<32xf32> to vector<1x32xf32>
    %71 = vector.extract_strided_slice %55 {offsets = [8, 0], sizes = [6, 32], strides = [1, 1]} : vector<16x32xf32> to vector<6x32xf32>
    %72 = vector.extract_strided_slice %57 {offsets = [9, 0], sizes = [6, 32], strides = [1, 1]} : vector<16x32xf32> to vector<6x32xf32>
    %73 = arith.addf %71, %72 : vector<6x32xf32>
    %74 = vector.extract_strided_slice %59 {offsets = [10, 0], sizes = [6, 32], strides = [1, 1]} : vector<16x32xf32> to vector<6x32xf32>
    %75 = arith.addf %73, %74 : vector<6x32xf32>
    %76 = vector.broadcast %23 : vector<1x32xf32> to vector<6x32xf32>
    %77 = arith.addf %75, %76 : vector<6x32xf32>
    %cst_42 = arith.constant 0.000000e+00 : f32
    %78 = vector.broadcast %cst_42 : f32 to vector<6x32xf32>
    %79 = arith.maximumf %77, %78 : vector<6x32xf32>
    %cst_43 = arith.constant dense<0xFF800000> : vector<32xf32>
    %80 = vector.multi_reduction <maximumf>, %79, %cst_43 [0] : vector<6x32xf32> to vector<32xf32>
    %81 = vector.shape_cast %80 : vector<32xf32> to vector<1x32xf32>
    %82 = vector.extract_strided_slice %25 {offsets = [0, 0], sizes = [32, 32], strides = [1, 1]} : vector<64x32xf32> to vector<32x32xf32>
    %cst_44 = arith.constant dense<0.000000e+00> : vector<32x32xf32>
    %83 = tpu.matmul %15, %82, %cst_44 {dimension_numbers = #tpu.dot_dimension_numbers<[1], [0], [0], [1], [0, 0, 1, 1], [], []>} : vector<32x32xf32>, vector<32x32xf32>, vector<32x32xf32> -> vector<32x32xf32>
    %84 = vector.extract_strided_slice %25 {offsets = [32, 0], sizes = [32, 32], strides = [1, 1]} : vector<64x32xf32> to vector<32x32xf32>
    %cst_45 = arith.constant dense<0.000000e+00> : vector<32x32xf32>
    %85 = tpu.matmul %15, %84, %cst_45 {dimension_numbers = #tpu.dot_dimension_numbers<[1], [0], [0], [1], [0, 0, 1, 1], [], []>} : vector<32x32xf32>, vector<32x32xf32>, vector<32x32xf32> -> vector<32x32xf32>
    %86 = vector.extract_strided_slice %83 {offsets = [0, 0], sizes = [15, 32], strides = [1, 1]} : vector<32x32xf32> to vector<15x32xf32>
    %87 = vector.extract_strided_slice %85 {offsets = [1, 0], sizes = [15, 32], strides = [1, 1]} : vector<32x32xf32> to vector<15x32xf32>
    %88 = arith.addf %86, %87 : vector<15x32xf32>
    %89 = vector.broadcast %27 : vector<1x32xf32> to vector<15x32xf32>
    %90 = arith.addf %88, %89 : vector<15x32xf32>
    %cst_46 = arith.constant 0.000000e+00 : f32
    %91 = vector.broadcast %cst_46 : f32 to vector<15x32xf32>
    %92 = arith.maximumf %90, %91 : vector<15x32xf32>
    %cst_47 = arith.constant dense<0xFF800000> : vector<32xf32>
    %93 = vector.multi_reduction <maximumf>, %92, %cst_47 [0] : vector<15x32xf32> to vector<32xf32>
    %94 = vector.shape_cast %93 : vector<32xf32> to vector<1x32xf32>
    %95 = vector.extract_strided_slice %83 {offsets = [16, 0], sizes = [15, 32], strides = [1, 1]} : vector<32x32xf32> to vector<15x32xf32>
    %96 = vector.extract_strided_slice %85 {offsets = [17, 0], sizes = [15, 32], strides = [1, 1]} : vector<32x32xf32> to vector<15x32xf32>
    %97 = arith.addf %95, %96 : vector<15x32xf32>
    %98 = vector.broadcast %27 : vector<1x32xf32> to vector<15x32xf32>
    %99 = arith.addf %97, %98 : vector<15x32xf32>
    %cst_48 = arith.constant 0.000000e+00 : f32
    %100 = vector.broadcast %cst_48 : f32 to vector<15x32xf32>
    %101 = arith.maximumf %99, %100 : vector<15x32xf32>
    %cst_49 = arith.constant dense<0xFF800000> : vector<32xf32>
    %102 = vector.multi_reduction <maximumf>, %101, %cst_49 [0] : vector<15x32xf32> to vector<32xf32>
    %103 = vector.shape_cast %102 : vector<32xf32> to vector<1x32xf32>
    %104 = vector.extract_strided_slice %29 {offsets = [0, 0], sizes = [32, 32], strides = [1, 1]} : vector<96x32xf32> to vector<32x32xf32>
    %cst_50 = arith.constant dense<0.000000e+00> : vector<32x32xf32>
    %105 = tpu.matmul %15, %104, %cst_50 {dimension_numbers = #tpu.dot_dimension_numbers<[1], [0], [0], [1], [0, 0, 1, 1], [], []>} : vector<32x32xf32>, vector<32x32xf32>, vector<32x32xf32> -> vector<32x32xf32>
    %106 = vector.extract_strided_slice %29 {offsets = [32, 0], sizes = [32, 32], strides = [1, 1]} : vector<96x32xf32> to vector<32x32xf32>
    %cst_51 = arith.constant dense<0.000000e+00> : vector<32x32xf32>
    %107 = tpu.matmul %15, %106, %cst_51 {dimension_numbers = #tpu.dot_dimension_numbers<[1], [0], [0], [1], [0, 0, 1, 1], [], []>} : vector<32x32xf32>, vector<32x32xf32>, vector<32x32xf32> -> vector<32x32xf32>
    %108 = vector.extract_strided_slice %29 {offsets = [64, 0], sizes = [32, 32], strides = [1, 1]} : vector<96x32xf32> to vector<32x32xf32>
    %cst_52 = arith.constant dense<0.000000e+00> : vector<32x32xf32>
    %109 = tpu.matmul %15, %108, %cst_52 {dimension_numbers = #tpu.dot_dimension_numbers<[1], [0], [0], [1], [0, 0, 1, 1], [], []>} : vector<32x32xf32>, vector<32x32xf32>, vector<32x32xf32> -> vector<32x32xf32>
    %110 = vector.extract_strided_slice %105 {offsets = [0, 0], sizes = [14, 32], strides = [1, 1]} : vector<32x32xf32> to vector<14x32xf32>
    %111 = vector.extract_strided_slice %107 {offsets = [1, 0], sizes = [14, 32], strides = [1, 1]} : vector<32x32xf32> to vector<14x32xf32>
    %112 = arith.addf %110, %111 : vector<14x32xf32>
    %113 = vector.extract_strided_slice %109 {offsets = [2, 0], sizes = [14, 32], strides = [1, 1]} : vector<32x32xf32> to vector<14x32xf32>
    %114 = arith.addf %112, %113 : vector<14x32xf32>
    %115 = vector.broadcast %31 : vector<1x32xf32> to vector<14x32xf32>
    %116 = arith.addf %114, %115 : vector<14x32xf32>
    %cst_53 = arith.constant 0.000000e+00 : f32
    %117 = vector.broadcast %cst_53 : f32 to vector<14x32xf32>
    %118 = arith.maximumf %116, %117 : vector<14x32xf32>
    %cst_54 = arith.constant dense<0xFF800000> : vector<32xf32>
    %119 = vector.multi_reduction <maximumf>, %118, %cst_54 [0] : vector<14x32xf32> to vector<32xf32>
    %120 = vector.shape_cast %119 : vector<32xf32> to vector<1x32xf32>
    %121 = vector.extract_strided_slice %105 {offsets = [16, 0], sizes = [14, 32], strides = [1, 1]} : vector<32x32xf32> to vector<14x32xf32>
    %122 = vector.extract_strided_slice %107 {offsets = [17, 0], sizes = [14, 32], strides = [1, 1]} : vector<32x32xf32> to vector<14x32xf32>
    %123 = arith.addf %121, %122 : vector<14x32xf32>
    %124 = vector.extract_strided_slice %109 {offsets = [18, 0], sizes = [14, 32], strides = [1, 1]} : vector<32x32xf32> to vector<14x32xf32>
    %125 = arith.addf %123, %124 : vector<14x32xf32>
    %126 = vector.broadcast %31 : vector<1x32xf32> to vector<14x32xf32>
    %127 = arith.addf %125, %126 : vector<14x32xf32>
    %cst_55 = arith.constant 0.000000e+00 : f32
    %128 = vector.broadcast %cst_55 : f32 to vector<14x32xf32>
    %129 = arith.maximumf %127, %128 : vector<14x32xf32>
    %cst_56 = arith.constant dense<0xFF800000> : vector<32xf32>
    %130 = vector.multi_reduction <maximumf>, %129, %cst_56 [0] : vector<14x32xf32> to vector<32xf32>
    %131 = vector.shape_cast %130 : vector<32xf32> to vector<1x32xf32>
    %c1 = arith.constant 1 : index
    %c0_57 = arith.constant 0 : index
    %c0_58 = arith.constant 0 : index
    %132 = vector.load %arg2[%c1, %c0_57, %c0_58] : memref<5x100x32xf32, #tpu.memory_space<vmem>>, vector<1x100x32xf32>
    %133 = vector.shape_cast %132 : vector<1x100x32xf32> to vector<100x32xf32>
    %cst_59 = arith.constant dense<0.000000e+00> : vector<16x32xf32>
    %134 = tpu.matmul %5, %133, %cst_59 {dimension_numbers = #tpu.dot_dimension_numbers<[1], [0], [0], [1], [0, 0, 1, 1], [], []>} : vector<16x100xf32>, vector<100x32xf32>, vector<16x32xf32> -> vector<16x32xf32>
    %cst_60 = arith.constant dense<0.000000e+00> : vector<32x32xf32>
    %135 = tpu.matmul %11, %133, %cst_60 {dimension_numbers = #tpu.dot_dimension_numbers<[1], [0], [0], [1], [0, 0, 1, 1], [], []>} : vector<32x100xf32>, vector<100x32xf32>, vector<32x32xf32> -> vector<32x32xf32>
    %c1_61 = arith.constant 1 : index
    %c0_62 = arith.constant 0 : index
    %c0_63 = arith.constant 0 : index
    %136 = vector.load %arg3[%c1_61, %c0_62, %c0_63] : memref<5x64x32xf32, #tpu.memory_space<vmem>>, vector<1x64x32xf32>
    %137 = vector.shape_cast %136 : vector<1x64x32xf32> to vector<64x32xf32>
    %c1_64 = arith.constant 1 : index
    %c0_65 = arith.constant 0 : index
    %c0_66 = arith.constant 0 : index
    %138 = vector.load %arg4[%c1_64, %c0_65, %c0_66] : memref<5x1x32xf32, #tpu.memory_space<vmem>>, vector<1x1x32xf32>
    %139 = vector.shape_cast %138 : vector<1x1x32xf32> to vector<1x32xf32>
    %c1_67 = arith.constant 1 : index
    %c0_68 = arith.constant 0 : index
    %c0_69 = arith.constant 0 : index
    %140 = vector.load %arg5[%c1_67, %c0_68, %c0_69] : memref<5x96x32xf32, #tpu.memory_space<vmem>>, vector<1x96x32xf32>
    %141 = vector.shape_cast %140 : vector<1x96x32xf32> to vector<96x32xf32>
    %c1_70 = arith.constant 1 : index
    %c0_71 = arith.constant 0 : index
    %c0_72 = arith.constant 0 : index
    %142 = vector.load %arg6[%c1_70, %c0_71, %c0_72] : memref<5x1x32xf32, #tpu.memory_space<vmem>>, vector<1x1x32xf32>
    %143 = vector.shape_cast %142 : vector<1x1x32xf32> to vector<1x32xf32>
    %c1_73 = arith.constant 1 : index
    %c0_74 = arith.constant 0 : index
    %c0_75 = arith.constant 0 : index
    %144 = vector.load %arg7[%c1_73, %c0_74, %c0_75] : memref<5x64x32xf32, #tpu.memory_space<vmem>>, vector<1x64x32xf32>
    %145 = vector.shape_cast %144 : vector<1x64x32xf32> to vector<64x32xf32>
    %c1_76 = arith.constant 1 : index
    %c0_77 = arith.constant 0 : index
    %c0_78 = arith.constant 0 : index
    %146 = vector.load %arg8[%c1_76, %c0_77, %c0_78] : memref<5x1x32xf32, #tpu.memory_space<vmem>>, vector<1x1x32xf32>
    %147 = vector.shape_cast %146 : vector<1x1x32xf32> to vector<1x32xf32>
    %c1_79 = arith.constant 1 : index
    %c0_80 = arith.constant 0 : index
    %c0_81 = arith.constant 0 : index
    %148 = vector.load %arg9[%c1_79, %c0_80, %c0_81] : memref<5x96x32xf32, #tpu.memory_space<vmem>>, vector<1x96x32xf32>
    %149 = vector.shape_cast %148 : vector<1x96x32xf32> to vector<96x32xf32>
    %c1_82 = arith.constant 1 : index
    %c0_83 = arith.constant 0 : index
    %c0_84 = arith.constant 0 : index
    %150 = vector.load %arg10[%c1_82, %c0_83, %c0_84] : memref<5x1x32xf32, #tpu.memory_space<vmem>>, vector<1x1x32xf32>
    %151 = vector.shape_cast %150 : vector<1x1x32xf32> to vector<1x32xf32>
    %152 = vector.extract_strided_slice %137 {offsets = [0, 0], sizes = [32, 32], strides = [1, 1]} : vector<64x32xf32> to vector<32x32xf32>
    %cst_85 = arith.constant dense<0.000000e+00> : vector<16x32xf32>
    %153 = tpu.matmul %134, %152, %cst_85 {dimension_numbers = #tpu.dot_dimension_numbers<[1], [0], [0], [1], [0, 0, 1, 1], [], []>} : vector<16x32xf32>, vector<32x32xf32>, vector<16x32xf32> -> vector<16x32xf32>
    %154 = vector.extract_strided_slice %137 {offsets = [32, 0], sizes = [32, 32], strides = [1, 1]} : vector<64x32xf32> to vector<32x32xf32>
    %cst_86 = arith.constant dense<0.000000e+00> : vector<16x32xf32>
    %155 = tpu.matmul %134, %154, %cst_86 {dimension_numbers = #tpu.dot_dimension_numbers<[1], [0], [0], [1], [0, 0, 1, 1], [], []>} : vector<16x32xf32>, vector<32x32xf32>, vector<16x32xf32> -> vector<16x32xf32>
    %156 = vector.extract_strided_slice %153 {offsets = [0, 0], sizes = [7, 32], strides = [1, 1]} : vector<16x32xf32> to vector<7x32xf32>
    %157 = vector.extract_strided_slice %155 {offsets = [1, 0], sizes = [7, 32], strides = [1, 1]} : vector<16x32xf32> to vector<7x32xf32>
    %158 = arith.addf %156, %157 : vector<7x32xf32>
    %159 = vector.broadcast %139 : vector<1x32xf32> to vector<7x32xf32>
    %160 = arith.addf %158, %159 : vector<7x32xf32>
    %cst_87 = arith.constant 0.000000e+00 : f32
    %161 = vector.broadcast %cst_87 : f32 to vector<7x32xf32>
    %162 = arith.maximumf %160, %161 : vector<7x32xf32>
    %cst_88 = arith.constant dense<0xFF800000> : vector<32xf32>
    %163 = vector.multi_reduction <maximumf>, %162, %cst_88 [0] : vector<7x32xf32> to vector<32xf32>
    %164 = vector.shape_cast %163 : vector<32xf32> to vector<1x32xf32>
    %165 = vector.extract_strided_slice %153 {offsets = [8, 0], sizes = [7, 32], strides = [1, 1]} : vector<16x32xf32> to vector<7x32xf32>
    %166 = vector.extract_strided_slice %155 {offsets = [9, 0], sizes = [7, 32], strides = [1, 1]} : vector<16x32xf32> to vector<7x32xf32>
    %167 = arith.addf %165, %166 : vector<7x32xf32>
    %168 = vector.broadcast %139 : vector<1x32xf32> to vector<7x32xf32>
    %169 = arith.addf %167, %168 : vector<7x32xf32>
    %cst_89 = arith.constant 0.000000e+00 : f32
    %170 = vector.broadcast %cst_89 : f32 to vector<7x32xf32>
    %171 = arith.maximumf %169, %170 : vector<7x32xf32>
    %cst_90 = arith.constant dense<0xFF800000> : vector<32xf32>
    %172 = vector.multi_reduction <maximumf>, %171, %cst_90 [0] : vector<7x32xf32> to vector<32xf32>
    %173 = vector.shape_cast %172 : vector<32xf32> to vector<1x32xf32>
    %174 = vector.extract_strided_slice %141 {offsets = [0, 0], sizes = [32, 32], strides = [1, 1]} : vector<96x32xf32> to vector<32x32xf32>
    %cst_91 = arith.constant dense<0.000000e+00> : vector<16x32xf32>
    %175 = tpu.matmul %134, %174, %cst_91 {dimension_numbers = #tpu.dot_dimension_numbers<[1], [0], [0], [1], [0, 0, 1, 1], [], []>} : vector<16x32xf32>, vector<32x32xf32>, vector<16x32xf32> -> vector<16x32xf32>
    %176 = vector.extract_strided_slice %141 {offsets = [32, 0], sizes = [32, 32], strides = [1, 1]} : vector<96x32xf32> to vector<32x32xf32>
    %cst_92 = arith.constant dense<0.000000e+00> : vector<16x32xf32>
    %177 = tpu.matmul %134, %176, %cst_92 {dimension_numbers = #tpu.dot_dimension_numbers<[1], [0], [0], [1], [0, 0, 1, 1], [], []>} : vector<16x32xf32>, vector<32x32xf32>, vector<16x32xf32> -> vector<16x32xf32>
    %178 = vector.extract_strided_slice %141 {offsets = [64, 0], sizes = [32, 32], strides = [1, 1]} : vector<96x32xf32> to vector<32x32xf32>
    %cst_93 = arith.constant dense<0.000000e+00> : vector<16x32xf32>
    %179 = tpu.matmul %134, %178, %cst_93 {dimension_numbers = #tpu.dot_dimension_numbers<[1], [0], [0], [1], [0, 0, 1, 1], [], []>} : vector<16x32xf32>, vector<32x32xf32>, vector<16x32xf32> -> vector<16x32xf32>
    %180 = vector.extract_strided_slice %175 {offsets = [0, 0], sizes = [6, 32], strides = [1, 1]} : vector<16x32xf32> to vector<6x32xf32>
    %181 = vector.extract_strided_slice %177 {offsets = [1, 0], sizes = [6, 32], strides = [1, 1]} : vector<16x32xf32> to vector<6x32xf32>
    %182 = arith.addf %180, %181 : vector<6x32xf32>
    %183 = vector.extract_strided_slice %179 {offsets = [2, 0], sizes = [6, 32], strides = [1, 1]} : vector<16x32xf32> to vector<6x32xf32>
    %184 = arith.addf %182, %183 : vector<6x32xf32>
    %185 = vector.broadcast %143 : vector<1x32xf32> to vector<6x32xf32>
    %186 = arith.addf %184, %185 : vector<6x32xf32>
    %cst_94 = arith.constant 0.000000e+00 : f32
    %187 = vector.broadcast %cst_94 : f32 to vector<6x32xf32>
    %188 = arith.maximumf %186, %187 : vector<6x32xf32>
    %cst_95 = arith.constant dense<0xFF800000> : vector<32xf32>
    %189 = vector.multi_reduction <maximumf>, %188, %cst_95 [0] : vector<6x32xf32> to vector<32xf32>
    %190 = vector.shape_cast %189 : vector<32xf32> to vector<1x32xf32>
    %191 = vector.extract_strided_slice %175 {offsets = [8, 0], sizes = [6, 32], strides = [1, 1]} : vector<16x32xf32> to vector<6x32xf32>
    %192 = vector.extract_strided_slice %177 {offsets = [9, 0], sizes = [6, 32], strides = [1, 1]} : vector<16x32xf32> to vector<6x32xf32>
    %193 = arith.addf %191, %192 : vector<6x32xf32>
    %194 = vector.extract_strided_slice %179 {offsets = [10, 0], sizes = [6, 32], strides = [1, 1]} : vector<16x32xf32> to vector<6x32xf32>
    %195 = arith.addf %193, %194 : vector<6x32xf32>
    %196 = vector.broadcast %143 : vector<1x32xf32> to vector<6x32xf32>
    %197 = arith.addf %195, %196 : vector<6x32xf32>
    %cst_96 = arith.constant 0.000000e+00 : f32
    %198 = vector.broadcast %cst_96 : f32 to vector<6x32xf32>
    %199 = arith.maximumf %197, %198 : vector<6x32xf32>
    %cst_97 = arith.constant dense<0xFF800000> : vector<32xf32>
    %200 = vector.multi_reduction <maximumf>, %199, %cst_97 [0] : vector<6x32xf32> to vector<32xf32>
    %201 = vector.shape_cast %200 : vector<32xf32> to vector<1x32xf32>
    %202 = vector.extract_strided_slice %145 {offsets = [0, 0], sizes = [32, 32], strides = [1, 1]} : vector<64x32xf32> to vector<32x32xf32>
    %cst_98 = arith.constant dense<0.000000e+00> : vector<32x32xf32>
    %203 = tpu.matmul %135, %202, %cst_98 {dimension_numbers = #tpu.dot_dimension_numbers<[1], [0], [0], [1], [0, 0, 1, 1], [], []>} : vector<32x32xf32>, vector<32x32xf32>, vector<32x32xf32> -> vector<32x32xf32>
    %204 = vector.extract_strided_slice %145 {offsets = [32, 0], sizes = [32, 32], strides = [1, 1]} : vector<64x32xf32> to vector<32x32xf32>
    %cst_99 = arith.constant dense<0.000000e+00> : vector<32x32xf32>
    %205 = tpu.matmul %135, %204, %cst_99 {dimension_numbers = #tpu.dot_dimension_numbers<[1], [0], [0], [1], [0, 0, 1, 1], [], []>} : vector<32x32xf32>, vector<32x32xf32>, vector<32x32xf32> -> vector<32x32xf32>
    %206 = vector.extract_strided_slice %203 {offsets = [0, 0], sizes = [15, 32], strides = [1, 1]} : vector<32x32xf32> to vector<15x32xf32>
    %207 = vector.extract_strided_slice %205 {offsets = [1, 0], sizes = [15, 32], strides = [1, 1]} : vector<32x32xf32> to vector<15x32xf32>
    %208 = arith.addf %206, %207 : vector<15x32xf32>
    %209 = vector.broadcast %147 : vector<1x32xf32> to vector<15x32xf32>
    %210 = arith.addf %208, %209 : vector<15x32xf32>
    %cst_100 = arith.constant 0.000000e+00 : f32
    %211 = vector.broadcast %cst_100 : f32 to vector<15x32xf32>
    %212 = arith.maximumf %210, %211 : vector<15x32xf32>
    %cst_101 = arith.constant dense<0xFF800000> : vector<32xf32>
    %213 = vector.multi_reduction <maximumf>, %212, %cst_101 [0] : vector<15x32xf32> to vector<32xf32>
    %214 = vector.shape_cast %213 : vector<32xf32> to vector<1x32xf32>
    %215 = vector.extract_strided_slice %203 {offsets = [16, 0], sizes = [15, 32], strides = [1, 1]} : vector<32x32xf32> to vector<15x32xf32>
    %216 = vector.extract_strided_slice %205 {offsets = [17, 0], sizes = [15, 32], strides = [1, 1]} : vector<32x32xf32> to vector<15x32xf32>
    %217 = arith.addf %215, %216 : vector<15x32xf32>
    %218 = vector.broadcast %147 : vector<1x32xf32> to vector<15x32xf32>
    %219 = arith.addf %217, %218 : vector<15x32xf32>
    %cst_102 = arith.constant 0.000000e+00 : f32
    %220 = vector.broadcast %cst_102 : f32 to vector<15x32xf32>
    %221 = arith.maximumf %219, %220 : vector<15x32xf32>
    %cst_103 = arith.constant dense<0xFF800000> : vector<32xf32>
    %222 = vector.multi_reduction <maximumf>, %221, %cst_103 [0] : vector<15x32xf32> to vector<32xf32>
    %223 = vector.shape_cast %222 : vector<32xf32> to vector<1x32xf32>
    %224 = vector.extract_strided_slice %149 {offsets = [0, 0], sizes = [32, 32], strides = [1, 1]} : vector<96x32xf32> to vector<32x32xf32>
    %cst_104 = arith.constant dense<0.000000e+00> : vector<32x32xf32>
    %225 = tpu.matmul %135, %224, %cst_104 {dimension_numbers = #tpu.dot_dimension_numbers<[1], [0], [0], [1], [0, 0, 1, 1], [], []>} : vector<32x32xf32>, vector<32x32xf32>, vector<32x32xf32> -> vector<32x32xf32>
    %226 = vector.extract_strided_slice %149 {offsets = [32, 0], sizes = [32, 32], strides = [1, 1]} : vector<96x32xf32> to vector<32x32xf32>
    %cst_105 = arith.constant dense<0.000000e+00> : vector<32x32xf32>
    %227 = tpu.matmul %135, %226, %cst_105 {dimension_numbers = #tpu.dot_dimension_numbers<[1], [0], [0], [1], [0, 0, 1, 1], [], []>} : vector<32x32xf32>, vector<32x32xf32>, vector<32x32xf32> -> vector<32x32xf32>
    %228 = vector.extract_strided_slice %149 {offsets = [64, 0], sizes = [32, 32], strides = [1, 1]} : vector<96x32xf32> to vector<32x32xf32>
    %cst_106 = arith.constant dense<0.000000e+00> : vector<32x32xf32>
    %229 = tpu.matmul %135, %228, %cst_106 {dimension_numbers = #tpu.dot_dimension_numbers<[1], [0], [0], [1], [0, 0, 1, 1], [], []>} : vector<32x32xf32>, vector<32x32xf32>, vector<32x32xf32> -> vector<32x32xf32>
    %230 = vector.extract_strided_slice %225 {offsets = [0, 0], sizes = [14, 32], strides = [1, 1]} : vector<32x32xf32> to vector<14x32xf32>
    %231 = vector.extract_strided_slice %227 {offsets = [1, 0], sizes = [14, 32], strides = [1, 1]} : vector<32x32xf32> to vector<14x32xf32>
    %232 = arith.addf %230, %231 : vector<14x32xf32>
    %233 = vector.extract_strided_slice %229 {offsets = [2, 0], sizes = [14, 32], strides = [1, 1]} : vector<32x32xf32> to vector<14x32xf32>
    %234 = arith.addf %232, %233 : vector<14x32xf32>
    %235 = vector.broadcast %151 : vector<1x32xf32> to vector<14x32xf32>
    %236 = arith.addf %234, %235 : vector<14x32xf32>
    %cst_107 = arith.constant 0.000000e+00 : f32
    %237 = vector.broadcast %cst_107 : f32 to vector<14x32xf32>
    %238 = arith.maximumf %236, %237 : vector<14x32xf32>
    %cst_108 = arith.constant dense<0xFF800000> : vector<32xf32>
    %239 = vector.multi_reduction <maximumf>, %238, %cst_108 [0] : vector<14x32xf32> to vector<32xf32>
    %240 = vector.shape_cast %239 : vector<32xf32> to vector<1x32xf32>
    %241 = vector.extract_strided_slice %225 {offsets = [16, 0], sizes = [14, 32], strides = [1, 1]} : vector<32x32xf32> to vector<14x32xf32>
    %242 = vector.extract_strided_slice %227 {offsets = [17, 0], sizes = [14, 32], strides = [1, 1]} : vector<32x32xf32> to vector<14x32xf32>
    %243 = arith.addf %241, %242 : vector<14x32xf32>
    %244 = vector.extract_strided_slice %229 {offsets = [18, 0], sizes = [14, 32], strides = [1, 1]} : vector<32x32xf32> to vector<14x32xf32>
    %245 = arith.addf %243, %244 : vector<14x32xf32>
    %246 = vector.broadcast %151 : vector<1x32xf32> to vector<14x32xf32>
    %247 = arith.addf %245, %246 : vector<14x32xf32>
    %cst_109 = arith.constant 0.000000e+00 : f32
    %248 = vector.broadcast %cst_109 : f32 to vector<14x32xf32>
    %249 = arith.maximumf %247, %248 : vector<14x32xf32>
    %cst_110 = arith.constant dense<0xFF800000> : vector<32xf32>
    %250 = vector.multi_reduction <maximumf>, %249, %cst_110 [0] : vector<14x32xf32> to vector<32xf32>
    %251 = vector.shape_cast %250 : vector<32xf32> to vector<1x32xf32>
    %c2 = arith.constant 2 : index
    %c0_111 = arith.constant 0 : index
    %c0_112 = arith.constant 0 : index
    %252 = vector.load %arg2[%c2, %c0_111, %c0_112] : memref<5x100x32xf32, #tpu.memory_space<vmem>>, vector<1x100x32xf32>
    %253 = vector.shape_cast %252 : vector<1x100x32xf32> to vector<100x32xf32>
    %cst_113 = arith.constant dense<0.000000e+00> : vector<16x32xf32>
    %254 = tpu.matmul %5, %253, %cst_113 {dimension_numbers = #tpu.dot_dimension_numbers<[1], [0], [0], [1], [0, 0, 1, 1], [], []>} : vector<16x100xf32>, vector<100x32xf32>, vector<16x32xf32> -> vector<16x32xf32>
    %cst_114 = arith.constant dense<0.000000e+00> : vector<32x32xf32>
    %255 = tpu.matmul %11, %253, %cst_114 {dimension_numbers = #tpu.dot_dimension_numbers<[1], [0], [0], [1], [0, 0, 1, 1], [], []>} : vector<32x100xf32>, vector<100x32xf32>, vector<32x32xf32> -> vector<32x32xf32>
    %c2_115 = arith.constant 2 : index
    %c0_116 = arith.constant 0 : index
    %c0_117 = arith.constant 0 : index
    %256 = vector.load %arg3[%c2_115, %c0_116, %c0_117] : memref<5x64x32xf32, #tpu.memory_space<vmem>>, vector<1x64x32xf32>
    %257 = vector.shape_cast %256 : vector<1x64x32xf32> to vector<64x32xf32>
    %c2_118 = arith.constant 2 : index
    %c0_119 = arith.constant 0 : index
    %c0_120 = arith.constant 0 : index
    %258 = vector.load %arg4[%c2_118, %c0_119, %c0_120] : memref<5x1x32xf32, #tpu.memory_space<vmem>>, vector<1x1x32xf32>
    %259 = vector.shape_cast %258 : vector<1x1x32xf32> to vector<1x32xf32>
    %c2_121 = arith.constant 2 : index
    %c0_122 = arith.constant 0 : index
    %c0_123 = arith.constant 0 : index
    %260 = vector.load %arg5[%c2_121, %c0_122, %c0_123] : memref<5x96x32xf32, #tpu.memory_space<vmem>>, vector<1x96x32xf32>
    %261 = vector.shape_cast %260 : vector<1x96x32xf32> to vector<96x32xf32>
    %c2_124 = arith.constant 2 : index
    %c0_125 = arith.constant 0 : index
    %c0_126 = arith.constant 0 : index
    %262 = vector.load %arg6[%c2_124, %c0_125, %c0_126] : memref<5x1x32xf32, #tpu.memory_space<vmem>>, vector<1x1x32xf32>
    %263 = vector.shape_cast %262 : vector<1x1x32xf32> to vector<1x32xf32>
    %c2_127 = arith.constant 2 : index
    %c0_128 = arith.constant 0 : index
    %c0_129 = arith.constant 0 : index
    %264 = vector.load %arg7[%c2_127, %c0_128, %c0_129] : memref<5x64x32xf32, #tpu.memory_space<vmem>>, vector<1x64x32xf32>
    %265 = vector.shape_cast %264 : vector<1x64x32xf32> to vector<64x32xf32>
    %c2_130 = arith.constant 2 : index
    %c0_131 = arith.constant 0 : index
    %c0_132 = arith.constant 0 : index
    %266 = vector.load %arg8[%c2_130, %c0_131, %c0_132] : memref<5x1x32xf32, #tpu.memory_space<vmem>>, vector<1x1x32xf32>
    %267 = vector.shape_cast %266 : vector<1x1x32xf32> to vector<1x32xf32>
    %c2_133 = arith.constant 2 : index
    %c0_134 = arith.constant 0 : index
    %c0_135 = arith.constant 0 : index
    %268 = vector.load %arg9[%c2_133, %c0_134, %c0_135] : memref<5x96x32xf32, #tpu.memory_space<vmem>>, vector<1x96x32xf32>
    %269 = vector.shape_cast %268 : vector<1x96x32xf32> to vector<96x32xf32>
    %c2_136 = arith.constant 2 : index
    %c0_137 = arith.constant 0 : index
    %c0_138 = arith.constant 0 : index
    %270 = vector.load %arg10[%c2_136, %c0_137, %c0_138] : memref<5x1x32xf32, #tpu.memory_space<vmem>>, vector<1x1x32xf32>
    %271 = vector.shape_cast %270 : vector<1x1x32xf32> to vector<1x32xf32>
    %272 = vector.extract_strided_slice %257 {offsets = [0, 0], sizes = [32, 32], strides = [1, 1]} : vector<64x32xf32> to vector<32x32xf32>
    %cst_139 = arith.constant dense<0.000000e+00> : vector<16x32xf32>
    %273 = tpu.matmul %254, %272, %cst_139 {dimension_numbers = #tpu.dot_dimension_numbers<[1], [0], [0], [1], [0, 0, 1, 1], [], []>} : vector<16x32xf32>, vector<32x32xf32>, vector<16x32xf32> -> vector<16x32xf32>
    %274 = vector.extract_strided_slice %257 {offsets = [32, 0], sizes = [32, 32], strides = [1, 1]} : vector<64x32xf32> to vector<32x32xf32>
    %cst_140 = arith.constant dense<0.000000e+00> : vector<16x32xf32>
    %275 = tpu.matmul %254, %274, %cst_140 {dimension_numbers = #tpu.dot_dimension_numbers<[1], [0], [0], [1], [0, 0, 1, 1], [], []>} : vector<16x32xf32>, vector<32x32xf32>, vector<16x32xf32> -> vector<16x32xf32>
    %276 = vector.extract_strided_slice %273 {offsets = [0, 0], sizes = [7, 32], strides = [1, 1]} : vector<16x32xf32> to vector<7x32xf32>
    %277 = vector.extract_strided_slice %275 {offsets = [1, 0], sizes = [7, 32], strides = [1, 1]} : vector<16x32xf32> to vector<7x32xf32>
    %278 = arith.addf %276, %277 : vector<7x32xf32>
    %279 = vector.broadcast %259 : vector<1x32xf32> to vector<7x32xf32>
    %280 = arith.addf %278, %279 : vector<7x32xf32>
    %cst_141 = arith.constant 0.000000e+00 : f32
    %281 = vector.broadcast %cst_141 : f32 to vector<7x32xf32>
    %282 = arith.maximumf %280, %281 : vector<7x32xf32>
    %cst_142 = arith.constant dense<0xFF800000> : vector<32xf32>
    %283 = vector.multi_reduction <maximumf>, %282, %cst_142 [0] : vector<7x32xf32> to vector<32xf32>
    %284 = vector.shape_cast %283 : vector<32xf32> to vector<1x32xf32>
    %285 = vector.extract_strided_slice %273 {offsets = [8, 0], sizes = [7, 32], strides = [1, 1]} : vector<16x32xf32> to vector<7x32xf32>
    %286 = vector.extract_strided_slice %275 {offsets = [9, 0], sizes = [7, 32], strides = [1, 1]} : vector<16x32xf32> to vector<7x32xf32>
    %287 = arith.addf %285, %286 : vector<7x32xf32>
    %288 = vector.broadcast %259 : vector<1x32xf32> to vector<7x32xf32>
    %289 = arith.addf %287, %288 : vector<7x32xf32>
    %cst_143 = arith.constant 0.000000e+00 : f32
    %290 = vector.broadcast %cst_143 : f32 to vector<7x32xf32>
    %291 = arith.maximumf %289, %290 : vector<7x32xf32>
    %cst_144 = arith.constant dense<0xFF800000> : vector<32xf32>
    %292 = vector.multi_reduction <maximumf>, %291, %cst_144 [0] : vector<7x32xf32> to vector<32xf32>
    %293 = vector.shape_cast %292 : vector<32xf32> to vector<1x32xf32>
    %294 = vector.extract_strided_slice %261 {offsets = [0, 0], sizes = [32, 32], strides = [1, 1]} : vector<96x32xf32> to vector<32x32xf32>
    %cst_145 = arith.constant dense<0.000000e+00> : vector<16x32xf32>
    %295 = tpu.matmul %254, %294, %cst_145 {dimension_numbers = #tpu.dot_dimension_numbers<[1], [0], [0], [1], [0, 0, 1, 1], [], []>} : vector<16x32xf32>, vector<32x32xf32>, vector<16x32xf32> -> vector<16x32xf32>
    %296 = vector.extract_strided_slice %261 {offsets = [32, 0], sizes = [32, 32], strides = [1, 1]} : vector<96x32xf32> to vector<32x32xf32>
    %cst_146 = arith.constant dense<0.000000e+00> : vector<16x32xf32>
    %297 = tpu.matmul %254, %296, %cst_146 {dimension_numbers = #tpu.dot_dimension_numbers<[1], [0], [0], [1], [0, 0, 1, 1], [], []>} : vector<16x32xf32>, vector<32x32xf32>, vector<16x32xf32> -> vector<16x32xf32>
    %298 = vector.extract_strided_slice %261 {offsets = [64, 0], sizes = [32, 32], strides = [1, 1]} : vector<96x32xf32> to vector<32x32xf32>
    %cst_147 = arith.constant dense<0.000000e+00> : vector<16x32xf32>
    %299 = tpu.matmul %254, %298, %cst_147 {dimension_numbers = #tpu.dot_dimension_numbers<[1], [0], [0], [1], [0, 0, 1, 1], [], []>} : vector<16x32xf32>, vector<32x32xf32>, vector<16x32xf32> -> vector<16x32xf32>
    %300 = vector.extract_strided_slice %295 {offsets = [0, 0], sizes = [6, 32], strides = [1, 1]} : vector<16x32xf32> to vector<6x32xf32>
    %301 = vector.extract_strided_slice %297 {offsets = [1, 0], sizes = [6, 32], strides = [1, 1]} : vector<16x32xf32> to vector<6x32xf32>
    %302 = arith.addf %300, %301 : vector<6x32xf32>
    %303 = vector.extract_strided_slice %299 {offsets = [2, 0], sizes = [6, 32], strides = [1, 1]} : vector<16x32xf32> to vector<6x32xf32>
    %304 = arith.addf %302, %303 : vector<6x32xf32>
    %305 = vector.broadcast %263 : vector<1x32xf32> to vector<6x32xf32>
    %306 = arith.addf %304, %305 : vector<6x32xf32>
    %cst_148 = arith.constant 0.000000e+00 : f32
    %307 = vector.broadcast %cst_148 : f32 to vector<6x32xf32>
    %308 = arith.maximumf %306, %307 : vector<6x32xf32>
    %cst_149 = arith.constant dense<0xFF800000> : vector<32xf32>
    %309 = vector.multi_reduction <maximumf>, %308, %cst_149 [0] : vector<6x32xf32> to vector<32xf32>
    %310 = vector.shape_cast %309 : vector<32xf32> to vector<1x32xf32>
    %311 = vector.extract_strided_slice %295 {offsets = [8, 0], sizes = [6, 32], strides = [1, 1]} : vector<16x32xf32> to vector<6x32xf32>
    %312 = vector.extract_strided_slice %297 {offsets = [9, 0], sizes = [6, 32], strides = [1, 1]} : vector<16x32xf32> to vector<6x32xf32>
    %313 = arith.addf %311, %312 : vector<6x32xf32>
    %314 = vector.extract_strided_slice %299 {offsets = [10, 0], sizes = [6, 32], strides = [1, 1]} : vector<16x32xf32> to vector<6x32xf32>
    %315 = arith.addf %313, %314 : vector<6x32xf32>
    %316 = vector.broadcast %263 : vector<1x32xf32> to vector<6x32xf32>
    %317 = arith.addf %315, %316 : vector<6x32xf32>
    %cst_150 = arith.constant 0.000000e+00 : f32
    %318 = vector.broadcast %cst_150 : f32 to vector<6x32xf32>
    %319 = arith.maximumf %317, %318 : vector<6x32xf32>
    %cst_151 = arith.constant dense<0xFF800000> : vector<32xf32>
    %320 = vector.multi_reduction <maximumf>, %319, %cst_151 [0] : vector<6x32xf32> to vector<32xf32>
    %321 = vector.shape_cast %320 : vector<32xf32> to vector<1x32xf32>
    %322 = vector.extract_strided_slice %265 {offsets = [0, 0], sizes = [32, 32], strides = [1, 1]} : vector<64x32xf32> to vector<32x32xf32>
    %cst_152 = arith.constant dense<0.000000e+00> : vector<32x32xf32>
    %323 = tpu.matmul %255, %322, %cst_152 {dimension_numbers = #tpu.dot_dimension_numbers<[1], [0], [0], [1], [0, 0, 1, 1], [], []>} : vector<32x32xf32>, vector<32x32xf32>, vector<32x32xf32> -> vector<32x32xf32>
    %324 = vector.extract_strided_slice %265 {offsets = [32, 0], sizes = [32, 32], strides = [1, 1]} : vector<64x32xf32> to vector<32x32xf32>
    %cst_153 = arith.constant dense<0.000000e+00> : vector<32x32xf32>
    %325 = tpu.matmul %255, %324, %cst_153 {dimension_numbers = #tpu.dot_dimension_numbers<[1], [0], [0], [1], [0, 0, 1, 1], [], []>} : vector<32x32xf32>, vector<32x32xf32>, vector<32x32xf32> -> vector<32x32xf32>
    %326 = vector.extract_strided_slice %323 {offsets = [0, 0], sizes = [15, 32], strides = [1, 1]} : vector<32x32xf32> to vector<15x32xf32>
    %327 = vector.extract_strided_slice %325 {offsets = [1, 0], sizes = [15, 32], strides = [1, 1]} : vector<32x32xf32> to vector<15x32xf32>
    %328 = arith.addf %326, %327 : vector<15x32xf32>
    %329 = vector.broadcast %267 : vector<1x32xf32> to vector<15x32xf32>
    %330 = arith.addf %328, %329 : vector<15x32xf32>
    %cst_154 = arith.constant 0.000000e+00 : f32
    %331 = vector.broadcast %cst_154 : f32 to vector<15x32xf32>
    %332 = arith.maximumf %330, %331 : vector<15x32xf32>
    %cst_155 = arith.constant dense<0xFF800000> : vector<32xf32>
    %333 = vector.multi_reduction <maximumf>, %332, %cst_155 [0] : vector<15x32xf32> to vector<32xf32>
    %334 = vector.shape_cast %333 : vector<32xf32> to vector<1x32xf32>
    %335 = vector.extract_strided_slice %323 {offsets = [16, 0], sizes = [15, 32], strides = [1, 1]} : vector<32x32xf32> to vector<15x32xf32>
    %336 = vector.extract_strided_slice %325 {offsets = [17, 0], sizes = [15, 32], strides = [1, 1]} : vector<32x32xf32> to vector<15x32xf32>
    %337 = arith.addf %335, %336 : vector<15x32xf32>
    %338 = vector.broadcast %267 : vector<1x32xf32> to vector<15x32xf32>
    %339 = arith.addf %337, %338 : vector<15x32xf32>
    %cst_156 = arith.constant 0.000000e+00 : f32
    %340 = vector.broadcast %cst_156 : f32 to vector<15x32xf32>
    %341 = arith.maximumf %339, %340 : vector<15x32xf32>
    %cst_157 = arith.constant dense<0xFF800000> : vector<32xf32>
    %342 = vector.multi_reduction <maximumf>, %341, %cst_157 [0] : vector<15x32xf32> to vector<32xf32>
    %343 = vector.shape_cast %342 : vector<32xf32> to vector<1x32xf32>
    %344 = vector.extract_strided_slice %269 {offsets = [0, 0], sizes = [32, 32], strides = [1, 1]} : vector<96x32xf32> to vector<32x32xf32>
    %cst_158 = arith.constant dense<0.000000e+00> : vector<32x32xf32>
    %345 = tpu.matmul %255, %344, %cst_158 {dimension_numbers = #tpu.dot_dimension_numbers<[1], [0], [0], [1], [0, 0, 1, 1], [], []>} : vector<32x32xf32>, vector<32x32xf32>, vector<32x32xf32> -> vector<32x32xf32>
    %346 = vector.extract_strided_slice %269 {offsets = [32, 0], sizes = [32, 32], strides = [1, 1]} : vector<96x32xf32> to vector<32x32xf32>
    %cst_159 = arith.constant dense<0.000000e+00> : vector<32x32xf32>
    %347 = tpu.matmul %255, %346, %cst_159 {dimension_numbers = #tpu.dot_dimension_numbers<[1], [0], [0], [1], [0, 0, 1, 1], [], []>} : vector<32x32xf32>, vector<32x32xf32>, vector<32x32xf32> -> vector<32x32xf32>
    %348 = vector.extract_strided_slice %269 {offsets = [64, 0], sizes = [32, 32], strides = [1, 1]} : vector<96x32xf32> to vector<32x32xf32>
    %cst_160 = arith.constant dense<0.000000e+00> : vector<32x32xf32>
    %349 = tpu.matmul %255, %348, %cst_160 {dimension_numbers = #tpu.dot_dimension_numbers<[1], [0], [0], [1], [0, 0, 1, 1], [], []>} : vector<32x32xf32>, vector<32x32xf32>, vector<32x32xf32> -> vector<32x32xf32>
    %350 = vector.extract_strided_slice %345 {offsets = [0, 0], sizes = [14, 32], strides = [1, 1]} : vector<32x32xf32> to vector<14x32xf32>
    %351 = vector.extract_strided_slice %347 {offsets = [1, 0], sizes = [14, 32], strides = [1, 1]} : vector<32x32xf32> to vector<14x32xf32>
    %352 = arith.addf %350, %351 : vector<14x32xf32>
    %353 = vector.extract_strided_slice %349 {offsets = [2, 0], sizes = [14, 32], strides = [1, 1]} : vector<32x32xf32> to vector<14x32xf32>
    %354 = arith.addf %352, %353 : vector<14x32xf32>
    %355 = vector.broadcast %271 : vector<1x32xf32> to vector<14x32xf32>
    %356 = arith.addf %354, %355 : vector<14x32xf32>
    %cst_161 = arith.constant 0.000000e+00 : f32
    %357 = vector.broadcast %cst_161 : f32 to vector<14x32xf32>
    %358 = arith.maximumf %356, %357 : vector<14x32xf32>
    %cst_162 = arith.constant dense<0xFF800000> : vector<32xf32>
    %359 = vector.multi_reduction <maximumf>, %358, %cst_162 [0] : vector<14x32xf32> to vector<32xf32>
    %360 = vector.shape_cast %359 : vector<32xf32> to vector<1x32xf32>
    %361 = vector.extract_strided_slice %345 {offsets = [16, 0], sizes = [14, 32], strides = [1, 1]} : vector<32x32xf32> to vector<14x32xf32>
    %362 = vector.extract_strided_slice %347 {offsets = [17, 0], sizes = [14, 32], strides = [1, 1]} : vector<32x32xf32> to vector<14x32xf32>
    %363 = arith.addf %361, %362 : vector<14x32xf32>
    %364 = vector.extract_strided_slice %349 {offsets = [18, 0], sizes = [14, 32], strides = [1, 1]} : vector<32x32xf32> to vector<14x32xf32>
    %365 = arith.addf %363, %364 : vector<14x32xf32>
    %366 = vector.broadcast %271 : vector<1x32xf32> to vector<14x32xf32>
    %367 = arith.addf %365, %366 : vector<14x32xf32>
    %cst_163 = arith.constant 0.000000e+00 : f32
    %368 = vector.broadcast %cst_163 : f32 to vector<14x32xf32>
    %369 = arith.maximumf %367, %368 : vector<14x32xf32>
    %cst_164 = arith.constant dense<0xFF800000> : vector<32xf32>
    %370 = vector.multi_reduction <maximumf>, %369, %cst_164 [0] : vector<14x32xf32> to vector<32xf32>
    %371 = vector.shape_cast %370 : vector<32xf32> to vector<1x32xf32>
    %c3 = arith.constant 3 : index
    %c0_165 = arith.constant 0 : index
    %c0_166 = arith.constant 0 : index
    %372 = vector.load %arg2[%c3, %c0_165, %c0_166] : memref<5x100x32xf32, #tpu.memory_space<vmem>>, vector<1x100x32xf32>
    %373 = vector.shape_cast %372 : vector<1x100x32xf32> to vector<100x32xf32>
    %cst_167 = arith.constant dense<0.000000e+00> : vector<16x32xf32>
    %374 = tpu.matmul %5, %373, %cst_167 {dimension_numbers = #tpu.dot_dimension_numbers<[1], [0], [0], [1], [0, 0, 1, 1], [], []>} : vector<16x100xf32>, vector<100x32xf32>, vector<16x32xf32> -> vector<16x32xf32>
    %cst_168 = arith.constant dense<0.000000e+00> : vector<32x32xf32>
    %375 = tpu.matmul %11, %373, %cst_168 {dimension_numbers = #tpu.dot_dimension_numbers<[1], [0], [0], [1], [0, 0, 1, 1], [], []>} : vector<32x100xf32>, vector<100x32xf32>, vector<32x32xf32> -> vector<32x32xf32>
    %c3_169 = arith.constant 3 : index
    %c0_170 = arith.constant 0 : index
    %c0_171 = arith.constant 0 : index
    %376 = vector.load %arg3[%c3_169, %c0_170, %c0_171] : memref<5x64x32xf32, #tpu.memory_space<vmem>>, vector<1x64x32xf32>
    %377 = vector.shape_cast %376 : vector<1x64x32xf32> to vector<64x32xf32>
    %c3_172 = arith.constant 3 : index
    %c0_173 = arith.constant 0 : index
    %c0_174 = arith.constant 0 : index
    %378 = vector.load %arg4[%c3_172, %c0_173, %c0_174] : memref<5x1x32xf32, #tpu.memory_space<vmem>>, vector<1x1x32xf32>
    %379 = vector.shape_cast %378 : vector<1x1x32xf32> to vector<1x32xf32>
    %c3_175 = arith.constant 3 : index
    %c0_176 = arith.constant 0 : index
    %c0_177 = arith.constant 0 : index
    %380 = vector.load %arg5[%c3_175, %c0_176, %c0_177] : memref<5x96x32xf32, #tpu.memory_space<vmem>>, vector<1x96x32xf32>
    %381 = vector.shape_cast %380 : vector<1x96x32xf32> to vector<96x32xf32>
    %c3_178 = arith.constant 3 : index
    %c0_179 = arith.constant 0 : index
    %c0_180 = arith.constant 0 : index
    %382 = vector.load %arg6[%c3_178, %c0_179, %c0_180] : memref<5x1x32xf32, #tpu.memory_space<vmem>>, vector<1x1x32xf32>
    %383 = vector.shape_cast %382 : vector<1x1x32xf32> to vector<1x32xf32>
    %c3_181 = arith.constant 3 : index
    %c0_182 = arith.constant 0 : index
    %c0_183 = arith.constant 0 : index
    %384 = vector.load %arg7[%c3_181, %c0_182, %c0_183] : memref<5x64x32xf32, #tpu.memory_space<vmem>>, vector<1x64x32xf32>
    %385 = vector.shape_cast %384 : vector<1x64x32xf32> to vector<64x32xf32>
    %c3_184 = arith.constant 3 : index
    %c0_185 = arith.constant 0 : index
    %c0_186 = arith.constant 0 : index
    %386 = vector.load %arg8[%c3_184, %c0_185, %c0_186] : memref<5x1x32xf32, #tpu.memory_space<vmem>>, vector<1x1x32xf32>
    %387 = vector.shape_cast %386 : vector<1x1x32xf32> to vector<1x32xf32>
    %c3_187 = arith.constant 3 : index
    %c0_188 = arith.constant 0 : index
    %c0_189 = arith.constant 0 : index
    %388 = vector.load %arg9[%c3_187, %c0_188, %c0_189] : memref<5x96x32xf32, #tpu.memory_space<vmem>>, vector<1x96x32xf32>
    %389 = vector.shape_cast %388 : vector<1x96x32xf32> to vector<96x32xf32>
    %c3_190 = arith.constant 3 : index
    %c0_191 = arith.constant 0 : index
    %c0_192 = arith.constant 0 : index
    %390 = vector.load %arg10[%c3_190, %c0_191, %c0_192] : memref<5x1x32xf32, #tpu.memory_space<vmem>>, vector<1x1x32xf32>
    %391 = vector.shape_cast %390 : vector<1x1x32xf32> to vector<1x32xf32>
    %392 = vector.extract_strided_slice %377 {offsets = [0, 0], sizes = [32, 32], strides = [1, 1]} : vector<64x32xf32> to vector<32x32xf32>
    %cst_193 = arith.constant dense<0.000000e+00> : vector<16x32xf32>
    %393 = tpu.matmul %374, %392, %cst_193 {dimension_numbers = #tpu.dot_dimension_numbers<[1], [0], [0], [1], [0, 0, 1, 1], [], []>} : vector<16x32xf32>, vector<32x32xf32>, vector<16x32xf32> -> vector<16x32xf32>
    %394 = vector.extract_strided_slice %377 {offsets = [32, 0], sizes = [32, 32], strides = [1, 1]} : vector<64x32xf32> to vector<32x32xf32>
    %cst_194 = arith.constant dense<0.000000e+00> : vector<16x32xf32>
    %395 = tpu.matmul %374, %394, %cst_194 {dimension_numbers = #tpu.dot_dimension_numbers<[1], [0], [0], [1], [0, 0, 1, 1], [], []>} : vector<16x32xf32>, vector<32x32xf32>, vector<16x32xf32> -> vector<16x32xf32>
    %396 = vector.extract_strided_slice %393 {offsets = [0, 0], sizes = [7, 32], strides = [1, 1]} : vector<16x32xf32> to vector<7x32xf32>
    %397 = vector.extract_strided_slice %395 {offsets = [1, 0], sizes = [7, 32], strides = [1, 1]} : vector<16x32xf32> to vector<7x32xf32>
    %398 = arith.addf %396, %397 : vector<7x32xf32>
    %399 = vector.broadcast %379 : vector<1x32xf32> to vector<7x32xf32>
    %400 = arith.addf %398, %399 : vector<7x32xf32>
    %cst_195 = arith.constant 0.000000e+00 : f32
    %401 = vector.broadcast %cst_195 : f32 to vector<7x32xf32>
    %402 = arith.maximumf %400, %401 : vector<7x32xf32>
    %cst_196 = arith.constant dense<0xFF800000> : vector<32xf32>
    %403 = vector.multi_reduction <maximumf>, %402, %cst_196 [0] : vector<7x32xf32> to vector<32xf32>
    %404 = vector.shape_cast %403 : vector<32xf32> to vector<1x32xf32>
    %405 = vector.extract_strided_slice %393 {offsets = [8, 0], sizes = [7, 32], strides = [1, 1]} : vector<16x32xf32> to vector<7x32xf32>
    %406 = vector.extract_strided_slice %395 {offsets = [9, 0], sizes = [7, 32], strides = [1, 1]} : vector<16x32xf32> to vector<7x32xf32>
    %407 = arith.addf %405, %406 : vector<7x32xf32>
    %408 = vector.broadcast %379 : vector<1x32xf32> to vector<7x32xf32>
    %409 = arith.addf %407, %408 : vector<7x32xf32>
    %cst_197 = arith.constant 0.000000e+00 : f32
    %410 = vector.broadcast %cst_197 : f32 to vector<7x32xf32>
    %411 = arith.maximumf %409, %410 : vector<7x32xf32>
    %cst_198 = arith.constant dense<0xFF800000> : vector<32xf32>
    %412 = vector.multi_reduction <maximumf>, %411, %cst_198 [0] : vector<7x32xf32> to vector<32xf32>
    %413 = vector.shape_cast %412 : vector<32xf32> to vector<1x32xf32>
    %414 = vector.extract_strided_slice %381 {offsets = [0, 0], sizes = [32, 32], strides = [1, 1]} : vector<96x32xf32> to vector<32x32xf32>
    %cst_199 = arith.constant dense<0.000000e+00> : vector<16x32xf32>
    %415 = tpu.matmul %374, %414, %cst_199 {dimension_numbers = #tpu.dot_dimension_numbers<[1], [0], [0], [1], [0, 0, 1, 1], [], []>} : vector<16x32xf32>, vector<32x32xf32>, vector<16x32xf32> -> vector<16x32xf32>
    %416 = vector.extract_strided_slice %381 {offsets = [32, 0], sizes = [32, 32], strides = [1, 1]} : vector<96x32xf32> to vector<32x32xf32>
    %cst_200 = arith.constant dense<0.000000e+00> : vector<16x32xf32>
    %417 = tpu.matmul %374, %416, %cst_200 {dimension_numbers = #tpu.dot_dimension_numbers<[1], [0], [0], [1], [0, 0, 1, 1], [], []>} : vector<16x32xf32>, vector<32x32xf32>, vector<16x32xf32> -> vector<16x32xf32>
    %418 = vector.extract_strided_slice %381 {offsets = [64, 0], sizes = [32, 32], strides = [1, 1]} : vector<96x32xf32> to vector<32x32xf32>
    %cst_201 = arith.constant dense<0.000000e+00> : vector<16x32xf32>
    %419 = tpu.matmul %374, %418, %cst_201 {dimension_numbers = #tpu.dot_dimension_numbers<[1], [0], [0], [1], [0, 0, 1, 1], [], []>} : vector<16x32xf32>, vector<32x32xf32>, vector<16x32xf32> -> vector<16x32xf32>
    %420 = vector.extract_strided_slice %415 {offsets = [0, 0], sizes = [6, 32], strides = [1, 1]} : vector<16x32xf32> to vector<6x32xf32>
    %421 = vector.extract_strided_slice %417 {offsets = [1, 0], sizes = [6, 32], strides = [1, 1]} : vector<16x32xf32> to vector<6x32xf32>
    %422 = arith.addf %420, %421 : vector<6x32xf32>
    %423 = vector.extract_strided_slice %419 {offsets = [2, 0], sizes = [6, 32], strides = [1, 1]} : vector<16x32xf32> to vector<6x32xf32>
    %424 = arith.addf %422, %423 : vector<6x32xf32>
    %425 = vector.broadcast %383 : vector<1x32xf32> to vector<6x32xf32>
    %426 = arith.addf %424, %425 : vector<6x32xf32>
    %cst_202 = arith.constant 0.000000e+00 : f32
    %427 = vector.broadcast %cst_202 : f32 to vector<6x32xf32>
    %428 = arith.maximumf %426, %427 : vector<6x32xf32>
    %cst_203 = arith.constant dense<0xFF800000> : vector<32xf32>
    %429 = vector.multi_reduction <maximumf>, %428, %cst_203 [0] : vector<6x32xf32> to vector<32xf32>
    %430 = vector.shape_cast %429 : vector<32xf32> to vector<1x32xf32>
    %431 = vector.extract_strided_slice %415 {offsets = [8, 0], sizes = [6, 32], strides = [1, 1]} : vector<16x32xf32> to vector<6x32xf32>
    %432 = vector.extract_strided_slice %417 {offsets = [9, 0], sizes = [6, 32], strides = [1, 1]} : vector<16x32xf32> to vector<6x32xf32>
    %433 = arith.addf %431, %432 : vector<6x32xf32>
    %434 = vector.extract_strided_slice %419 {offsets = [10, 0], sizes = [6, 32], strides = [1, 1]} : vector<16x32xf32> to vector<6x32xf32>
    %435 = arith.addf %433, %434 : vector<6x32xf32>
    %436 = vector.broadcast %383 : vector<1x32xf32> to vector<6x32xf32>
    %437 = arith.addf %435, %436 : vector<6x32xf32>
    %cst_204 = arith.constant 0.000000e+00 : f32
    %438 = vector.broadcast %cst_204 : f32 to vector<6x32xf32>
    %439 = arith.maximumf %437, %438 : vector<6x32xf32>
    %cst_205 = arith.constant dense<0xFF800000> : vector<32xf32>
    %440 = vector.multi_reduction <maximumf>, %439, %cst_205 [0] : vector<6x32xf32> to vector<32xf32>
    %441 = vector.shape_cast %440 : vector<32xf32> to vector<1x32xf32>
    %442 = vector.extract_strided_slice %385 {offsets = [0, 0], sizes = [32, 32], strides = [1, 1]} : vector<64x32xf32> to vector<32x32xf32>
    %cst_206 = arith.constant dense<0.000000e+00> : vector<32x32xf32>
    %443 = tpu.matmul %375, %442, %cst_206 {dimension_numbers = #tpu.dot_dimension_numbers<[1], [0], [0], [1], [0, 0, 1, 1], [], []>} : vector<32x32xf32>, vector<32x32xf32>, vector<32x32xf32> -> vector<32x32xf32>
    %444 = vector.extract_strided_slice %385 {offsets = [32, 0], sizes = [32, 32], strides = [1, 1]} : vector<64x32xf32> to vector<32x32xf32>
    %cst_207 = arith.constant dense<0.000000e+00> : vector<32x32xf32>
    %445 = tpu.matmul %375, %444, %cst_207 {dimension_numbers = #tpu.dot_dimension_numbers<[1], [0], [0], [1], [0, 0, 1, 1], [], []>} : vector<32x32xf32>, vector<32x32xf32>, vector<32x32xf32> -> vector<32x32xf32>
    %446 = vector.extract_strided_slice %443 {offsets = [0, 0], sizes = [15, 32], strides = [1, 1]} : vector<32x32xf32> to vector<15x32xf32>
    %447 = vector.extract_strided_slice %445 {offsets = [1, 0], sizes = [15, 32], strides = [1, 1]} : vector<32x32xf32> to vector<15x32xf32>
    %448 = arith.addf %446, %447 : vector<15x32xf32>
    %449 = vector.broadcast %387 : vector<1x32xf32> to vector<15x32xf32>
    %450 = arith.addf %448, %449 : vector<15x32xf32>
    %cst_208 = arith.constant 0.000000e+00 : f32
    %451 = vector.broadcast %cst_208 : f32 to vector<15x32xf32>
    %452 = arith.maximumf %450, %451 : vector<15x32xf32>
    %cst_209 = arith.constant dense<0xFF800000> : vector<32xf32>
    %453 = vector.multi_reduction <maximumf>, %452, %cst_209 [0] : vector<15x32xf32> to vector<32xf32>
    %454 = vector.shape_cast %453 : vector<32xf32> to vector<1x32xf32>
    %455 = vector.extract_strided_slice %443 {offsets = [16, 0], sizes = [15, 32], strides = [1, 1]} : vector<32x32xf32> to vector<15x32xf32>
    %456 = vector.extract_strided_slice %445 {offsets = [17, 0], sizes = [15, 32], strides = [1, 1]} : vector<32x32xf32> to vector<15x32xf32>
    %457 = arith.addf %455, %456 : vector<15x32xf32>
    %458 = vector.broadcast %387 : vector<1x32xf32> to vector<15x32xf32>
    %459 = arith.addf %457, %458 : vector<15x32xf32>
    %cst_210 = arith.constant 0.000000e+00 : f32
    %460 = vector.broadcast %cst_210 : f32 to vector<15x32xf32>
    %461 = arith.maximumf %459, %460 : vector<15x32xf32>
    %cst_211 = arith.constant dense<0xFF800000> : vector<32xf32>
    %462 = vector.multi_reduction <maximumf>, %461, %cst_211 [0] : vector<15x32xf32> to vector<32xf32>
    %463 = vector.shape_cast %462 : vector<32xf32> to vector<1x32xf32>
    %464 = vector.extract_strided_slice %389 {offsets = [0, 0], sizes = [32, 32], strides = [1, 1]} : vector<96x32xf32> to vector<32x32xf32>
    %cst_212 = arith.constant dense<0.000000e+00> : vector<32x32xf32>
    %465 = tpu.matmul %375, %464, %cst_212 {dimension_numbers = #tpu.dot_dimension_numbers<[1], [0], [0], [1], [0, 0, 1, 1], [], []>} : vector<32x32xf32>, vector<32x32xf32>, vector<32x32xf32> -> vector<32x32xf32>
    %466 = vector.extract_strided_slice %389 {offsets = [32, 0], sizes = [32, 32], strides = [1, 1]} : vector<96x32xf32> to vector<32x32xf32>
    %cst_213 = arith.constant dense<0.000000e+00> : vector<32x32xf32>
    %467 = tpu.matmul %375, %466, %cst_213 {dimension_numbers = #tpu.dot_dimension_numbers<[1], [0], [0], [1], [0, 0, 1, 1], [], []>} : vector<32x32xf32>, vector<32x32xf32>, vector<32x32xf32> -> vector<32x32xf32>
    %468 = vector.extract_strided_slice %389 {offsets = [64, 0], sizes = [32, 32], strides = [1, 1]} : vector<96x32xf32> to vector<32x32xf32>
    %cst_214 = arith.constant dense<0.000000e+00> : vector<32x32xf32>
    %469 = tpu.matmul %375, %468, %cst_214 {dimension_numbers = #tpu.dot_dimension_numbers<[1], [0], [0], [1], [0, 0, 1, 1], [], []>} : vector<32x32xf32>, vector<32x32xf32>, vector<32x32xf32> -> vector<32x32xf32>
    %470 = vector.extract_strided_slice %465 {offsets = [0, 0], sizes = [14, 32], strides = [1, 1]} : vector<32x32xf32> to vector<14x32xf32>
    %471 = vector.extract_strided_slice %467 {offsets = [1, 0], sizes = [14, 32], strides = [1, 1]} : vector<32x32xf32> to vector<14x32xf32>
    %472 = arith.addf %470, %471 : vector<14x32xf32>
    %473 = vector.extract_strided_slice %469 {offsets = [2, 0], sizes = [14, 32], strides = [1, 1]} : vector<32x32xf32> to vector<14x32xf32>
    %474 = arith.addf %472, %473 : vector<14x32xf32>
    %475 = vector.broadcast %391 : vector<1x32xf32> to vector<14x32xf32>
    %476 = arith.addf %474, %475 : vector<14x32xf32>
    %cst_215 = arith.constant 0.000000e+00 : f32
    %477 = vector.broadcast %cst_215 : f32 to vector<14x32xf32>
    %478 = arith.maximumf %476, %477 : vector<14x32xf32>
    %cst_216 = arith.constant dense<0xFF800000> : vector<32xf32>
    %479 = vector.multi_reduction <maximumf>, %478, %cst_216 [0] : vector<14x32xf32> to vector<32xf32>
    %480 = vector.shape_cast %479 : vector<32xf32> to vector<1x32xf32>
    %481 = vector.extract_strided_slice %465 {offsets = [16, 0], sizes = [14, 32], strides = [1, 1]} : vector<32x32xf32> to vector<14x32xf32>
    %482 = vector.extract_strided_slice %467 {offsets = [17, 0], sizes = [14, 32], strides = [1, 1]} : vector<32x32xf32> to vector<14x32xf32>
    %483 = arith.addf %481, %482 : vector<14x32xf32>
    %484 = vector.extract_strided_slice %469 {offsets = [18, 0], sizes = [14, 32], strides = [1, 1]} : vector<32x32xf32> to vector<14x32xf32>
    %485 = arith.addf %483, %484 : vector<14x32xf32>
    %486 = vector.broadcast %391 : vector<1x32xf32> to vector<14x32xf32>
    %487 = arith.addf %485, %486 : vector<14x32xf32>
    %cst_217 = arith.constant 0.000000e+00 : f32
    %488 = vector.broadcast %cst_217 : f32 to vector<14x32xf32>
    %489 = arith.maximumf %487, %488 : vector<14x32xf32>
    %cst_218 = arith.constant dense<0xFF800000> : vector<32xf32>
    %490 = vector.multi_reduction <maximumf>, %489, %cst_218 [0] : vector<14x32xf32> to vector<32xf32>
    %491 = vector.shape_cast %490 : vector<32xf32> to vector<1x32xf32>
    %c4 = arith.constant 4 : index
    %c0_219 = arith.constant 0 : index
    %c0_220 = arith.constant 0 : index
    %492 = vector.load %arg2[%c4, %c0_219, %c0_220] : memref<5x100x32xf32, #tpu.memory_space<vmem>>, vector<1x100x32xf32>
    %493 = vector.shape_cast %492 : vector<1x100x32xf32> to vector<100x32xf32>
    %cst_221 = arith.constant dense<0.000000e+00> : vector<16x32xf32>
    %494 = tpu.matmul %5, %493, %cst_221 {dimension_numbers = #tpu.dot_dimension_numbers<[1], [0], [0], [1], [0, 0, 1, 1], [], []>} : vector<16x100xf32>, vector<100x32xf32>, vector<16x32xf32> -> vector<16x32xf32>
    %cst_222 = arith.constant dense<0.000000e+00> : vector<32x32xf32>
    %495 = tpu.matmul %11, %493, %cst_222 {dimension_numbers = #tpu.dot_dimension_numbers<[1], [0], [0], [1], [0, 0, 1, 1], [], []>} : vector<32x100xf32>, vector<100x32xf32>, vector<32x32xf32> -> vector<32x32xf32>
    %c4_223 = arith.constant 4 : index
    %c0_224 = arith.constant 0 : index
    %c0_225 = arith.constant 0 : index
    %496 = vector.load %arg3[%c4_223, %c0_224, %c0_225] : memref<5x64x32xf32, #tpu.memory_space<vmem>>, vector<1x64x32xf32>
    %497 = vector.shape_cast %496 : vector<1x64x32xf32> to vector<64x32xf32>
    %c4_226 = arith.constant 4 : index
    %c0_227 = arith.constant 0 : index
    %c0_228 = arith.constant 0 : index
    %498 = vector.load %arg4[%c4_226, %c0_227, %c0_228] : memref<5x1x32xf32, #tpu.memory_space<vmem>>, vector<1x1x32xf32>
    %499 = vector.shape_cast %498 : vector<1x1x32xf32> to vector<1x32xf32>
    %c4_229 = arith.constant 4 : index
    %c0_230 = arith.constant 0 : index
    %c0_231 = arith.constant 0 : index
    %500 = vector.load %arg5[%c4_229, %c0_230, %c0_231] : memref<5x96x32xf32, #tpu.memory_space<vmem>>, vector<1x96x32xf32>
    %501 = vector.shape_cast %500 : vector<1x96x32xf32> to vector<96x32xf32>
    %c4_232 = arith.constant 4 : index
    %c0_233 = arith.constant 0 : index
    %c0_234 = arith.constant 0 : index
    %502 = vector.load %arg6[%c4_232, %c0_233, %c0_234] : memref<5x1x32xf32, #tpu.memory_space<vmem>>, vector<1x1x32xf32>
    %503 = vector.shape_cast %502 : vector<1x1x32xf32> to vector<1x32xf32>
    %c4_235 = arith.constant 4 : index
    %c0_236 = arith.constant 0 : index
    %c0_237 = arith.constant 0 : index
    %504 = vector.load %arg7[%c4_235, %c0_236, %c0_237] : memref<5x64x32xf32, #tpu.memory_space<vmem>>, vector<1x64x32xf32>
    %505 = vector.shape_cast %504 : vector<1x64x32xf32> to vector<64x32xf32>
    %c4_238 = arith.constant 4 : index
    %c0_239 = arith.constant 0 : index
    %c0_240 = arith.constant 0 : index
    %506 = vector.load %arg8[%c4_238, %c0_239, %c0_240] : memref<5x1x32xf32, #tpu.memory_space<vmem>>, vector<1x1x32xf32>
    %507 = vector.shape_cast %506 : vector<1x1x32xf32> to vector<1x32xf32>
    %c4_241 = arith.constant 4 : index
    %c0_242 = arith.constant 0 : index
    %c0_243 = arith.constant 0 : index
    %508 = vector.load %arg9[%c4_241, %c0_242, %c0_243] : memref<5x96x32xf32, #tpu.memory_space<vmem>>, vector<1x96x32xf32>
    %509 = vector.shape_cast %508 : vector<1x96x32xf32> to vector<96x32xf32>
    %c4_244 = arith.constant 4 : index
    %c0_245 = arith.constant 0 : index
    %c0_246 = arith.constant 0 : index
    %510 = vector.load %arg10[%c4_244, %c0_245, %c0_246] : memref<5x1x32xf32, #tpu.memory_space<vmem>>, vector<1x1x32xf32>
    %511 = vector.shape_cast %510 : vector<1x1x32xf32> to vector<1x32xf32>
    %512 = vector.extract_strided_slice %497 {offsets = [0, 0], sizes = [32, 32], strides = [1, 1]} : vector<64x32xf32> to vector<32x32xf32>
    %cst_247 = arith.constant dense<0.000000e+00> : vector<16x32xf32>
    %513 = tpu.matmul %494, %512, %cst_247 {dimension_numbers = #tpu.dot_dimension_numbers<[1], [0], [0], [1], [0, 0, 1, 1], [], []>} : vector<16x32xf32>, vector<32x32xf32>, vector<16x32xf32> -> vector<16x32xf32>
    %514 = vector.extract_strided_slice %497 {offsets = [32, 0], sizes = [32, 32], strides = [1, 1]} : vector<64x32xf32> to vector<32x32xf32>
    %cst_248 = arith.constant dense<0.000000e+00> : vector<16x32xf32>
    %515 = tpu.matmul %494, %514, %cst_248 {dimension_numbers = #tpu.dot_dimension_numbers<[1], [0], [0], [1], [0, 0, 1, 1], [], []>} : vector<16x32xf32>, vector<32x32xf32>, vector<16x32xf32> -> vector<16x32xf32>
    %516 = vector.extract_strided_slice %513 {offsets = [0, 0], sizes = [7, 32], strides = [1, 1]} : vector<16x32xf32> to vector<7x32xf32>
    %517 = vector.extract_strided_slice %515 {offsets = [1, 0], sizes = [7, 32], strides = [1, 1]} : vector<16x32xf32> to vector<7x32xf32>
    %518 = arith.addf %516, %517 : vector<7x32xf32>
    %519 = vector.broadcast %499 : vector<1x32xf32> to vector<7x32xf32>
    %520 = arith.addf %518, %519 : vector<7x32xf32>
    %cst_249 = arith.constant 0.000000e+00 : f32
    %521 = vector.broadcast %cst_249 : f32 to vector<7x32xf32>
    %522 = arith.maximumf %520, %521 : vector<7x32xf32>
    %cst_250 = arith.constant dense<0xFF800000> : vector<32xf32>
    %523 = vector.multi_reduction <maximumf>, %522, %cst_250 [0] : vector<7x32xf32> to vector<32xf32>
    %524 = vector.shape_cast %523 : vector<32xf32> to vector<1x32xf32>
    %525 = vector.extract_strided_slice %513 {offsets = [8, 0], sizes = [7, 32], strides = [1, 1]} : vector<16x32xf32> to vector<7x32xf32>
    %526 = vector.extract_strided_slice %515 {offsets = [9, 0], sizes = [7, 32], strides = [1, 1]} : vector<16x32xf32> to vector<7x32xf32>
    %527 = arith.addf %525, %526 : vector<7x32xf32>
    %528 = vector.broadcast %499 : vector<1x32xf32> to vector<7x32xf32>
    %529 = arith.addf %527, %528 : vector<7x32xf32>
    %cst_251 = arith.constant 0.000000e+00 : f32
    %530 = vector.broadcast %cst_251 : f32 to vector<7x32xf32>
    %531 = arith.maximumf %529, %530 : vector<7x32xf32>
    %cst_252 = arith.constant dense<0xFF800000> : vector<32xf32>
    %532 = vector.multi_reduction <maximumf>, %531, %cst_252 [0] : vector<7x32xf32> to vector<32xf32>
    %533 = vector.shape_cast %532 : vector<32xf32> to vector<1x32xf32>
    %534 = vector.extract_strided_slice %501 {offsets = [0, 0], sizes = [32, 32], strides = [1, 1]} : vector<96x32xf32> to vector<32x32xf32>
    %cst_253 = arith.constant dense<0.000000e+00> : vector<16x32xf32>
    %535 = tpu.matmul %494, %534, %cst_253 {dimension_numbers = #tpu.dot_dimension_numbers<[1], [0], [0], [1], [0, 0, 1, 1], [], []>} : vector<16x32xf32>, vector<32x32xf32>, vector<16x32xf32> -> vector<16x32xf32>
    %536 = vector.extract_strided_slice %501 {offsets = [32, 0], sizes = [32, 32], strides = [1, 1]} : vector<96x32xf32> to vector<32x32xf32>
    %cst_254 = arith.constant dense<0.000000e+00> : vector<16x32xf32>
    %537 = tpu.matmul %494, %536, %cst_254 {dimension_numbers = #tpu.dot_dimension_numbers<[1], [0], [0], [1], [0, 0, 1, 1], [], []>} : vector<16x32xf32>, vector<32x32xf32>, vector<16x32xf32> -> vector<16x32xf32>
    %538 = vector.extract_strided_slice %501 {offsets = [64, 0], sizes = [32, 32], strides = [1, 1]} : vector<96x32xf32> to vector<32x32xf32>
    %cst_255 = arith.constant dense<0.000000e+00> : vector<16x32xf32>
    %539 = tpu.matmul %494, %538, %cst_255 {dimension_numbers = #tpu.dot_dimension_numbers<[1], [0], [0], [1], [0, 0, 1, 1], [], []>} : vector<16x32xf32>, vector<32x32xf32>, vector<16x32xf32> -> vector<16x32xf32>
    %540 = vector.extract_strided_slice %535 {offsets = [0, 0], sizes = [6, 32], strides = [1, 1]} : vector<16x32xf32> to vector<6x32xf32>
    %541 = vector.extract_strided_slice %537 {offsets = [1, 0], sizes = [6, 32], strides = [1, 1]} : vector<16x32xf32> to vector<6x32xf32>
    %542 = arith.addf %540, %541 : vector<6x32xf32>
    %543 = vector.extract_strided_slice %539 {offsets = [2, 0], sizes = [6, 32], strides = [1, 1]} : vector<16x32xf32> to vector<6x32xf32>
    %544 = arith.addf %542, %543 : vector<6x32xf32>
    %545 = vector.broadcast %503 : vector<1x32xf32> to vector<6x32xf32>
    %546 = arith.addf %544, %545 : vector<6x32xf32>
    %cst_256 = arith.constant 0.000000e+00 : f32
    %547 = vector.broadcast %cst_256 : f32 to vector<6x32xf32>
    %548 = arith.maximumf %546, %547 : vector<6x32xf32>
    %cst_257 = arith.constant dense<0xFF800000> : vector<32xf32>
    %549 = vector.multi_reduction <maximumf>, %548, %cst_257 [0] : vector<6x32xf32> to vector<32xf32>
    %550 = vector.shape_cast %549 : vector<32xf32> to vector<1x32xf32>
    %551 = vector.extract_strided_slice %535 {offsets = [8, 0], sizes = [6, 32], strides = [1, 1]} : vector<16x32xf32> to vector<6x32xf32>
    %552 = vector.extract_strided_slice %537 {offsets = [9, 0], sizes = [6, 32], strides = [1, 1]} : vector<16x32xf32> to vector<6x32xf32>
    %553 = arith.addf %551, %552 : vector<6x32xf32>
    %554 = vector.extract_strided_slice %539 {offsets = [10, 0], sizes = [6, 32], strides = [1, 1]} : vector<16x32xf32> to vector<6x32xf32>
    %555 = arith.addf %553, %554 : vector<6x32xf32>
    %556 = vector.broadcast %503 : vector<1x32xf32> to vector<6x32xf32>
    %557 = arith.addf %555, %556 : vector<6x32xf32>
    %cst_258 = arith.constant 0.000000e+00 : f32
    %558 = vector.broadcast %cst_258 : f32 to vector<6x32xf32>
    %559 = arith.maximumf %557, %558 : vector<6x32xf32>
    %cst_259 = arith.constant dense<0xFF800000> : vector<32xf32>
    %560 = vector.multi_reduction <maximumf>, %559, %cst_259 [0] : vector<6x32xf32> to vector<32xf32>
    %561 = vector.shape_cast %560 : vector<32xf32> to vector<1x32xf32>
    %562 = vector.extract_strided_slice %505 {offsets = [0, 0], sizes = [32, 32], strides = [1, 1]} : vector<64x32xf32> to vector<32x32xf32>
    %cst_260 = arith.constant dense<0.000000e+00> : vector<32x32xf32>
    %563 = tpu.matmul %495, %562, %cst_260 {dimension_numbers = #tpu.dot_dimension_numbers<[1], [0], [0], [1], [0, 0, 1, 1], [], []>} : vector<32x32xf32>, vector<32x32xf32>, vector<32x32xf32> -> vector<32x32xf32>
    %564 = vector.extract_strided_slice %505 {offsets = [32, 0], sizes = [32, 32], strides = [1, 1]} : vector<64x32xf32> to vector<32x32xf32>
    %cst_261 = arith.constant dense<0.000000e+00> : vector<32x32xf32>
    %565 = tpu.matmul %495, %564, %cst_261 {dimension_numbers = #tpu.dot_dimension_numbers<[1], [0], [0], [1], [0, 0, 1, 1], [], []>} : vector<32x32xf32>, vector<32x32xf32>, vector<32x32xf32> -> vector<32x32xf32>
    %566 = vector.extract_strided_slice %563 {offsets = [0, 0], sizes = [15, 32], strides = [1, 1]} : vector<32x32xf32> to vector<15x32xf32>
    %567 = vector.extract_strided_slice %565 {offsets = [1, 0], sizes = [15, 32], strides = [1, 1]} : vector<32x32xf32> to vector<15x32xf32>
    %568 = arith.addf %566, %567 : vector<15x32xf32>
    %569 = vector.broadcast %507 : vector<1x32xf32> to vector<15x32xf32>
    %570 = arith.addf %568, %569 : vector<15x32xf32>
    %cst_262 = arith.constant 0.000000e+00 : f32
    %571 = vector.broadcast %cst_262 : f32 to vector<15x32xf32>
    %572 = arith.maximumf %570, %571 : vector<15x32xf32>
    %cst_263 = arith.constant dense<0xFF800000> : vector<32xf32>
    %573 = vector.multi_reduction <maximumf>, %572, %cst_263 [0] : vector<15x32xf32> to vector<32xf32>
    %574 = vector.shape_cast %573 : vector<32xf32> to vector<1x32xf32>
    %575 = vector.extract_strided_slice %563 {offsets = [16, 0], sizes = [15, 32], strides = [1, 1]} : vector<32x32xf32> to vector<15x32xf32>
    %576 = vector.extract_strided_slice %565 {offsets = [17, 0], sizes = [15, 32], strides = [1, 1]} : vector<32x32xf32> to vector<15x32xf32>
    %577 = arith.addf %575, %576 : vector<15x32xf32>
    %578 = vector.broadcast %507 : vector<1x32xf32> to vector<15x32xf32>
    %579 = arith.addf %577, %578 : vector<15x32xf32>
    %cst_264 = arith.constant 0.000000e+00 : f32
    %580 = vector.broadcast %cst_264 : f32 to vector<15x32xf32>
    %581 = arith.maximumf %579, %580 : vector<15x32xf32>
    %cst_265 = arith.constant dense<0xFF800000> : vector<32xf32>
    %582 = vector.multi_reduction <maximumf>, %581, %cst_265 [0] : vector<15x32xf32> to vector<32xf32>
    %583 = vector.shape_cast %582 : vector<32xf32> to vector<1x32xf32>
    %584 = vector.extract_strided_slice %509 {offsets = [0, 0], sizes = [32, 32], strides = [1, 1]} : vector<96x32xf32> to vector<32x32xf32>
    %cst_266 = arith.constant dense<0.000000e+00> : vector<32x32xf32>
    %585 = tpu.matmul %495, %584, %cst_266 {dimension_numbers = #tpu.dot_dimension_numbers<[1], [0], [0], [1], [0, 0, 1, 1], [], []>} : vector<32x32xf32>, vector<32x32xf32>, vector<32x32xf32> -> vector<32x32xf32>
    %586 = vector.extract_strided_slice %509 {offsets = [32, 0], sizes = [32, 32], strides = [1, 1]} : vector<96x32xf32> to vector<32x32xf32>
    %cst_267 = arith.constant dense<0.000000e+00> : vector<32x32xf32>
    %587 = tpu.matmul %495, %586, %cst_267 {dimension_numbers = #tpu.dot_dimension_numbers<[1], [0], [0], [1], [0, 0, 1, 1], [], []>} : vector<32x32xf32>, vector<32x32xf32>, vector<32x32xf32> -> vector<32x32xf32>
    %588 = vector.extract_strided_slice %509 {offsets = [64, 0], sizes = [32, 32], strides = [1, 1]} : vector<96x32xf32> to vector<32x32xf32>
    %cst_268 = arith.constant dense<0.000000e+00> : vector<32x32xf32>
    %589 = tpu.matmul %495, %588, %cst_268 {dimension_numbers = #tpu.dot_dimension_numbers<[1], [0], [0], [1], [0, 0, 1, 1], [], []>} : vector<32x32xf32>, vector<32x32xf32>, vector<32x32xf32> -> vector<32x32xf32>
    %590 = vector.extract_strided_slice %585 {offsets = [0, 0], sizes = [14, 32], strides = [1, 1]} : vector<32x32xf32> to vector<14x32xf32>
    %591 = vector.extract_strided_slice %587 {offsets = [1, 0], sizes = [14, 32], strides = [1, 1]} : vector<32x32xf32> to vector<14x32xf32>
    %592 = arith.addf %590, %591 : vector<14x32xf32>
    %593 = vector.extract_strided_slice %589 {offsets = [2, 0], sizes = [14, 32], strides = [1, 1]} : vector<32x32xf32> to vector<14x32xf32>
    %594 = arith.addf %592, %593 : vector<14x32xf32>
    %595 = vector.broadcast %511 : vector<1x32xf32> to vector<14x32xf32>
    %596 = arith.addf %594, %595 : vector<14x32xf32>
    %cst_269 = arith.constant 0.000000e+00 : f32
    %597 = vector.broadcast %cst_269 : f32 to vector<14x32xf32>
    %598 = arith.maximumf %596, %597 : vector<14x32xf32>
    %cst_270 = arith.constant dense<0xFF800000> : vector<32xf32>
    %599 = vector.multi_reduction <maximumf>, %598, %cst_270 [0] : vector<14x32xf32> to vector<32xf32>
    %600 = vector.shape_cast %599 : vector<32xf32> to vector<1x32xf32>
    %601 = vector.extract_strided_slice %585 {offsets = [16, 0], sizes = [14, 32], strides = [1, 1]} : vector<32x32xf32> to vector<14x32xf32>
    %602 = vector.extract_strided_slice %587 {offsets = [17, 0], sizes = [14, 32], strides = [1, 1]} : vector<32x32xf32> to vector<14x32xf32>
    %603 = arith.addf %601, %602 : vector<14x32xf32>
    %604 = vector.extract_strided_slice %589 {offsets = [18, 0], sizes = [14, 32], strides = [1, 1]} : vector<32x32xf32> to vector<14x32xf32>
    %605 = arith.addf %603, %604 : vector<14x32xf32>
    %606 = vector.broadcast %511 : vector<1x32xf32> to vector<14x32xf32>
    %607 = arith.addf %605, %606 : vector<14x32xf32>
    %cst_271 = arith.constant 0.000000e+00 : f32
    %608 = vector.broadcast %cst_271 : f32 to vector<14x32xf32>
    %609 = arith.maximumf %607, %608 : vector<14x32xf32>
    %cst_272 = arith.constant dense<0xFF800000> : vector<32xf32>
    %610 = vector.multi_reduction <maximumf>, %609, %cst_272 [0] : vector<14x32xf32> to vector<32xf32>
    %611 = vector.shape_cast %610 : vector<32xf32> to vector<1x32xf32>
    %c0_273 = arith.constant 0 : index
    %c0_274 = arith.constant 0 : index
    %612 = vector.load %arg11[%c0_273, %c0_274] : memref<640x8xf32, #tpu.memory_space<vmem>>, vector<640x8xf32>
    %c0_275 = arith.constant 0 : index
    %c0_276 = arith.constant 0 : index
    %613 = vector.load %arg12[%c0_275, %c0_276] : memref<1x8xf32, #tpu.memory_space<vmem>>, vector<1x8xf32>
    %614 = tpu.concatenate %44, %70, %94, %120, %164, %190, %214, %240, %284, %310, %334, %360, %404, %430, %454, %480 in 1 : vector<1x32xf32>, vector<1x32xf32>, vector<1x32xf32>, vector<1x32xf32>, vector<1x32xf32>, vector<1x32xf32>, vector<1x32xf32>, vector<1x32xf32>, vector<1x32xf32>, vector<1x32xf32>, vector<1x32xf32>, vector<1x32xf32>, vector<1x32xf32>, vector<1x32xf32>, vector<1x32xf32>, vector<1x32xf32> -> vector<1x512xf32>
    %615 = tpu.concatenate %524, %550, %574, %600 in 1 : vector<1x32xf32>, vector<1x32xf32>, vector<1x32xf32>, vector<1x32xf32> -> vector<1x128xf32>
    %616 = tpu.concatenate %614, %615 in 1 : vector<1x512xf32>, vector<1x128xf32> -> vector<1x640xf32>
    %cst_277 = arith.constant dense<0.000000e+00> : vector<1x8xf32>
    %617 = tpu.matmul %616, %612, %cst_277 {dimension_numbers = #tpu.dot_dimension_numbers<[1], [0], [0], [1], [0, 0, 1, 1], [], []>} : vector<1x640xf32>, vector<640x8xf32>, vector<1x8xf32> -> vector<1x8xf32>
    %618 = arith.addf %617, %613 : vector<1x8xf32>
    %c0_278 = arith.constant 0 : index
    %c0_279 = arith.constant 0 : index
    %619 = vector.load %arg13[%c0_278, %c0_279] : memref<2x8xf32, #tpu.memory_space<vmem>>, vector<1x8xf32>
    tpu.vector_store %arg13[%c0_278, %c0_279], %618 {strides = array<i32>} : memref<2x8xf32, #tpu.memory_space<vmem>>, vector<1x8xf32>,
    %620 = tpu.concatenate %53, %81, %103, %131, %173, %201, %223, %251, %293, %321, %343, %371, %413, %441, %463, %491 in 1 : vector<1x32xf32>, vector<1x32xf32>, vector<1x32xf32>, vector<1x32xf32>, vector<1x32xf32>, vector<1x32xf32>, vector<1x32xf32>, vector<1x32xf32>, vector<1x32xf32>, vector<1x32xf32>, vector<1x32xf32>, vector<1x32xf32>, vector<1x32xf32>, vector<1x32xf32>, vector<1x32xf32>, vector<1x32xf32> -> vector<1x512xf32>
    %621 = tpu.concatenate %533, %561, %583, %611 in 1 : vector<1x32xf32>, vector<1x32xf32>, vector<1x32xf32>, vector<1x32xf32> -> vector<1x128xf32>
    %622 = tpu.concatenate %620, %621 in 1 : vector<1x512xf32>, vector<1x128xf32> -> vector<1x640xf32>
    %cst_280 = arith.constant dense<0.000000e+00> : vector<1x8xf32>
    %623 = tpu.matmul %622, %612, %cst_280 {dimension_numbers = #tpu.dot_dimension_numbers<[1], [0], [0], [1], [0, 0, 1, 1], [], []>} : vector<1x640xf32>, vector<640x8xf32>, vector<1x8xf32> -> vector<1x8xf32>
    %624 = arith.addf %623, %613 : vector<1x8xf32>
    %c1_281 = arith.constant 1 : index
    %c0_282 = arith.constant 0 : index
    %625 = vector.load %arg13[%c1_281, %c0_282] : memref<2x8xf32, #tpu.memory_space<vmem>>, vector<1x8xf32>
    tpu.vector_store %arg13[%c1_281, %c0_282], %624 {strides = array<i32>} : memref<2x8xf32, #tpu.memory_space<vmem>>, vector<1x8xf32>,
    return
  }
}

</mosaic_0001>

<bundles_post_ra>
// kernel: boost_cnn5_forward.1
= control target key start
LH: loop header
LB: loop body
LE: loop exit
PB: predicated region body
PF: predicated region fallthrough
CT: control target
= control target key end

     0   :  { %vm109_vm0 = vcmask 1043456   ;;  %v9182_v2 = vmov 0   ;;  %s11510_s0 = inlined_call_operand.vmem [shape: s32[16,1], index: 0, kind: input, shape index: {}]   ;;  %s11511_s1 = inlined_call_operand.vmem [shape: s32[32,1], index: 1, kind: input, shape index: {}]   ;;  %s11512_s2 = inlined_call_operand.vmem [shape: f32[5,100,32], index: 2, kind: input, shape index: {}]   ;;  %s11513_s3 = inlined_call_operand.vmem [shape: f32[5,64,32], index: 3, kind: input, shape index: {}]   ;;  %s11514_s4 = inlined_call_operand.vmem [shape: f32[5,1,32], index: 4, kind: input, shape index: {}]   ;;  %s11515_s5 = inlined_call_operand.vmem [shape: f32[5,96,32], index: 5, kind: input, shape index: {}]   ;;  %s11516_s6 = inlined_call_operand.vmem [shape: f32[5,1,32], index: 6, kind: input, shape index: {}]   ;;  %s11517_s7 = inlined_call_operand.vmem [shape: f32[5,64,32], index: 7, kind: input, shape index: {}]   ;;  %s11518_s8 = inlined_call_operand.vmem [shape: f32[5,1,32], index: 8, kind: input, shape index: {}]   ;;  %s11519_s9 = inlined_call_operand.vmem [shape: f32[5,96,32], index: 9, kind: input, shape index: {}]   ;;  %s11520_s10 = inlined_call_operand.vmem [shape: f32[5,1,32], index: 10, kind: input, shape index: {}]   ;;  %s11521_s11 = inlined_call_operand.vmem [shape: f32[640,8], index: 11, kind: input, shape index: {}]   ;;  %s11522_s12 = inlined_call_operand.vmem [shape: f32[1,8], index: 12, kind: input, shape index: {}]   ;;  %s11523_s13 = inlined_call_operand.hbm [shape: f32[2,8], index: 13, kind: output, shape index: {}]  }
   0x1   :  { %v47_v0 = vld [vmem:[%s11510_s0] sm:$0xff]  ;;  %9095 = vset.pattern.permute.xlu0 %v9182_v2  ;;  %9096 = vset.pattern.permute.xlu1 %v9182_v2  ;;  %v100_v4 = vld [vmem:[%s11512_s2 + $0x58] sm:$0xff]  ;;  %v48_v5 = vld [vmem:[%s11510_s0 + $0x8] sm:$0xff] }
   0x2   :  { %v61_v1 = vld [vmem:[%s11511_s1] sm:$0xff]  ;;  %50 = vperm.xlu0 %9095, %v47_v0   ;;  %v62_v6 = vld [vmem:[%s11511_s1 + $0x8] sm:$0xff]  ;;  %v99_v7 = vld [vmem:[%s11512_s2 + $0x50] sm:$0xff] }
   0x3   :  { %66 = vperm.xlu1 %9096, %v61_v1   ;;  %v101_v3 = vld [vmem:[%s11512_s2 + $0x60] sm:$0xf] }
   0x4   :  { %8088 = vmatprep.subr.msk.mxu0 %vm109_vm0, %v101_v3  ;;  %8117 = vmatprep.subr.msk.mxu1 %vm109_vm0, %v101_v3 }
   0x5   :  { %8089 = vmatpush3.msk.msra.mxu0 %vm109_vm0, %v101_v3  ;;  %8118 = vmatpush3.msk.msra.mxu1 %vm109_vm0, %v101_v3 }
   0x6   :  { %8090 = vmatprep.subr.mxu0 %v100_v4  ;;  %8119 = vmatprep.subr.mxu1 %v100_v4 }
   0x7   :  { %53 = vperm.xlu0 %9095, %v48_v5   ;;  %69 = vperm.xlu1 %9096, %v62_v6  }
   0x8   :  { %18 = vsyncpa [#allocation3], 0  ;;  %v63_v8 = vld [vmem:[%s11511_s1 + $0x10] sm:$0xff]  ;;  %v64_v9 = vld [vmem:[%s11511_s1 + $0x18] sm:$0xff]  ;;  %8091 = vmatpush3.msra.mxu0 %v100_v4  ;;  %8120 = vmatpush3.msra.mxu1 %v100_v4  ;;  %v45_v22 = vlaneseq  ;;  %vm102_vm1 = vcmask 818176   ;;  %v11524_v26 = vmov 0.0  }
   0x9   :  { %8092 = vmatprep.subr.mxu0 %v99_v7  ;;  %v98_v10 = vld [vmem:[%s11512_s2 + $0x48] sm:$0xff]  ;;  %8121 = vmatprep.subr.mxu1 %v99_v7  ;;  %v97_v11 = vld [vmem:[%s11512_s2 + $0x40] sm:$0xff]  ;;  %v96_v12 = vld [vmem:[%s11512_s2 + $0x38] sm:$0xff]  ;;  %vm329_vm8 = vcmask 261120   ;;  %vm969_vm9 = vcmask 1046528   ;;  %vm498_vm10 = vcmask 260096  }
   0xa   :  { %8093 = vmatpush3.msra.mxu0 %v99_v7  ;;  %8122 = vmatpush3.msra.mxu1 %v99_v7  ;;  %v95_v13 = vld [vmem:[%s11512_s2 + $0x30] sm:$0xff]  ;;  %v94_v14 = vld [vmem:[%s11512_s2 + $0x28] sm:$0xff]  ;;  %v93_v15 = vld [vmem:[%s11512_s2 + $0x20] sm:$0xff]  ;;  %v46_v23 = vand.u32 127, %v45_v22  ;;  %vm1284_vm11 = vcmask 1045504   ;;  %vm760_vm12 = vcmask 259072  }
   0xb   :  { %72 = vperm.xlu0 %9095, %v63_v8   ;;  %75 = vperm.xlu1 %9096, %v64_v9   ;;  %v92_v16 = vld [vmem:[%s11512_s2 + $0x18] sm:$0xff]  ;;  %v91_v17 = vld [vmem:[%s11512_s2 + $0x10] sm:$0xff]  ;;  %v90_v18 = vld [vmem:[%s11512_s2 + $0x8] sm:$0xff]  ;;  %s9184_s27 = smov 32   ;;  %s9185_s28 = smov 64   ;;  %vm6420_vm13 = vcmask 523264  }
   0xc   :  { %8094 = vmatprep.subr.mxu0 %v98_v10  ;;  %8123 = vmatprep.subr.mxu1 %v98_v10  ;;  %v89_v19 = vld [vmem:[%s11512_s2] sm:$0xff]  ;;  %v288_v20 = vld [vmem:[%s11513_s3 + $0x18] sm:$0xff]  ;;  %v287_v33 = vld [vmem:[%s11513_s3 + $0x10] sm:$0xff]  ;;  %s9186_s1 = smov 96   ;;  %vm6422_vm14 = vcmask 785408   ;;  %vm9187_vm15 = vmmov 0  }
   0xd   :  { %8095 = vmatpush3.msra.mxu0 %v98_v10  ;;  %8124 = vmatpush3.msra.mxu1 %v98_v10  ;;  %v292_v21 = vld [vmem:[%s11513_s3 + $0x38] sm:$0xff]  ;;  %v291_v34 = vld [vmem:[%s11513_s3 + $0x30] sm:$0xff]  ;;  %v286_v37 = vld [vmem:[%s11513_s3 + $0x8] sm:$0xff] }
   0xe   :  { %8096 = vmatprep.subr.mxu0 %v97_v11  ;;  %8125 = vmatprep.subr.mxu1 %v97_v11  ;;  %v290_v38 = vld [vmem:[%s11513_s3 + $0x28] sm:$0xff]  ;;  %v285_v41 = vld [vmem:[%s11513_s3] sm:$0xff]  ;;  %v297_v43 = vld [vmem:[%s11515_s5 + $0x18] sm:$0xff] }
   0xf   :  { %8097 = vmatpush3.msra.mxu0 %v97_v11  ;;  %8126 = vmatpush3.msra.mxu1 %v97_v11  ;;  %v289_v42 = vld [vmem:[%s11513_s3 + $0x20] sm:$0xff]  ;;  %v301_v44 = vld [vmem:[%s11515_s5 + $0x38] sm:$0xff]  ;;  %v296_v47 = vld [vmem:[%s11515_s5 + $0x10] sm:$0xff] }
  0x10   :  { %8098 = vmatprep.subr.mxu0 %v96_v12  ;;  %8127 = vmatprep.subr.mxu1 %v96_v12  ;;  %v300_v48 = vld [vmem:[%s11515_s5 + $0x30] sm:$0xff]  ;;  %v295_v49 = vld [vmem:[%s11515_s5 + $0x8] sm:$0xff]  ;;  %v294_v51 = vld [vmem:[%s11515_s5] sm:$0xff] }
  0x11   :  { %8099 = vmatpush3.msra.mxu0 %v96_v12  ;;  %8128 = vmatpush3.msra.mxu1 %v96_v12  ;;  %v299_v50 = vld [vmem:[%s11515_s5 + $0x28] sm:$0xff]  ;;  %v298_v52 = vld [vmem:[%s11515_s5 + $0x20] sm:$0xff]  ;;  %v305_v53 = vld [vmem:[%s11515_s5 + $0x58] sm:$0xff] }
  0x12   :  { %8100 = vmatprep.subr.mxu0 %v95_v13  ;;  %8129 = vmatprep.subr.mxu1 %v95_v13  ;;  %v310_v54 = vld [vmem:[%s11517_s7 + $0x18] sm:$0xff]  ;;  %v304_v56 = vld [vmem:[%s11515_s5 + $0x50] sm:$0xff]  ;;  %v303_v58 = vld [vmem:[%s11515_s5 + $0x48] sm:$0xff] }
  0x13   :  { %8101 = vmatpush3.msra.mxu0 %v95_v13  ;;  %8130 = vmatpush3.msra.mxu1 %v95_v13  ;;  %v309_v57 = vld [vmem:[%s11517_s7 + $0x10] sm:$0xff]  ;;  %v308_v60 = vld [vmem:[%s11517_s7 + $0x8] sm:$0xff]  ;;  %v302_v61 = vld [vmem:[%s11515_s5 + $0x40] sm:$0xff] }
  0x14   :  { %8102 = vmatprep.subr.mxu0 %v94_v14  ;;  %8131 = vmatprep.subr.mxu1 %v94_v14  ;;  %v307_v62 = vld [vmem:[%s11517_s7] sm:$0xff]  ;;  %v314_v0 = vld [vmem:[%s11517_s7 + $0x38] sm:$0xff]  ;;  %v313_v3 = vld [vmem:[%s11517_s7 + $0x30] sm:$0xff] }
  0x15   :  { %8103 = vmatpush3.msra.mxu0 %v94_v14  ;;  %8132 = vmatpush3.msra.mxu1 %v94_v14  ;;  %v319_v1 = vld [vmem:[%s11519_s9 + $0x18] sm:$0xff]  ;;  %v318_v4 = vld [vmem:[%s11519_s9 + $0x10] sm:$0xff]  ;;  %v312_v5 = vld [vmem:[%s11517_s7 + $0x28] sm:$0xff] }
  0x16   :  { %8104 = vmatprep.subr.mxu0 %v93_v15  ;;  %8133 = vmatprep.subr.mxu1 %v93_v15  ;;  %v317_v6 = vld [vmem:[%s11519_s9 + $0x8] sm:$0xff]  ;;  %v311_v7 = vld [vmem:[%s11517_s7 + $0x20] sm:$0xff]  ;;  %v323_v9 = vld [vmem:[%s11519_s9 + $0x38] sm:$0xff] }
  0x17   :  { %8105 = vmatpush3.msra.mxu0 %v93_v15  ;;  %8134 = vmatpush3.msra.mxu1 %v93_v15  ;;  %v316_v8 = vld [vmem:[%s11519_s9] sm:$0xff]  ;;  %v327_v10 = vld [vmem:[%s11519_s9 + $0x58] sm:$0xff]  ;;  %v322_v11 = vld [vmem:[%s11519_s9 + $0x30] sm:$0xff] }
  0x18   :  { %8106 = vmatprep.subr.mxu0 %v92_v16  ;;  %8135 = vmatprep.subr.mxu1 %v92_v16  ;;  %v326_v12 = vld [vmem:[%s11519_s9 + $0x50] sm:$0xff]  ;;  %v321_v13 = vld [vmem:[%s11519_s9 + $0x28] sm:$0xff]  ;;  %v320_v15 = vld [vmem:[%s11519_s9 + $0x20] sm:$0xff] }
  0x19   :  { %8107 = vmatpush3.msra.mxu0 %v92_v16  ;;  %8136 = vmatpush3.msra.mxu1 %v92_v16  ;;  %v325_v14 = vld [vmem:[%s11519_s9 + $0x48] sm:$0xff]  ;;  %v324_v16 = vld [vmem:[%s11519_s9 + $0x40] sm:$0xff] }
  0x1a   :  { %8108 = vmatprep.subr.mxu0 %v91_v17  ;;  %8137 = vmatprep.subr.mxu1 %v91_v17  ;;  %v7015_v22 = vld [vmem:[%s11512_s2 + $0xa0] sm:$0xff] }
  0x1b   :  { %8109 = vmatpush3.msra.mxu0 %v91_v17  ;;  %8138 = vmatpush3.msra.mxu1 %v91_v17  ;;  %v7020_v17 = vld [vmem:[%s11512_s2 + $0xc8] sm:$0xf] }
  0x1c   :  { %8110 = vmatprep.subr.mxu0 %v90_v18  ;;  %8139 = vmatprep.subr.mxu1 %v90_v18 }
  0x1d   :  { %8111 = vmatpush3.msra.mxu0 %v90_v18  ;;  %8140 = vmatpush3.msra.mxu1 %v90_v18  ;;  %v7019_v18 = vld [vmem:[%s11512_s2 + $0xc0] sm:$0xff] }
  0x1e   :  { %8112 = vmatprep.subr.mxu0 %v89_v19  ;;  %8141 = vmatprep.subr.mxu1 %v89_v19 }
  0x1f   :  { %8113 = vmatpush3.msra.mxu0 %v89_v19  ;;  %8142 = vmatpush3.msra.mxu1 %v89_v19  ;;  %v7018_v19 = vld [vmem:[%s11512_s2 + $0xb8] sm:$0xff] }
  0x20   :  { %8149 = vmatprep.subr.mxu0 %v288_v20  ;;  %8160 = vmatprep.subr.mxu1 %v292_v21 }
  0x7d   :  { %v51_v24 = vpop.permute.xlu0 %50 }
  0x7e   :  { %v67_v25 = vpop.permute.xlu1 %66  ;;  %vm55_vm2 = vcmp.eq.s32.totalorder %v51_v24, %v46_v23  ;;  %v7013_v24 = vld [vmem:[%s11512_s2 + $0x90] sm:$0xff] }
  0x7f   :  { %vm77_vm3 = vcmp.eq.s32.totalorder %v67_v25, %v46_v23  ;;  %v9327_v27 = vsel %vm55_vm2, 1.0, %v11524_v26  ;;  %v7012_v25 = vld [vmem:[%s11512_s2 + $0x88] sm:$0xff] }
  0x80   :  { %v9330_v28 = vsel %vm77_vm3, 1.0, %v11524_v26  ;;  %8114 = vmatprep.mubr.msk.f32.mxu0 %vm102_vm1, %v9327_v27 }
  0x81   :  { %8143 = vmatprep.mubr.msk.f32.mxu1 %vm102_vm1, %v9330_v28 }
  0x82   :  { %v54_v29 = vpop.permute.xlu0 %53  ;;  %v70_v30 = vpop.permute.xlu1 %69 }
  0x83   :  { %vm56_vm4 = vcmp.eq.s32.totalorder %v54_v29, %v46_v23  ;;  %vm78_vm5 = vcmp.eq.s32.totalorder %v70_v30, %v46_v23  ;;  %v7011_v29 = vld [vmem:[%s11512_s2 + $0x80] sm:$0xff]  ;;  %v7010_v30 = vld [vmem:[%s11512_s2 + $0x78] sm:$0xff] }
  0x84   :  { %v9337_v31 = vsel %vm56_vm4, 1.0, %v11524_v26  ;;  %v9340_v32 = vsel %vm78_vm5, 1.0, %v11524_v26 }
  0x85   :  { %8115 = vmatmul.mubr.msk.f32.vlgmr.msra.gmra.mxu0 %vm102_vm1, %v9337_v31  ;;  %8144 = vmatmul.mubr.msk.f32.vlgmr.msra.gmra.mxu1 %vm102_vm1, %v9340_v32 }
  0x86   :  { %v73_v35 = vpop.permute.xlu0 %72  ;;  %v76_v36 = vpop.permute.xlu1 %75  ;;  %8150 = vmatpush3.msra.mxu0 %v288_v20  ;;  %8161 = vmatpush3.msra.mxu1 %v292_v21  ;;  %v7017_v20 = vld [vmem:[%s11512_s2 + $0xb0] sm:$0xff]  ;;  %v7016_v21 = vld [vmem:[%s11512_s2 + $0xa8] sm:$0xff] }
  0x87   :  { %vm79_vm6 = vcmp.eq.s32.totalorder %v73_v35, %v46_v23  ;;  %vm80_vm7 = vcmp.eq.s32.totalorder %v76_v36, %v46_v23  ;;  %8151 = vmatprep.subr.mxu0 %v287_v33  ;;  %8162 = vmatprep.subr.mxu1 %v291_v34  ;;  %v7014_v23 = vld [vmem:[%s11512_s2 + $0x98] sm:$0xff] }
  0x88   :  { %v9359_v39 = vsel %vm79_vm6, 1.0, %v11524_v26  ;;  %v9362_v40 = vsel %vm80_vm7, 1.0, %v11524_v26  ;;  %8152 = vmatpush3.msra.mxu0 %v287_v33  ;;  %8163 = vmatpush3.msra.mxu1 %v291_v34  ;;  %v7009_v33 = vld [vmem:[%s11512_s2 + $0x70] sm:$0xff]  ;;  %v7008_v34 = vld [vmem:[%s11512_s2 + $0x68] sm:$0xff]  ;;  %v7032_v35 = vld [vmem:[%s11513_s3 + $0x58] sm:$0xff] }
  0x89   :  { %8146 = vmatprep.mubr.msk.f32.mxu1 %vm102_vm1, %v9359_v39  ;;  %8153 = vmatprep.subr.mxu0 %v286_v37  ;;  %v7036_v36 = vld [vmem:[%s11513_s3 + $0x78] sm:$0xff] }
  0x8a   :  { %8147 = vmatmul.mubr.msk.f32.gmra.mxu1 %vm102_vm1, %v9362_v40  ;;  %8164 = vmatprep.subr.mxu1 %v290_v38 }
  0x8b   :  { %8154 = vmatpush3.msra.mxu0 %v286_v37  ;;  %8165 = vmatpush3.msra.mxu1 %v290_v38  ;;  %v7031_v37 = vld [vmem:[%s11513_s3 + $0x50] sm:$0xff] }
  0x8c   :  { %8155 = vmatprep.subr.mxu0 %v285_v41  ;;  %8166 = vmatprep.subr.mxu1 %v289_v42  ;;  %v7035_v38 = vld [vmem:[%s11513_s3 + $0x70] sm:$0xff] }
  0x8d   :  { %8156 = vmatpush3.msra.mxu0 %v285_v41  ;;  %8167 = vmatpush3.msra.mxu1 %v289_v42  ;;  %v7030_v41 = vld [vmem:[%s11513_s3 + $0x48] sm:$0xff] }
  0x8e   :  { %8171 = vmatprep.subr.mxu0 %v297_v43  ;;  %8182 = vmatprep.subr.mxu1 %v301_v44  ;;  %v7034_v42 = vld [vmem:[%s11513_s3 + $0x68] sm:$0xff] }
 0x145   :  { %v8116_v45 = vpop.f32.mrf.mxu0  ;;  %v9410_v55 = vpop.f32.mrf.mxu1 }
 0x147   :  { %v179_v46 = vpop.f32.mrf.mxu0  ;;  %v9424_v59 = vpop.f32.mrf.mxu1 }
 0x148   :  { %8157 = vmatprep.mubr.msk.f32.mxu0 %vm329_vm8, %v179_v46  ;;  %8168 = vmatprep.mubr.msk.f32.mxu1 %vm329_vm8, %v179_v46 }
 0x149   :  { %8158 = vmatmul.mubr.msk.f32.vlgmr.msra.gmra.mxu0 %vm329_vm8, %v8116_v45  ;;  %8169 = vmatmul.mubr.msk.f32.vlgmr.msra.gmra.mxu1 %vm329_vm8, %v8116_v45 }
 0x14a   :  { %8172 = vmatpush3.msra.mxu0 %v297_v43  ;;  %8183 = vmatpush3.msra.mxu1 %v301_v44  ;;  %v9435_v63 = vpop.f32.mrf.mxu1  ;;  %v7029_v43 = vld [vmem:[%s11513_s3 + $0x40] sm:$0xff] }
 0x14b   :  { %8173 = vmatprep.subr.mxu0 %v296_v47  ;;  %8179 = vmatprep.mubr.msk.f32.mxu0 %vm329_vm8, %v179_v46  ;;  %v7033_v44 = vld [vmem:[%s11513_s3 + $0x60] sm:$0xff] }
 0x14c   :  { %8184 = vmatprep.subr.mxu1 %v300_v48  ;;  %8190 = vmatprep.mubr.msk.f32.mxu1 %vm329_vm8, %v179_v46  ;;  %v9448_v2 = vpop.f32.mrf.mxu1 }
 0x14d   :  { %8174 = vmatpush3.msra.mxu0 %v296_v47  ;;  %8185 = vmatpush3.msra.mxu1 %v300_v48 }
 0x14e   :  { %8175 = vmatprep.subr.mxu0 %v295_v49  ;;  %8186 = vmatprep.subr.mxu1 %v299_v50 }
 0x14f   :  { %8176 = vmatpush3.msra.mxu0 %v295_v49  ;;  %8187 = vmatpush3.msra.mxu1 %v299_v50  ;;  %v6978_v50 = vld [vmem:[%s11514_s4] ss:$0 sm:$0xff] }
 0x150   :  { %8177 = vmatprep.subr.mxu0 %v294_v51  ;;  %8188 = vmatprep.subr.mxu1 %v298_v52 }
 0x151   :  { %8178 = vmatpush3.msra.mxu0 %v294_v51  ;;  %8189 = vmatpush3.msra.mxu1 %v298_v52 }
 0x152   :  { %8180 = vmatmul.mubr.msk.f32.vlgmr.msra.gmra.mxu0 %vm329_vm8, %v8116_v45  ;;  %8191 = vmatmul.mubr.msk.f32.vlgmr.msra.gmra.mxu1 %vm329_vm8, %v8116_v45 }
 0x153   :  { %8193 = vmatprep.subr.mxu0 %v305_v53  ;;  %8204 = vmatprep.subr.mxu1 %v310_v54 }
 0x154   :  { %8194 = vmatpush3.msra.mxu0 %v305_v53  ;;  %8201 = vmatprep.mubr.msk.f32.mxu0 %vm329_vm8, %v179_v46  ;;  %v9615_v46 = vld [vmem:[%s11515_s5 + $0x98] sm:$0xff] }
 0x155   :  { %8205 = vmatpush3.msra.mxu1 %v310_v54  ;;  %8195 = vmatprep.subr.mxu0 %v304_v56 }
 0x156   :  { %8206 = vmatprep.subr.mxu1 %v309_v57  ;;  %8196 = vmatpush3.msra.mxu0 %v304_v56 }
 0x157   :  { %8207 = vmatpush3.msra.mxu1 %v309_v57  ;;  %8197 = vmatprep.subr.mxu0 %v303_v58 }
 0x158   :  { %8208 = vmatprep.subr.mxu1 %v308_v60  ;;  %8198 = vmatpush3.msra.mxu0 %v303_v58 }
 0x159   :  { %8209 = vmatpush3.msra.mxu1 %v308_v60  ;;  %8199 = vmatprep.subr.mxu0 %v302_v61 }
 0x15a   :  { %8210 = vmatprep.subr.mxu1 %v307_v62  ;;  %8200 = vmatpush3.msra.mxu0 %v302_v61 }
 0x15b   :  { %8211 = vmatpush3.msra.mxu1 %v307_v62  ;;  %8212 = vmatprep.mubr.msk.f32.mxu1 %vm329_vm8, %v9424_v59 }
 0x15c   :  { %8202 = vmatmul.mubr.msk.f32.vlgmr.msra.gmra.mxu0 %vm329_vm8, %v8116_v45  ;;  %8213 = vmatmul.mubr.msk.f32.vlgmr.msra.gmra.mxu1 %vm329_vm8, %v9410_v55  ;;  %v9610_v45 = vld [vmem:[%s11515_s5 + $0x78] sm:$0xff] }
 0x15d   :  { %8218 = vmatprep.subr.mxu0 %v314_v0  ;;  %8232 = vmatprep.subr.mxu1 %v319_v1 }
 0x15e   :  { %8219 = vmatpush3.msra.mxu0 %v314_v0  ;;  %8233 = vmatpush3.msra.mxu1 %v319_v1 }
 0x15f   :  { %8215 = vmatprep.mubr.msk.f32.mxu1 %vm329_vm8, %v9448_v2  ;;  %8220 = vmatprep.subr.mxu0 %v313_v3 }
 0x160   :  { %8226 = vmatprep.mubr.msk.f32.mxu0 %vm329_vm8, %v9424_v59  ;;  %8234 = vmatprep.subr.mxu1 %v318_v4 }
 0x161   :  { %8221 = vmatpush3.msra.mxu0 %v313_v3  ;;  %8235 = vmatpush3.msra.mxu1 %v318_v4  ;;  %v9629_v4 = vld [vmem:[%s11516_s6] ss:$0 sm:$0xff] }
 0x162   :  { %8216 = vmatmul.mubr.msk.f32.gmra.mxu1 %vm329_vm8, %v9435_v63  ;;  %8222 = vmatprep.subr.mxu0 %v312_v5 }
 0x163   :  { %8236 = vmatprep.subr.mxu1 %v317_v6  ;;  %8223 = vmatpush3.msra.mxu0 %v312_v5 }
 0x164   :  { %8237 = vmatpush3.msra.mxu1 %v317_v6  ;;  %8240 = vmatprep.mubr.msk.f32.mxu1 %vm329_vm8, %v9424_v59 }
 0x165   :  { %8224 = vmatprep.subr.mxu0 %v311_v7  ;;  %8238 = vmatprep.subr.mxu1 %v316_v8 }
 0x166   :  { %8225 = vmatpush3.msra.mxu0 %v311_v7  ;;  %8239 = vmatpush3.msra.mxu1 %v316_v8 }
 0x167   :  { %8227 = vmatmul.mubr.msk.f32.vlgmr.msra.gmra.mxu0 %vm329_vm8, %v9410_v55  ;;  %8241 = vmatmul.mubr.msk.f32.vlgmr.msra.gmra.mxu1 %vm329_vm8, %v9410_v55 }
 0x168   :  { %8246 = vmatprep.subr.mxu0 %v323_v9  ;;  %8260 = vmatprep.subr.mxu1 %v327_v10 }
 0x169   :  { %8229 = vmatprep.mubr.msk.f32.mxu0 %vm329_vm8, %v9448_v2  ;;  %8243 = vmatprep.mubr.msk.f32.mxu1 %vm329_vm8, %v9448_v2 }
 0x16a   :  { %8247 = vmatpush3.msra.mxu0 %v323_v9  ;;  %8261 = vmatpush3.msra.mxu1 %v327_v10 }
 0x16b   :  { %8248 = vmatprep.subr.mxu0 %v322_v11  ;;  %8262 = vmatprep.subr.mxu1 %v326_v12 }
 0x16c   :  { %8249 = vmatpush3.msra.mxu0 %v322_v11  ;;  %8263 = vmatpush3.msra.mxu1 %v326_v12 }
 0x16d   :  { %8230 = vmatmul.mubr.msk.f32.gmra.mxu0 %vm329_vm8, %v9435_v63  ;;  %8244 = vmatmul.mubr.msk.f32.gmra.mxu1 %vm329_vm8, %v9435_v63 }
 0x16e   :  { %8250 = vmatprep.subr.mxu0 %v321_v13  ;;  %8264 = vmatprep.subr.mxu1 %v325_v14 }
 0x16f   :  { %8251 = vmatpush3.msra.mxu0 %v321_v13  ;;  %8254 = vmatprep.mubr.msk.f32.mxu0 %vm329_vm8, %v9424_v59 }
 0x170   :  { %8265 = vmatpush3.msra.mxu1 %v325_v14  ;;  %8268 = vmatprep.mubr.msk.f32.mxu1 %vm329_vm8, %v9424_v59 }
 0x171   :  { %8252 = vmatprep.subr.mxu0 %v320_v15  ;;  %8266 = vmatprep.subr.mxu1 %v324_v16 }
 0x172   :  { %8253 = vmatpush3.msra.mxu0 %v320_v15  ;;  %8267 = vmatpush3.msra.mxu1 %v324_v16  ;;  %v6994_v16 = vld [vmem:[%s11518_s8] ss:$0 sm:$0xff] }
 0x173   :  { %8255 = vmatmul.mubr.msk.f32.vlgmr.msra.gmra.mxu0 %vm329_vm8, %v9410_v55  ;;  %8269 = vmatmul.mubr.msk.f32.vlgmr.msra.gmra.mxu1 %vm329_vm8, %v9410_v55 }
 0x174   :  { %8274 = vmatprep.subr.msk.mxu0 %vm109_vm0, %v7020_v17  ;;  %8303 = vmatprep.subr.msk.mxu1 %vm109_vm0, %v7020_v17 }
 0x175   :  { %8257 = vmatprep.mubr.msk.f32.mxu0 %vm329_vm8, %v9448_v2  ;;  %8271 = vmatprep.mubr.msk.f32.mxu1 %vm329_vm8, %v9448_v2 }
 0x176   :  { %8275 = vmatpush3.msk.msra.mxu0 %vm109_vm0, %v7020_v17  ;;  %8304 = vmatpush3.msk.msra.mxu1 %vm109_vm0, %v7020_v17 }
 0x177   :  { %8276 = vmatprep.subr.mxu0 %v7019_v18  ;;  %8305 = vmatprep.subr.mxu1 %v7019_v18 }
 0x178   :  { %8277 = vmatpush3.msra.mxu0 %v7019_v18  ;;  %8306 = vmatpush3.msra.mxu1 %v7019_v18 }
 0x179   :  { %8258 = vmatmul.mubr.msk.f32.gmra.mxu0 %vm329_vm8, %v9435_v63  ;;  %8272 = vmatmul.mubr.msk.f32.gmra.mxu1 %vm329_vm8, %v9435_v63 }
 0x17a   :  { %8278 = vmatprep.subr.mxu0 %v7018_v19  ;;  %8307 = vmatprep.subr.mxu1 %v7018_v19 }
 0x17b   :  { %8279 = vmatpush3.msra.mxu0 %v7018_v19  ;;  %8300 = vmatprep.mubr.msk.f32.mxu0 %vm102_vm1, %v9327_v27 }
 0x17c   :  { %8308 = vmatpush3.msra.mxu1 %v7018_v19  ;;  %8329 = vmatprep.mubr.msk.f32.mxu1 %vm102_vm1, %v9330_v28 }
 0x17d   :  { %8280 = vmatprep.subr.mxu0 %v7017_v20  ;;  %8309 = vmatprep.subr.mxu1 %v7017_v20 }
 0x17e   :  { %8281 = vmatpush3.msra.mxu0 %v7017_v20  ;;  %8310 = vmatpush3.msra.mxu1 %v7017_v20 }
 0x17f   :  { %8282 = vmatprep.subr.mxu0 %v7016_v21  ;;  %8311 = vmatprep.subr.mxu1 %v7016_v21 }
 0x180   :  { %8283 = vmatpush3.msra.mxu0 %v7016_v21  ;;  %8312 = vmatpush3.msra.mxu1 %v7016_v21 }
 0x181   :  { %8284 = vmatprep.subr.mxu0 %v7015_v22  ;;  %8313 = vmatprep.subr.mxu1 %v7015_v22 }
 0x182   :  { %8285 = vmatpush3.msra.mxu0 %v7015_v22  ;;  %8314 = vmatpush3.msra.mxu1 %v7015_v22 }
 0x183   :  { %8286 = vmatprep.subr.mxu0 %v7014_v23  ;;  %8315 = vmatprep.subr.mxu1 %v7014_v23 }
 0x184   :  { %8287 = vmatpush3.msra.mxu0 %v7014_v23  ;;  %8316 = vmatpush3.msra.mxu1 %v7014_v23 }
 0x185   :  { %8288 = vmatprep.subr.mxu0 %v7013_v24  ;;  %8317 = vmatprep.subr.mxu1 %v7013_v24 }
 0x186   :  { %8289 = vmatpush3.msra.mxu0 %v7013_v24  ;;  %8318 = vmatpush3.msra.mxu1 %v7013_v24 }
 0x187   :  { %8290 = vmatprep.subr.mxu0 %v7012_v25  ;;  %8319 = vmatprep.subr.mxu1 %v7012_v25 }
 0x188   :  { %8291 = vmatpush3.msra.mxu0 %v7012_v25  ;;  %8320 = vmatpush3.msra.mxu1 %v7012_v25 }
 0x189   :  { %8292 = vmatprep.subr.mxu0 %v7011_v29  ;;  %8321 = vmatprep.subr.mxu1 %v7011_v29 }
 0x18a   :  { %8293 = vmatpush3.msra.mxu0 %v7011_v29  ;;  %8322 = vmatpush3.msra.mxu1 %v7011_v29 }
 0x18b   :  { %8294 = vmatprep.subr.mxu0 %v7010_v30  ;;  %8323 = vmatprep.subr.mxu1 %v7010_v30 }
 0x18c   :  { %8295 = vmatpush3.msra.mxu0 %v7010_v30  ;;  %8324 = vmatpush3.msra.mxu1 %v7010_v30 }
 0x18d   :  { %8296 = vmatprep.subr.mxu0 %v7009_v33  ;;  %8325 = vmatprep.subr.mxu1 %v7009_v33 }
 0x18e   :  { %8297 = vmatpush3.msra.mxu0 %v7009_v33  ;;  %8326 = vmatpush3.msra.mxu1 %v7009_v33 }
 0x18f   :  { %8298 = vmatprep.subr.mxu0 %v7008_v34  ;;  %8327 = vmatprep.subr.mxu1 %v7008_v34 }
 0x190   :  { %8299 = vmatpush3.msra.mxu0 %v7008_v34  ;;  %8328 = vmatpush3.msra.mxu1 %v7008_v34 }
 0x191   :  { %8301 = vmatmul.mubr.msk.f32.vlgmr.msra.gmra.mxu0 %vm102_vm1, %v9337_v31  ;;  %8330 = vmatmul.mubr.msk.f32.vlgmr.msra.gmra.mxu1 %vm102_vm1, %v9340_v32 }
 0x192   :  { %8332 = vmatprep.mubr.msk.f32.mxu1 %vm102_vm1, %v9359_v39  ;;  %8335 = vmatprep.subr.mxu0 %v7032_v35 }
 0x193   :  { %8346 = vmatprep.subr.mxu1 %v7036_v36  ;;  %8336 = vmatpush3.msra.mxu0 %v7032_v35 }
 0x194   :  { %8347 = vmatpush3.msra.mxu1 %v7036_v36  ;;  %8337 = vmatprep.subr.mxu0 %v7031_v37 }
 0x195   :  { %8333 = vmatmul.mubr.msk.f32.gmra.mxu1 %vm102_vm1, %v9362_v40  ;;  %8348 = vmatprep.subr.mxu1 %v7035_v38 }
 0x196   :  { %8338 = vmatpush3.msra.mxu0 %v7031_v37  ;;  %8349 = vmatpush3.msra.mxu1 %v7035_v38 }
 0x197   :  { %8339 = vmatprep.subr.mxu0 %v7030_v41  ;;  %8350 = vmatprep.subr.mxu1 %v7034_v42 }
 0x198   :  { %8340 = vmatpush3.msra.mxu0 %v7030_v41  ;;  %8351 = vmatpush3.msra.mxu1 %v7034_v42 }
 0x199   :  { %8341 = vmatprep.subr.mxu0 %v7029_v43  ;;  %8352 = vmatprep.subr.mxu1 %v7033_v44 }
 0x19a   :  { %8342 = vmatpush3.msra.mxu0 %v7029_v43  ;;  %8353 = vmatpush3.msra.mxu1 %v7033_v44 }
 0x19b   :  { %8357 = vmatprep.subr.mxu0 %v9610_v45  ;;  %8368 = vmatprep.subr.mxu1 %v9615_v46 }
 0x209   :  { %v8159_v47 = vpop.f32.mrf.mxu0  ;;  %v8170_v48 = vpop.f32.mrf.mxu1 }
 0x20a   :  { %v507_v49 = vrot.slane %v8170_v48, 1 }
 0x20b   :  { %v477_v51 = vpop.f32.mrf.mxu1  ;;  %v402_v54 = vpop.f32.mrf.mxu0 }
 0x20c   :  { %v509_v52 = vadd.f32 %v8159_v47, %v507_v49  ;;  %v487_v53 = vrot.slane %v477_v51, 1 }
 0x20e   :  { %v9622_v55 = vadd.f32 %v6978_v50, %v509_v52  ;;  %v9624_v56 = vadd.f32 %v487_v53, %v402_v54 }
 0x210   :  { %11561 = vst [vmem:[#allocation5_spill] sm:$0xff] %v9622_v55 }
 0x212   :  { %v8181_v57 = vpop.f32.mrf.mxu0  ;;  %v8192_v58 = vpop.f32.mrf.mxu1 }
 0x213   :  { %v769_v59 = vrot.slane %v8192_v58, 1 }
 0x214   :  { %v660_v60 = vpop.f32.mrf.mxu1  ;;  %v585_v63 = vpop.f32.mrf.mxu0 }
 0x215   :  { %v771_v61 = vadd.f32 %v8181_v57, %v769_v59  ;;  %v745_v62 = vrot.slane %v660_v60, 1 }
 0x217   :  { %v747_v0 = vadd.f32 %v745_v62, %v585_v63  ;;  %v7007_v63 = vld [vmem:[%s11520_s10] ss:$0 sm:$0xff] }
 0x21c   :  { %v8203_v1 = vpop.f32.mrf.mxu0  ;;  %v8214_v2 = vpop.f32.mrf.mxu1 }
 0x21d   :  { %v773_v3 = vrot.slane %v8203_v1, 2 }
 0x21e   :  { %v735_v5 = vpop.f32.mrf.mxu0  ;;  %v863_v6 = vpop.f32.mrf.mxu1 }
 0x21f   :  { %v775_v7 = vadd.f32 %v773_v3, %v771_v61  ;;  %v749_v8 = vrot.slane %v735_v5, 2 }
 0x221   :  { %v9632_v9 = vadd.f32 %v9629_v4, %v775_v7  ;;  %v9634_v10 = vadd.f32 %v749_v8, %v747_v0 }
 0x222   :  { %v8217_v11 = vpop.f32.mrf.mxu1 }
 0x224   :  { %v873_v12 = vpop.f32.mrf.mxu1 }
 0x227   :  { %v8228_v13 = vpop.f32.mrf.mxu0  ;;  %v8242_v14 = vpop.f32.mrf.mxu1 }
 0x228   :  { %v971_v15 = vrot.slane %v8228_v13, 1 }
 0x229   :  { %v948_v17 = vpop.f32.mrf.mxu0  ;;  %v1084_v18 = vpop.f32.mrf.mxu1 }
 0x22a   :  { %v976_v19 = vadd.f32 %v8214_v2, %v971_v15  ;;  %v970_v20 = vrot.slane %v948_v17, 1 }
 0x22c   :  { %v984_v21 = vadd.f32 %v6994_v16, %v976_v19  ;;  %v972_v22 = vsel %vm969_vm9, %v970_v20, %v971_v15 }
 0x22d   :  { %v975_v23 = vadd.f32 %v972_v22, %v863_v6  ;;  %v8231_v24 = vpop.f32.mrf.mxu0  ;;  %v8245_v25 = vpop.f32.mrf.mxu1 }
 0x22e   :  { %v999_v29 = vrot.slane %v8231_v24, 1  ;;  %v986_v30 = vmax.f32 %v984_v21, 0.0 }
 0x22f   :  { %v983_v33 = vadd.f32 %v6994_v16, %v975_v23  ;;  %v958_v34 = vpop.f32.mrf.mxu0  ;;  %v1094_v35 = vpop.f32.mrf.mxu1 }
 0x230   :  { %v1004_v36 = vadd.f32 %v8217_v11, %v999_v29  ;;  %v998_v37 = vrot.slane %v958_v34, 1  ;;  %v988_v43 = vsel %vm498_vm10, %v986_v30, -inf }
 0x231   :  { %v985_v38 = vmax.f32 %v983_v33, 0.0 }
 0x232   :  { %v1006_v41 = vadd.f32 %v6994_v16, %v1004_v36  ;;  %v1000_v42 = vsel %vm969_vm9, %v998_v37, %v999_v29 }
 0x233   :  { %v987_v44 = vsel %vm329_vm8, %v985_v38, -inf  ;;  %v1003_v47 = vadd.f32 %v1000_v42, %v873_v12  ;;  %v8256_v48 = vpop.f32.mrf.mxu0  ;;  %v8270_v49 = vpop.f32.mrf.mxu1 }
 0x234   :  { %v9643_v50 = vmax.f32 %v987_v44, %v988_v43  ;;  %v1276_v51 = vrot.slane %v8256_v48, 1  ;;  %v1008_v52 = vmax.f32 %v1006_v41, 0.0  ;;  %v1286_v59 = vrot.slane %v8270_v49, 2 }
 0x235   :  { %v1005_v53 = vadd.f32 %v6994_v16, %v1003_v47  ;;  %v1169_v54 = vpop.f32.mrf.mxu0  ;;  %v1254_v57 = vpop.f32.mrf.mxu1 }
 0x236   :  { %v1281_v58 = vadd.f32 %v8242_v14, %v1276_v51  ;;  %v1275_v60 = vrot.slane %v1169_v54, 1  ;;  %v1285_v61 = vrot.slane %v1254_v57, 2  ;;  %v1010_v3 = vsel %vm498_vm10, %v1008_v52, -inf  ;;  %v7044_v52 = vld [vmem:[%s11515_s5 + $0x90] sm:$0xff]  ;;  %v7043_v54 = vld [vmem:[%s11515_s5 + $0x88] sm:$0xff] }
 0x237   :  { %v1007_v62 = vmax.f32 %v1005_v53, 0.0  ;;  %v7039_v53 = vld [vmem:[%s11515_s5 + $0x68] sm:$0xff] }
 0x238   :  { %v1291_v0 = vadd.f32 %v1286_v59, %v1281_v58  ;;  %v1277_v1 = vsel %vm969_vm9, %v1275_v60, %v1276_v51  ;;  %v1287_v2 = vsel %vm1284_vm11, %v1285_v61, %v1286_v59  ;;  %v7040_v51 = vld [vmem:[%s11515_s5 + $0x70] sm:$0xff]  ;;  %v7049_v58 = vld [vmem:[%s11515_s5 + $0xb8] sm:$0xff] }
 0x239   :  { %v1009_v5 = vsel %vm329_vm8, %v1007_v62, -inf  ;;  %v1280_v6 = vadd.f32 %v1277_v1, %v1084_v18  ;;  %v8259_v7 = vpop.f32.mrf.mxu0  ;;  %v8273_v8 = vpop.f32.mrf.mxu1  ;;  %v7054_v59 = vld [vmem:[%s11517_s7 + $0x58] sm:$0xff]  ;;  %v7048_v60 = vld [vmem:[%s11515_s5 + $0xb0] sm:$0xff]  ;;  %v7046_v1 = vld [vmem:[%s11515_s5 + $0xa0] sm:$0xff] }
 0x23a   :  { %v1299_v11 = vadd.f32 %v7007_v63, %v1291_v0  ;;  %v1314_v12 = vrot.slane %v8259_v7, 1  ;;  %v9652_v13 = vmax.f32 %v1009_v5, %v1010_v3  ;;  %v1323_v19 = vrot.slane %v8273_v8, 2  ;;  %v7053_v61 = vld [vmem:[%s11517_s7 + $0x50] sm:$0xff]  ;;  %v7052_v0 = vld [vmem:[%s11517_s7 + $0x48] sm:$0xff]  ;;  %v7058_v5 = vld [vmem:[%s11517_s7 + $0x78] sm:$0xff] }
 0x23b   :  { %v1290_v14 = vadd.f32 %v1287_v2, %v1280_v6  ;;  %v1179_v15 = vpop.f32.mrf.mxu0  ;;  %v1264_v16 = vpop.f32.mrf.mxu1  ;;  %v7051_v2 = vld [vmem:[%s11517_s7 + $0x40] sm:$0xff]  ;;  %v7063_v6 = vld [vmem:[%s11519_s9 + $0x78] sm:$0xff]  ;;  %v7057_v8 = vld [vmem:[%s11517_s7 + $0x70] sm:$0xff] }
 0x23c   :  { %v1319_v17 = vadd.f32 %v8245_v25, %v1314_v12  ;;  %v1313_v20 = vrot.slane %v1179_v15, 1  ;;  %v1322_v21 = vrot.slane %v1264_v16, 2  ;;  %v1301_v22 = vmax.f32 %v1299_v11, 0.0  ;;  %v7062_v11 = vld [vmem:[%s11519_s9 + $0x70] sm:$0xff]  ;;  %v7055_v15 = vld [vmem:[%s11517_s7 + $0x60] sm:$0xff] }
 0x23d   :  { %v1298_v23 = vadd.f32 %v7007_v63, %v1290_v14  ;;  %v7061_v14 = vld [vmem:[%s11519_s9 + $0x68] sm:$0xff]  ;;  %v7060_v16 = vld [vmem:[%s11519_s9 + $0x60] sm:$0xff] }
 0x23e   :  { %v1328_v24 = vadd.f32 %v1323_v19, %v1319_v17  ;;  %v1315_v29 = vsel %vm969_vm9, %v1313_v20, %v1314_v12  ;;  %v1324_v18 = vsel %vm1284_vm11, %v1322_v21, %v1323_v19  ;;  %v1303_v36 = vsel %vm760_vm12, %v1301_v22, -inf  ;;  %v7056_v12 = vld [vmem:[%s11517_s7 + $0x68] sm:$0xff]  ;;  %v7067_v17 = vld [vmem:[%s11519_s9 + $0x98] sm:$0xff]  ;;  %v7066_v20 = vld [vmem:[%s11519_s9 + $0x90] sm:$0xff] }
 0x23f   :  { %v1300_v30 = vmax.f32 %v1298_v23, 0.0  ;;  %v1318_v33 = vadd.f32 %v1315_v29, %v1094_v35  ;;  %v7071_v19 = vld [vmem:[%s11519_s9 + $0xb8] sm:$0xff]  ;;  %v7070_v21 = vld [vmem:[%s11519_s9 + $0xb0] sm:$0xff]  ;;  %v7065_v22 = vld [vmem:[%s11519_s9 + $0x88] sm:$0xff] }
 0x240   :  { %v1330_v34 = vadd.f32 %v7007_v63, %v1328_v24  ;;  %v7069_v23 = vld [vmem:[%s11519_s9 + $0xa8] sm:$0xff]  ;;  %v7064_v24 = vld [vmem:[%s11519_s9 + $0x80] sm:$0xff] }
 0x241   :  { %v1302_v37 = vsel %vm329_vm8, %v1300_v30, -inf  ;;  %v1327_v38 = vadd.f32 %v1324_v18, %v1318_v33  ;;  %v7068_v29 = vld [vmem:[%s11519_s9 + $0xa0] sm:$0xff]  ;;  %v7119_v18 = vld [vmem:[%s11512_s2 + $0x130] sm:$0xf]  ;;  %v7118_v30 = vld [vmem:[%s11512_s2 + $0x128] sm:$0xff] }
 0x242   :  { %v9658_v25 = vmax.f32 %v1302_v37, %v1303_v36  ;;  %v1332_v41 = vmax.f32 %v1330_v34, 0.0  ;;  %v7117_v33 = vld [vmem:[%s11512_s2 + $0x120] sm:$0xff]  ;;  %v7116_v34 = vld [vmem:[%s11512_s2 + $0x118] sm:$0xff]  ;;  %v7115_v36 = vld [vmem:[%s11512_s2 + $0x110] sm:$0xff] }
 0x243   :  { %v1329_v42 = vadd.f32 %v7007_v63, %v1327_v38  ;;  %v7047_v63 = vld [vmem:[%s11515_s5 + $0xa8] sm:$0xff]  ;;  %v7113_v38 = vld [vmem:[%s11512_s2 + $0x100] sm:$0xff] }
 0x244   :  { %v1334_v44 = vsel %vm760_vm12, %v1332_v41, -inf  ;;  %v7114_v37 = vld [vmem:[%s11512_s2 + $0x108] sm:$0xff]  ;;  %v7112_v41 = vld [vmem:[%s11512_s2 + $0xf8] sm:$0xff] }
 0x245   :  { %v1331_v43 = vmax.f32 %v1329_v42, 0.0  ;;  %v7111_v42 = vld [vmem:[%s11512_s2 + $0xf0] sm:$0xff] }
 0x247   :  { %v1333_v47 = vsel %vm329_vm8, %v1331_v43, -inf  ;;  %v7110_v43 = vld [vmem:[%s11512_s2 + $0xe8] sm:$0xff] }
 0x248   :  { %v9662_v48 = vmax.f32 %v1333_v47, %v1334_v44  ;;  %v7109_v44 = vld [vmem:[%s11512_s2 + $0xe0] sm:$0xff]  ;;  %v7108_v47 = vld [vmem:[%s11512_s2 + $0xd8] sm:$0xff] }
 0x251   :  { %v8302_v49 = vpop.f32.mrf.mxu0  ;;  %v9690_v57 = vpop.f32.mrf.mxu1 }
 0x253   :  { %v1425_v35 = vpop.f32.mrf.mxu0  ;;  %v9706_v62 = vpop.f32.mrf.mxu1 }
 0x254   :  { %8343 = vmatprep.mubr.msk.f32.mxu0 %vm329_vm8, %v1425_v35  ;;  %8354 = vmatprep.mubr.msk.f32.mxu1 %vm329_vm8, %v1425_v35 }
 0x255   :  { %8344 = vmatmul.mubr.msk.f32.vlgmr.msra.gmra.mxu0 %vm329_vm8, %v8302_v49  ;;  %8355 = vmatmul.mubr.msk.f32.vlgmr.msra.gmra.mxu1 %vm329_vm8, %v8302_v49  ;;  %v9723_v3 = vpop.f32.mrf.mxu1 }
 0x256   :  { %8358 = vmatpush3.msra.mxu0 %v9610_v45  ;;  %8369 = vmatpush3.msra.mxu1 %v9615_v46  ;;  %v7038_v45 = vld [vmem:[%s11515_s5 + $0x60] sm:$0xff] }
 0x257   :  { %8359 = vmatprep.subr.mxu0 %v7040_v51  ;;  %8365 = vmatprep.mubr.msk.f32.mxu0 %vm329_vm8, %v1425_v35  ;;  %v7042_v46 = vld [vmem:[%s11515_s5 + $0x80] sm:$0xff]  ;;  %v9734_v7 = vpop.f32.mrf.mxu1 }
 0x258   :  { %8370 = vmatprep.subr.mxu1 %v7044_v52  ;;  %8376 = vmatprep.mubr.msk.f32.mxu1 %vm329_vm8, %v1425_v35 }
 0x259   :  { %8360 = vmatpush3.msra.mxu0 %v7040_v51  ;;  %8371 = vmatpush3.msra.mxu1 %v7044_v52  ;;  %v7135_v51 = vld [vmem:[%s11513_s3 + $0xb8] sm:$0xff]  ;;  %v7130_v52 = vld [vmem:[%s11513_s3 + $0x90] sm:$0xff] }
 0x25a   :  { %8361 = vmatprep.subr.mxu0 %v7039_v53  ;;  %8372 = vmatprep.subr.mxu1 %v7043_v54 }
 0x25b   :  { %8362 = vmatpush3.msra.mxu0 %v7039_v53  ;;  %8373 = vmatpush3.msra.mxu1 %v7043_v54  ;;  %v7134_v53 = vld [vmem:[%s11513_s3 + $0xb0] sm:$0xff]  ;;  %v7129_v54 = vld [vmem:[%s11513_s3 + $0x88] sm:$0xff] }
 0x25c   :  { %8363 = vmatprep.subr.mxu0 %v7038_v45  ;;  %8374 = vmatprep.subr.mxu1 %v7042_v46 }
 0x25d   :  { %8364 = vmatpush3.msra.mxu0 %v7038_v45  ;;  %8375 = vmatpush3.msra.mxu1 %v7042_v46  ;;  %v7133_v45 = vld [vmem:[%s11513_s3 + $0xa8] sm:$0xff]  ;;  %v7128_v46 = vld [vmem:[%s11513_s3 + $0x80] sm:$0xff] }
 0x25e   :  { %8366 = vmatmul.mubr.msk.f32.vlgmr.msra.gmra.mxu0 %vm329_vm8, %v8302_v49  ;;  %8377 = vmatmul.mubr.msk.f32.vlgmr.msra.gmra.mxu1 %vm329_vm8, %v8302_v49 }
 0x25f   :  { %8379 = vmatprep.subr.mxu0 %v7049_v58  ;;  %8390 = vmatprep.subr.mxu1 %v7054_v59 }
 0x260   :  { %8380 = vmatpush3.msra.mxu0 %v7049_v58  ;;  %8387 = vmatprep.mubr.msk.f32.mxu0 %vm329_vm8, %v1425_v35  ;;  %v7131_v35 = vld [vmem:[%s11513_s3 + $0x98] sm:$0xff] }
 0x261   :  { %8391 = vmatpush3.msra.mxu1 %v7054_v59  ;;  %8398 = vmatprep.mubr.msk.f32.mxu1 %vm329_vm8, %v9706_v62  ;;  %v9896_v58 = vld [vmem:[%s11515_s5 + $0xd8] sm:$0xff] }
 0x262   :  { %8381 = vmatprep.subr.mxu0 %v7048_v60  ;;  %8392 = vmatprep.subr.mxu1 %v7053_v61  ;;  %v9901_v59 = vld [vmem:[%s11515_s5 + $0xf8] sm:$0xff] }
 0x263   :  { %8382 = vmatpush3.msra.mxu0 %v7048_v60  ;;  %8393 = vmatpush3.msra.mxu1 %v7053_v61 }
 0x264   :  { %8383 = vmatprep.subr.mxu0 %v7047_v63  ;;  %8394 = vmatprep.subr.mxu1 %v7052_v0 }
 0x265   :  { %8384 = vmatpush3.msra.mxu0 %v7047_v63  ;;  %8395 = vmatpush3.msra.mxu1 %v7052_v0  ;;  %v7077_v63 = vld [vmem:[%s11514_s4 + $0x1] ss:$0 sm:$0xff] }
 0x266   :  { %8385 = vmatprep.subr.mxu0 %v7046_v1  ;;  %8396 = vmatprep.subr.mxu1 %v7051_v2 }
 0x267   :  { %8386 = vmatpush3.msra.mxu0 %v7046_v1  ;;  %8397 = vmatpush3.msra.mxu1 %v7051_v2 }
 0x268   :  { %8388 = vmatmul.mubr.msk.f32.vlgmr.msra.gmra.mxu0 %vm329_vm8, %v8302_v49  ;;  %8399 = vmatmul.mubr.msk.f32.vlgmr.msra.gmra.mxu1 %vm329_vm8, %v9690_v57  ;;  %v7107_v49 = vld [vmem:[%s11512_s2 + $0xd0] sm:$0xff] }
 0x269   :  { %8404 = vmatprep.subr.mxu0 %v7058_v5  ;;  %8418 = vmatprep.subr.mxu1 %v7063_v6 }
 0x26a   :  { %8401 = vmatprep.mubr.msk.f32.mxu1 %vm329_vm8, %v9734_v7  ;;  %8405 = vmatpush3.msra.mxu0 %v7058_v5 }
 0x26b   :  { %8412 = vmatprep.mubr.msk.f32.mxu0 %vm329_vm8, %v9706_v62  ;;  %8419 = vmatpush3.msra.mxu1 %v7063_v6 }
 0x26c   :  { %8406 = vmatprep.subr.mxu0 %v7057_v8  ;;  %8420 = vmatprep.subr.mxu1 %v7062_v11 }
 0x26d   :  { %8407 = vmatpush3.msra.mxu0 %v7057_v8  ;;  %8421 = vmatpush3.msra.mxu1 %v7062_v11  ;;  %v758_v8 = vadd.f32 %v9629_v4, %v9634_v10 }
 0x26e   :  { %8402 = vmatmul.mubr.msk.f32.gmra.mxu1 %vm329_vm8, %v9723_v3  ;;  %8408 = vmatprep.subr.mxu0 %v7056_v12 }
 0x26f   :  { %8422 = vmatprep.subr.mxu1 %v7061_v14  ;;  %8409 = vmatpush3.msra.mxu0 %v7056_v12 }
 0x270   :  { %8423 = vmatpush3.msra.mxu1 %v7061_v14  ;;  %8426 = vmatprep.mubr.msk.f32.mxu1 %vm329_vm8, %v9706_v62 }
 0x271   :  { %8410 = vmatprep.subr.mxu0 %v7055_v15  ;;  %8424 = vmatprep.subr.mxu1 %v7060_v16 }
 0x272   :  { %8411 = vmatpush3.msra.mxu0 %v7055_v15  ;;  %8425 = vmatpush3.msra.mxu1 %v7060_v16  ;;  %v759_v15 = vmax.f32 %v758_v8, 0.0 }
 0x273   :  { %8413 = vmatmul.mubr.msk.f32.vlgmr.msra.gmra.mxu0 %vm329_vm8, %v9690_v57  ;;  %8427 = vmatmul.mubr.msk.f32.vlgmr.msra.gmra.mxu1 %vm329_vm8, %v9690_v57 }
 0x274   :  { %8432 = vmatprep.subr.mxu0 %v7067_v17  ;;  %8446 = vmatprep.subr.mxu1 %v7071_v19 }
 0x275   :  { %8415 = vmatprep.mubr.msk.f32.mxu0 %vm329_vm8, %v9734_v7  ;;  %8429 = vmatprep.mubr.msk.f32.mxu1 %vm329_vm8, %v9734_v7 }
 0x276   :  { %8433 = vmatpush3.msra.mxu0 %v7067_v17  ;;  %8447 = vmatpush3.msra.mxu1 %v7071_v19  ;;  %v761_v19 = vsel %vm760_vm12, %v759_v15, -inf }
 0x277   :  { %8434 = vmatprep.subr.mxu0 %v7066_v20  ;;  %8448 = vmatprep.subr.mxu1 %v7070_v21 }
 0x278   :  { %8435 = vmatpush3.msra.mxu0 %v7066_v20  ;;  %8449 = vmatpush3.msra.mxu1 %v7070_v21 }
 0x279   :  { %8416 = vmatmul.mubr.msk.f32.gmra.mxu0 %vm329_vm8, %v9723_v3  ;;  %8430 = vmatmul.mubr.msk.f32.gmra.mxu1 %vm329_vm8, %v9723_v3 }
 0x27a   :  { %8436 = vmatprep.subr.mxu0 %v7065_v22  ;;  %8450 = vmatprep.subr.mxu1 %v7069_v23 }
 0x27b   :  { %8437 = vmatpush3.msra.mxu0 %v7065_v22  ;;  %8440 = vmatprep.mubr.msk.f32.mxu0 %vm329_vm8, %v9706_v62 }
 0x27c   :  { %8451 = vmatpush3.msra.mxu1 %v7069_v23  ;;  %8454 = vmatprep.mubr.msk.f32.mxu1 %vm329_vm8, %v9706_v62 }
 0x27d   :  { %8438 = vmatprep.subr.mxu0 %v7064_v24  ;;  %8452 = vmatprep.subr.mxu1 %v7068_v29 }
 0x27e   :  { %8439 = vmatpush3.msra.mxu0 %v7064_v24  ;;  %8453 = vmatpush3.msra.mxu1 %v7068_v29  ;;  %v762_v24 = vrot.slane %v761_v19, 4  ;;  %v7084_v29 = vld [vmem:[%s11516_s6 + $0x1] ss:$0 sm:$0xff] }
 0x27f   :  { %8441 = vmatmul.mubr.msk.f32.vlgmr.msra.gmra.mxu0 %vm329_vm8, %v9690_v57  ;;  %8455 = vmatmul.mubr.msk.f32.vlgmr.msra.gmra.mxu1 %vm329_vm8, %v9690_v57  ;;  %v7132_v57 = vld [vmem:[%s11513_s3 + $0xa0] sm:$0xff] }
 0x280   :  { %8460 = vmatprep.subr.msk.mxu0 %vm109_vm0, %v7119_v18  ;;  %8489 = vmatprep.subr.msk.mxu1 %vm109_vm0, %v7119_v18 }
 0x281   :  { %8443 = vmatprep.mubr.msk.f32.mxu0 %vm329_vm8, %v9734_v7  ;;  %8457 = vmatprep.mubr.msk.f32.mxu1 %vm329_vm8, %v9734_v7 }
 0x282   :  { %8461 = vmatpush3.msk.msra.mxu0 %vm109_vm0, %v7119_v18  ;;  %8490 = vmatpush3.msk.msra.mxu1 %vm109_vm0, %v7119_v18 }
 0x283   :  { %8462 = vmatprep.subr.mxu0 %v7118_v30  ;;  %8491 = vmatprep.subr.mxu1 %v7118_v30 }
 0x284   :  { %8463 = vmatpush3.msra.mxu0 %v7118_v30  ;;  %8492 = vmatpush3.msra.mxu1 %v7118_v30 }
 0x285   :  { %8444 = vmatmul.mubr.msk.f32.gmra.mxu0 %vm329_vm8, %v9723_v3  ;;  %8458 = vmatmul.mubr.msk.f32.gmra.mxu1 %vm329_vm8, %v9723_v3 }
 0x286   :  { %8464 = vmatprep.subr.mxu0 %v7117_v33  ;;  %8493 = vmatprep.subr.mxu1 %v7117_v33 }
 0x287   :  { %8465 = vmatpush3.msra.mxu0 %v7117_v33  ;;  %8486 = vmatprep.mubr.msk.f32.mxu0 %vm102_vm1, %v9327_v27 }
 0x288   :  { %8494 = vmatpush3.msra.mxu1 %v7117_v33  ;;  %8515 = vmatprep.mubr.msk.f32.mxu1 %vm102_vm1, %v9330_v28 }
 0x289   :  { %8466 = vmatprep.subr.mxu0 %v7116_v34  ;;  %8495 = vmatprep.subr.mxu1 %v7116_v34 }
 0x28a   :  { %8467 = vmatpush3.msra.mxu0 %v7116_v34  ;;  %8496 = vmatpush3.msra.mxu1 %v7116_v34 }
 0x28b   :  { %8468 = vmatprep.subr.mxu0 %v7115_v36  ;;  %8497 = vmatprep.subr.mxu1 %v7115_v36 }
 0x28c   :  { %8469 = vmatpush3.msra.mxu0 %v7115_v36  ;;  %8498 = vmatpush3.msra.mxu1 %v7115_v36 }
 0x28d   :  { %8470 = vmatprep.subr.mxu0 %v7114_v37  ;;  %8499 = vmatprep.subr.mxu1 %v7114_v37 }
 0x28e   :  { %8471 = vmatpush3.msra.mxu0 %v7114_v37  ;;  %8500 = vmatpush3.msra.mxu1 %v7114_v37  ;;  %v763_v37 = vmax.f32 %v761_v19, %v762_v24 }
 0x28f   :  { %8472 = vmatprep.subr.mxu0 %v7113_v38  ;;  %8501 = vmatprep.subr.mxu1 %v7113_v38 }
 0x290   :  { %8473 = vmatpush3.msra.mxu0 %v7113_v38  ;;  %8502 = vmatpush3.msra.mxu1 %v7113_v38 }
 0x291   :  { %8474 = vmatprep.subr.mxu0 %v7112_v41  ;;  %8503 = vmatprep.subr.mxu1 %v7112_v41 }
 0x292   :  { %8475 = vmatpush3.msra.mxu0 %v7112_v41  ;;  %8504 = vmatpush3.msra.mxu1 %v7112_v41 }
 0x293   :  { %8476 = vmatprep.subr.mxu0 %v7111_v42  ;;  %8505 = vmatprep.subr.mxu1 %v7111_v42 }
 0x294   :  { %8477 = vmatpush3.msra.mxu0 %v7111_v42  ;;  %8506 = vmatpush3.msra.mxu1 %v7111_v42 }
 0x295   :  { %8478 = vmatprep.subr.mxu0 %v7110_v43  ;;  %8507 = vmatprep.subr.mxu1 %v7110_v43 }
 0x296   :  { %8479 = vmatpush3.msra.mxu0 %v7110_v43  ;;  %8508 = vmatpush3.msra.mxu1 %v7110_v43 }
 0x297   :  { %8480 = vmatprep.subr.mxu0 %v7109_v44  ;;  %8509 = vmatprep.subr.mxu1 %v7109_v44 }
 0x298   :  { %8481 = vmatpush3.msra.mxu0 %v7109_v44  ;;  %8510 = vmatpush3.msra.mxu1 %v7109_v44  ;;  %v764_v44 = vrot.slane %v763_v37, 2 }
 0x299   :  { %8482 = vmatprep.subr.mxu0 %v7108_v47  ;;  %8511 = vmatprep.subr.mxu1 %v7108_v47 }
 0x29a   :  { %8483 = vmatpush3.msra.mxu0 %v7108_v47  ;;  %8512 = vmatpush3.msra.mxu1 %v7108_v47 }
 0x29b   :  { %8484 = vmatprep.subr.mxu0 %v7107_v49  ;;  %8513 = vmatprep.subr.mxu1 %v7107_v49 }
 0x29c   :  { %8485 = vmatpush3.msra.mxu0 %v7107_v49  ;;  %8514 = vmatpush3.msra.mxu1 %v7107_v49 }
 0x29d   :  { %8487 = vmatmul.mubr.msk.f32.vlgmr.msra.gmra.mxu0 %vm102_vm1, %v9337_v31  ;;  %8516 = vmatmul.mubr.msk.f32.vlgmr.msra.gmra.mxu1 %vm102_vm1, %v9340_v32 }
 0x29e   :  { %8518 = vmatprep.mubr.msk.f32.mxu1 %vm102_vm1, %v9359_v39  ;;  %8521 = vmatprep.subr.mxu0 %v7131_v35 }
 0x29f   :  { %8532 = vmatprep.subr.mxu1 %v7135_v51  ;;  %8522 = vmatpush3.msra.mxu0 %v7131_v35 }
 0x2a0   :  { %8533 = vmatpush3.msra.mxu1 %v7135_v51  ;;  %8523 = vmatprep.subr.mxu0 %v7130_v52 }
 0x2a1   :  { %8519 = vmatmul.mubr.msk.f32.gmra.mxu1 %vm102_vm1, %v9362_v40  ;;  %8534 = vmatprep.subr.mxu1 %v7134_v53 }
 0x2a2   :  { %8524 = vmatpush3.msra.mxu0 %v7130_v52  ;;  %8535 = vmatpush3.msra.mxu1 %v7134_v53  ;;  %v7093_v53 = vld [vmem:[%s11518_s8 + $0x1] ss:$0 sm:$0xff] }
 0x2a3   :  { %8525 = vmatprep.subr.mxu0 %v7129_v54  ;;  %8536 = vmatprep.subr.mxu1 %v7133_v45 }
 0x2a4   :  { %8526 = vmatpush3.msra.mxu0 %v7129_v54  ;;  %8537 = vmatpush3.msra.mxu1 %v7133_v45 }
 0x2a5   :  { %8527 = vmatprep.subr.mxu0 %v7128_v46  ;;  %8538 = vmatprep.subr.mxu1 %v7132_v57 }
 0x2a6   :  { %8528 = vmatpush3.msra.mxu0 %v7128_v46  ;;  %8539 = vmatpush3.msra.mxu1 %v7132_v57 }
 0x2a7   :  { %8543 = vmatprep.subr.mxu0 %v9896_v58  ;;  %8554 = vmatprep.subr.mxu1 %v9901_v59 }
 0x315   :  { %v8345_v60 = vpop.f32.mrf.mxu0  ;;  %v8356_v61 = vpop.f32.mrf.mxu1 }
 0x316   :  { %v1747_v62 = vrot.slane %v8356_v61, 1  ;;  %v765_v61 = vmax.f32 %v763_v37, %v764_v44 }
 0x317   :  { %v1718_v0 = vpop.f32.mrf.mxu1  ;;  %v1643_v3 = vpop.f32.mrf.mxu0 }
 0x318   :  { %v1749_v1 = vadd.f32 %v8345_v60, %v1747_v62  ;;  %v1728_v2 = vrot.slane %v1718_v0, 1  ;;  %v990_v62 = vrot.slane %v9643_v50, 4 }
 0x31a   :  { %v9908_v5 = vadd.f32 %v7077_v63, %v1749_v1  ;;  %v9910_v6 = vadd.f32 %v1728_v2, %v1643_v3  ;;  %v991_v19 = vmax.f32 %v9643_v50, %v990_v62 }
 0x31c   :  { %11562 = vst [vmem:[#allocation6_spill] sm:$0xff] %v9908_v5 }
 0x31e   :  { %v8378_v7 = vpop.f32.mrf.mxu1  ;;  %v8367_v12 = vpop.f32.mrf.mxu0 }
 0x31f   :  { %v2008_v11 = vrot.slane %v8378_v7, 1 }
 0x320   :  { %v1900_v16 = vpop.f32.mrf.mxu1  ;;  %v1825_v17 = vpop.f32.mrf.mxu0 }
 0x321   :  { %v2010_v14 = vadd.f32 %v8367_v12, %v2008_v11  ;;  %v1985_v20 = vrot.slane %v1900_v16, 1  ;;  %v766_v11 = vrot.slane %v765_v61, 1 }
 0x323   :  { %v1987_v4 = vadd.f32 %v1985_v20, %v1825_v17 }
 0x328   :  { %v8389_v21 = vpop.f32.mrf.mxu0  ;;  %v8400_v22 = vpop.f32.mrf.mxu1 }
 0x329   :  { %v2012_v23 = vrot.slane %v8389_v21, 2 }
 0x32a   :  { %v1975_v18 = vpop.f32.mrf.mxu0  ;;  %v2102_v30 = vpop.f32.mrf.mxu1 }
 0x32b   :  { %v2014_v10 = vadd.f32 %v2012_v23, %v2010_v14  ;;  %v1989_v33 = vrot.slane %v1975_v18, 2  ;;  %v767_v18 = vmax.f32 %v765_v61, %v766_v11  ;;  %v7106_v61 = vld [vmem:[%s11520_s10 + $0x1] ss:$0 sm:$0xff] }
 0x32d   :  { %v9918_v34 = vadd.f32 %v7084_v29, %v2014_v10  ;;  %v1991_v36 = vadd.f32 %v1989_v33, %v1987_v4 }
 0x32e   :  { %v8403_v38 = vpop.f32.mrf.mxu1 }
 0x32f   :  { %v1998_v41 = vadd.f32 %v7084_v29, %v1991_v36 }
 0x330   :  { %v2112_v42 = vpop.f32.mrf.mxu1 }
 0x331   :  { %v1999_v43 = vmax.f32 %v1998_v41, 0.0  ;;  %v992_v41 = vrot.slane %v991_v19, 2 }
 0x333   :  { %v2000_v47 = vsel %vm760_vm12, %v1999_v43, -inf  ;;  %v8414_v49 = vpop.f32.mrf.mxu0  ;;  %v8428_v35 = vpop.f32.mrf.mxu1 }
 0x334   :  { %v2001_v51 = vrot.slane %v2000_v47, 4  ;;  %v2209_v52 = vrot.slane %v8414_v49, 1 }
 0x335   :  { %v2187_v54 = vpop.f32.mrf.mxu0  ;;  %v2322_v45 = vpop.f32.mrf.mxu1 }
 0x336   :  { %v2002_v46 = vmax.f32 %v2000_v47, %v2001_v51  ;;  %v2214_v57 = vadd.f32 %v8400_v22, %v2209_v52  ;;  %v2208_v60 = vrot.slane %v2187_v54, 1 }
 0x338   :  { %v2222_v63 = vadd.f32 %v7093_v53, %v2214_v57  ;;  %v2210_v0 = vsel %vm969_vm9, %v2208_v60, %v2209_v52  ;;  %v2003_v1 = vrot.slane %v2002_v46, 2 }
 0x339   :  { %v2213_v2 = vadd.f32 %v2210_v0, %v2102_v30  ;;  %v8417_v3 = vpop.f32.mrf.mxu0  ;;  %v8431_v7 = vpop.f32.mrf.mxu1  ;;  %v1305_v0 = vrot.slane %v9658_v25, 4 }
 0x33a   :  { %v2237_v8 = vrot.slane %v8417_v3, 1  ;;  %v2004_v12 = vmax.f32 %v2002_v46, %v2003_v1  ;;  %v2224_v14 = vmax.f32 %v2222_v63, 0.0 }
 0x33b   :  { %v2221_v15 = vadd.f32 %v7093_v53, %v2213_v2  ;;  %v2197_v16 = vpop.f32.mrf.mxu0  ;;  %v9926_v17 = vpop.f32.mrf.mxu1 }
 0x33c   :  { %v2242_v20 = vadd.f32 %v8403_v38, %v2237_v8  ;;  %v2236_v21 = vrot.slane %v2197_v16, 1  ;;  %v2005_v22 = vrot.slane %v2004_v12, 1  ;;  %v2226_v4 = vsel %vm498_vm10, %v2224_v14, -inf }
 0x33d   :  { %v2223_v23 = vmax.f32 %v2221_v15, 0.0 }
 0x33e   :  { %v2244_v24 = vadd.f32 %v7093_v53, %v2242_v20  ;;  %v2238_v29 = vsel %vm969_vm9, %v2236_v21, %v2237_v8  ;;  %v2006_v30 = vmax.f32 %v2004_v12, %v2005_v22 }
 0x33f   :  { %v2225_v10 = vsel %vm329_vm8, %v2223_v23, -inf  ;;  %v2241_v33 = vadd.f32 %v2238_v29, %v2112_v42  ;;  %v8442_v36 = vpop.f32.mrf.mxu0  ;;  %v8456_v37 = vpop.f32.mrf.mxu1  ;;  %v993_v42 = vmax.f32 %v991_v19, %v992_v41  ;;  %v1306_v41 = vmax.f32 %v9658_v25, %v1305_v0 }
 0x340   :  { %v2227_v43 = vmax.f32 %v2225_v10, %v2226_v4  ;;  %v2514_v44 = vrot.slane %v8442_v36, 1  ;;  %v2246_v50 = vmax.f32 %v2244_v24, 0.0  ;;  %v9097_v51 = vpack.i.bf16 %v767_v18, %v2006_v30 }
 0x341   :  { %v2243_v38 = vadd.f32 %v7093_v53, %v2241_v33  ;;  %v2407_v47 = vpop.f32.mrf.mxu0  ;;  %v2492_v49 = vpop.f32.mrf.mxu1  ;;  %v2523_v54 = vrot.slane %v8456_v37, 2  ;;  %v994_v22 = vrot.slane %v993_v42, 1 }
 0x342   :  { %v2519_v52 = vadd.f32 %v8428_v35, %v2514_v44  ;;  %v2513_v46 = vrot.slane %v2407_v47, 1  ;;  %v2522_v57 = vrot.slane %v2492_v49, 2  ;;  %9098 = vrot.lane.b32.xlu0 %v9097_v51, %s9184_s27  ;;  %v2228_v62 = vrot.slane %v2227_v43, 4 }
 0x343   :  { %v2245_v60 = vmax.f32 %v2243_v38, 0.0  ;;  %v2248_v35 = vsel %vm498_vm10, %v2246_v50, -inf  ;;  %v995_v47 = vmax.f32 %v993_v42, %v994_v22 }
 0x344   :  { %v2528_v63 = vadd.f32 %v2523_v54, %v2519_v52  ;;  %v2515_v53 = vsel %vm969_vm9, %v2513_v46, %v2514_v44  ;;  %v2229_v11 = vmax.f32 %v2227_v43, %v2228_v62  ;;  %v2524_v15 = vsel %vm1284_vm11, %v2522_v57, %v2523_v54 }
 0x345   :  { %v2247_v1 = vsel %vm329_vm8, %v2245_v60, -inf  ;;  %v2518_v2 = vadd.f32 %v2515_v53, %v2322_v45  ;;  %v8445_v3 = vpop.f32.mrf.mxu0  ;;  %v8459_v8 = vpop.f32.mrf.mxu1  ;;  %v1307_v57 = vrot.slane %v1306_v41, 2 }
 0x346   :  { %v9940_v12 = vmax.f32 %v2247_v1, %v2248_v35  ;;  %v2536_v14 = vadd.f32 %v7106_v61, %v2528_v63  ;;  %v2551_v16 = vrot.slane %v8445_v3, 1  ;;  %v2230_v23 = vrot.slane %v2229_v11, 2 }
 0x347   :  { %v2527_v19 = vadd.f32 %v2524_v15, %v2518_v2  ;;  %v2417_v20 = vpop.f32.mrf.mxu0  ;;  %v2502_v21 = vpop.f32.mrf.mxu1  ;;  %v2560_v29 = vrot.slane %v8459_v8, 2  ;;  %v1308_v42 = vmax.f32 %v1306_v41, %v1307_v57  ;;  %v7142_v41 = vld [vmem:[%s11515_s5 + $0xe8] sm:$0xff]  ;;  %v7157_v57 = vld [vmem:[%s11517_s7 + $0xb8] sm:$0xff] }
 0x348   :  { %v2556_v24 = vadd.f32 %v8431_v7, %v2551_v16  ;;  %v2550_v18 = vrot.slane %v2417_v20, 1  ;;  %v2559_v30 = vrot.slane %v2502_v21, 2  ;;  %v2538_v4 = vmax.f32 %v2536_v14, 0.0 }
 0x349   :  { %v2535_v45 = vadd.f32 %v7106_v61, %v2527_v19  ;;  %v2231_v10 = vmax.f32 %v2229_v11, %v2230_v23  ;;  %v1336_v7 = vrot.slane %v9662_v48, 4  ;;  %v1309_v11 = vrot.slane %v1308_v42, 1 }
 0x34a   :  { %v2565_v33 = vadd.f32 %v2560_v29, %v2556_v24  ;;  %v2552_v36 = vsel %vm969_vm9, %v2550_v18, %v2551_v16  ;;  %v2561_v37 = vsel %vm1284_vm11, %v2559_v30, %v2560_v29  ;;  %v2540_v49 = vsel %vm760_vm12, %v2538_v4, -inf  ;;  %v7139_v4 = vld [vmem:[%s11515_s5 + $0xd0] sm:$0xff] }
 0x34b   :  { %v2537_v43 = vmax.f32 %v2535_v45, 0.0  ;;  %v2555_v44 = vadd.f32 %v2552_v36, %v9926_v17  ;;  %v2232_v50 = vrot.slane %v2231_v10, 1  ;;  %v1337_v53 = vmax.f32 %v9662_v48, %v1336_v7  ;;  %v10978_v36 = vld [vmem:[%s11521_s11 + $0x1b8] sm:$0xff] }
 0x34c   :  { %v2567_v38 = vadd.f32 %v7106_v61, %v2565_v33  ;;  %v1310_v48 = vmax.f32 %v1308_v42, %v1309_v11  ;;  %v7143_v33 = vld [vmem:[%s11515_s5 + $0xf0] sm:$0xff]  ;;  %v7154_v42 = vld [vmem:[%s11517_s7 + $0xa0] sm:$0xff]  ;;  %v7168_v11 = vld [vmem:[%s11519_s9 + $0x108] sm:$0xff]  ;;  %11584 = vst [vmem:[#allocation28_spill] sm:$0xff] %v10978_v36 }
 0x34d   :  { %v2539_v51 = vsel %vm329_vm8, %v2537_v43, -inf  ;;  %v2564_v52 = vadd.f32 %v2561_v37, %v2555_v44  ;;  %v2233_v54 = vmax.f32 %v2231_v10, %v2232_v50  ;;  %v1338_v8 = vrot.slane %v1337_v53, 2  ;;  %v7138_v37 = vld [vmem:[%s11515_s5 + $0xc8] sm:$0xff]  ;;  %v7148_v44 = vld [vmem:[%s11515_s5 + $0x118] sm:$0xff] }
 0x34e   :  { %v2541_v46 = vmax.f32 %v2539_v51, %v2540_v49  ;;  %v2569_v60 = vmax.f32 %v2567_v38, 0.0  ;;  %v7153_v50 = vld [vmem:[%s11517_s7 + $0x98] sm:$0xff]  ;;  %v7147_v38 = vld [vmem:[%s11515_s5 + $0x110] sm:$0xff]  ;;  %v7146_v49 = vld [vmem:[%s11515_s5 + $0x108] sm:$0xff] }
 0x34f   :  { %v2566_v62 = vadd.f32 %v7106_v61, %v2564_v52  ;;  %v9102_v63 = vpack.i.bf16 %v995_v47, %v2233_v54  ;;  %v1339_v16 = vmax.f32 %v1337_v53, %v1338_v8  ;;  %v7152_v47 = vld [vmem:[%s11517_s7 + $0x90] sm:$0xff]  ;;  %v7151_v51 = vld [vmem:[%s11517_s7 + $0x88] sm:$0xff]  ;;  %v7145_v52 = vld [vmem:[%s11515_s5 + $0x100] sm:$0xff] }
 0x350   :  { %v2542_v25 = vrot.slane %v2541_v46, 4  ;;  %v2571_v35 = vsel %vm760_vm12, %v2569_v60, -inf  ;;  %v7150_v54 = vld [vmem:[%s11517_s7 + $0x80] sm:$0xff]  ;;  %v7162_v60 = vld [vmem:[%s11519_s9 + $0xd8] sm:$0xff]  ;;  %v7155_v53 = vld [vmem:[%s11517_s7 + $0xa8] sm:$0xff] }
 0x351   :  { %v2568_v17 = vmax.f32 %v2566_v62, 0.0  ;;  %9103 = vrot.lane.b32.xlu1 %v9102_v63, %s9185_s28  ;;  %v1340_v23 = vrot.slane %v1339_v16, 1  ;;  %v7156_v63 = vld [vmem:[%s11517_s7 + $0xb0] sm:$0xff]  ;;  %v7164_v8 = vld [vmem:[%s11519_s9 + $0xe8] sm:$0xff] }
 0x352   :  { %v2543_v0 = vmax.f32 %v2541_v46, %v2542_v25  ;;  %v7161_v25 = vld [vmem:[%s11519_s9 + $0xd0] sm:$0xff] }
 0x353   :  { %v2570_v1 = vsel %vm329_vm8, %v2568_v17, -inf  ;;  %v9962_v45 = vmax.f32 %v1339_v16, %v1340_v23  ;;  %v7160_v17 = vld [vmem:[%s11519_s9 + $0xc8] sm:$0xff]  ;;  %v7217_v16 = vld [vmem:[%s11512_s2 + $0x190] sm:$0xff]  ;;  %v7211_v23 = vld [vmem:[%s11512_s2 + $0x160] sm:$0xff] }
 0x354   :  { %v2572_v2 = vmax.f32 %v2570_v1, %v2571_v35  ;;  %v2544_v3 = vrot.slane %v2543_v0, 2  ;;  %v7166_v35 = vld [vmem:[%s11519_s9 + $0xf8] sm:$0xff] }
 0x355   :  { %v7170_v1 = vld [vmem:[%s11519_s9 + $0x118] sm:$0xff] }
 0x356   :  { %v2545_v14 = vmax.f32 %v2543_v0, %v2544_v3  ;;  %v2573_v61 = vrot.slane %v2572_v2, 4  ;;  %v7159_v0 = vld [vmem:[%s11519_s9 + $0xc0] sm:$0xff]  ;;  %v7169_v3 = vld [vmem:[%s11519_s9 + $0x110] sm:$0xff] }
 0x358   :  { %v2546_v15 = vrot.slane %v2545_v14, 1  ;;  %v2574_v19 = vmax.f32 %v2572_v2, %v2573_v61  ;;  %v7165_v2 = vld [vmem:[%s11519_s9 + $0xf0] sm:$0xff]  ;;  %v7167_v61 = vld [vmem:[%s11519_s9 + $0x100] sm:$0xff] }
 0x35a   :  { %v2547_v20 = vmax.f32 %v2545_v14, %v2546_v15  ;;  %v2575_v21 = vrot.slane %v2574_v19, 2  ;;  %v7163_v14 = vld [vmem:[%s11519_s9 + $0xe0] sm:$0xff]  ;;  %v7218_v15 = vld [vmem:[%s11512_s2 + $0x198] sm:$0xf] }
 0x35c   :  { %v9107_v22 = vpack.i.bf16 %v1310_v48, %v2547_v20  ;;  %v2576_v24 = vmax.f32 %v2574_v19, %v2575_v21  ;;  %v7216_v19 = vld [vmem:[%s11512_s2 + $0x188] sm:$0xff]  ;;  %v7215_v48 = vld [vmem:[%s11512_s2 + $0x180] sm:$0xff]  ;;  %v7214_v20 = vld [vmem:[%s11512_s2 + $0x178] sm:$0xff] }
 0x35d   :  { %v9954_v29 = vpop.f32.mrf.mxu0  ;;  %v9991_v43 = vpop.f32.mrf.mxu1  ;;  %v7213_v21 = vld [vmem:[%s11512_s2 + $0x170] sm:$0xff] }
 0x35e   :  { %9108 = vrot.lane.b32.xlu0 %v9107_v22, %s9186_s1  ;;  %v2577_v18 = vrot.slane %v2576_v24, 1  ;;  %v7212_v22 = vld [vmem:[%s11512_s2 + $0x168] sm:$0xff] }
 0x35f   :  { %v2662_v30 = vpop.f32.mrf.mxu0  ;;  %v10009_v7 = vpop.f32.mrf.mxu1 }
 0x360   :  { %8529 = vmatprep.mubr.msk.f32.mxu0 %vm329_vm8, %v2662_v30  ;;  %8540 = vmatprep.mubr.msk.f32.mxu1 %vm329_vm8, %v2662_v30  ;;  %v9964_v10 = vmax.f32 %v2576_v24, %v2577_v18  ;;  %v7210_v24 = vld [vmem:[%s11512_s2 + $0x158] sm:$0xff]  ;;  %v7208_v18 = vld [vmem:[%s11512_s2 + $0x148] sm:$0xff] }
 0x361   :  { %8530 = vmatmul.mubr.msk.f32.vlgmr.msra.gmra.mxu0 %vm329_vm8, %v9954_v29  ;;  %8541 = vmatmul.mubr.msk.f32.vlgmr.msra.gmra.mxu1 %vm329_vm8, %v9954_v29  ;;  %v10026_v46 = vpop.f32.mrf.mxu1 }
 0x362   :  { %8544 = vmatpush3.msra.mxu0 %v9896_v58  ;;  %8555 = vmatpush3.msra.mxu1 %v9901_v59  ;;  %v7137_v58 = vld [vmem:[%s11515_s5 + $0xc0] sm:$0xff] }
 0x363   :  { %8545 = vmatprep.subr.mxu0 %v7139_v4  ;;  %8551 = vmatprep.mubr.msk.f32.mxu0 %vm329_vm8, %v2662_v30  ;;  %v7141_v59 = vld [vmem:[%s11515_s5 + $0xe0] sm:$0xff]  ;;  %v10038_v62 = vpop.f32.mrf.mxu1 }
 0x364   :  { %8556 = vmatprep.subr.mxu1 %v7143_v33  ;;  %8562 = vmatprep.mubr.msk.f32.mxu1 %vm329_vm8, %v2662_v30 }
 0x365   :  { %8546 = vmatpush3.msra.mxu0 %v7139_v4  ;;  %8557 = vmatpush3.msra.mxu1 %v7143_v33  ;;  %v7206_v4 = vld [vmem:[%s11512_s2 + $0x138] sm:$0xff] }
 0x366   :  { %8547 = vmatprep.subr.mxu0 %v7138_v37  ;;  %8558 = vmatprep.subr.mxu1 %v7142_v41  ;;  %v7230_v33 = vld [vmem:[%s11513_s3 + $0xd8] sm:$0xff] }
 0x367   :  { %8548 = vmatpush3.msra.mxu0 %v7138_v37  ;;  %8559 = vmatpush3.msra.mxu1 %v7142_v41  ;;  %v7234_v37 = vld [vmem:[%s11513_s3 + $0xf8] sm:$0xff]  ;;  %v7229_v41 = vld [vmem:[%s11513_s3 + $0xd0] sm:$0xff] }
 0x368   :  { %8549 = vmatprep.subr.mxu0 %v7137_v58  ;;  %8560 = vmatprep.subr.mxu1 %v7141_v59 }
 0x369   :  { %8550 = vmatpush3.msra.mxu0 %v7137_v58  ;;  %8561 = vmatpush3.msra.mxu1 %v7141_v59  ;;  %v7233_v58 = vld [vmem:[%s11513_s3 + $0xf0] sm:$0xff]  ;;  %v7228_v59 = vld [vmem:[%s11513_s3 + $0xc8] sm:$0xff] }
 0x36a   :  { %8552 = vmatmul.mubr.msk.f32.vlgmr.msra.gmra.mxu0 %vm329_vm8, %v9954_v29  ;;  %8563 = vmatmul.mubr.msk.f32.vlgmr.msra.gmra.mxu1 %vm329_vm8, %v9954_v29 }
 0x36b   :  { %8565 = vmatprep.subr.mxu0 %v7148_v44  ;;  %8576 = vmatprep.subr.mxu1 %v7153_v50 }
 0x36c   :  { %8566 = vmatpush3.msra.mxu0 %v7148_v44  ;;  %8573 = vmatprep.mubr.msk.f32.mxu0 %vm329_vm8, %v2662_v30  ;;  %v7207_v30 = vld [vmem:[%s11512_s2 + $0x140] sm:$0xff] }
 0x36d   :  { %8577 = vmatpush3.msra.mxu1 %v7153_v50  ;;  %8584 = vmatprep.mubr.msk.f32.mxu1 %vm329_vm8, %v10009_v7  ;;  %v7227_v44 = vld [vmem:[%s11513_s3 + $0xc0] sm:$0xff] }
 0x36e   :  { %8567 = vmatprep.subr.mxu0 %v7147_v38  ;;  %8578 = vmatprep.subr.mxu1 %v7152_v47  ;;  %v7231_v50 = vld [vmem:[%s11513_s3 + $0xe0] sm:$0xff] }
 0x36f   :  { %8568 = vmatpush3.msra.mxu0 %v7147_v38  ;;  %8579 = vmatpush3.msra.mxu1 %v7152_v47  ;;  %v10200_v38 = vld [vmem:[%s11515_s5 + $0x138] sm:$0xff] }
 0x370   :  { %8569 = vmatprep.subr.mxu0 %v7146_v49  ;;  %8580 = vmatprep.subr.mxu1 %v7151_v51  ;;  %v10205_v47 = vld [vmem:[%s11515_s5 + $0x158] sm:$0xff] }
 0x371   :  { %8570 = vmatpush3.msra.mxu0 %v7146_v49  ;;  %8581 = vmatpush3.msra.mxu1 %v7151_v51 }
 0x372   :  { %8571 = vmatprep.subr.mxu0 %v7145_v52  ;;  %8582 = vmatprep.subr.mxu1 %v7150_v54 }
 0x373   :  { %8572 = vmatpush3.msra.mxu0 %v7145_v52  ;;  %8583 = vmatpush3.msra.mxu1 %v7150_v54  ;;  %v7176_v52 = vld [vmem:[%s11514_s4 + $0x2] ss:$0 sm:$0xff] }
 0x374   :  { %8574 = vmatmul.mubr.msk.f32.vlgmr.msra.gmra.mxu0 %vm329_vm8, %v9954_v29  ;;  %8585 = vmatmul.mubr.msk.f32.vlgmr.msra.gmra.mxu1 %vm329_vm8, %v9991_v43  ;;  %v7209_v29 = vld [vmem:[%s11512_s2 + $0x150] sm:$0xff] }
 0x375   :  { %8590 = vmatprep.subr.mxu0 %v7157_v57  ;;  %8604 = vmatprep.subr.mxu1 %v7162_v60 }
 0x376   :  { %8587 = vmatprep.mubr.msk.f32.mxu1 %vm329_vm8, %v10038_v62  ;;  %8591 = vmatpush3.msra.mxu0 %v7157_v57 }
 0x377   :  { %8598 = vmatprep.mubr.msk.f32.mxu0 %vm329_vm8, %v10009_v7  ;;  %8605 = vmatpush3.msra.mxu1 %v7162_v60 }
 0x378   :  { %8592 = vmatprep.subr.mxu0 %v7156_v63  ;;  %8606 = vmatprep.subr.mxu1 %v7161_v25 }
 0x379   :  { %8593 = vmatpush3.msra.mxu0 %v7156_v63  ;;  %8607 = vmatpush3.msra.mxu1 %v7161_v25 }
 0x37a   :  { %8588 = vmatmul.mubr.msk.f32.gmra.mxu1 %vm329_vm8, %v10026_v46  ;;  %8594 = vmatprep.subr.mxu0 %v7155_v53 }
 0x37b   :  { %8608 = vmatprep.subr.mxu1 %v7160_v17  ;;  %8595 = vmatpush3.msra.mxu0 %v7155_v53 }
 0x37c   :  { %8609 = vmatpush3.msra.mxu1 %v7160_v17  ;;  %8612 = vmatprep.mubr.msk.f32.mxu1 %vm329_vm8, %v10009_v7 }
 0x37d   :  { %8596 = vmatprep.subr.mxu0 %v7154_v42  ;;  %8610 = vmatprep.subr.mxu1 %v7159_v0 }
 0x37e   :  { %8597 = vmatpush3.msra.mxu0 %v7154_v42  ;;  %8611 = vmatpush3.msra.mxu1 %v7159_v0 }
 0x37f   :  { %8599 = vmatmul.mubr.msk.f32.vlgmr.msra.gmra.mxu0 %vm329_vm8, %v9991_v43  ;;  %8613 = vmatmul.mubr.msk.f32.vlgmr.msra.gmra.mxu1 %vm329_vm8, %v9991_v43 }
 0x380   :  { %8618 = vmatprep.subr.mxu0 %v7166_v35  ;;  %8632 = vmatprep.subr.mxu1 %v7170_v1 }
 0x381   :  { %8601 = vmatprep.mubr.msk.f32.mxu0 %vm329_vm8, %v10038_v62  ;;  %8615 = vmatprep.mubr.msk.f32.mxu1 %vm329_vm8, %v10038_v62 }
 0x382   :  { %8619 = vmatpush3.msra.mxu0 %v7166_v35  ;;  %8633 = vmatpush3.msra.mxu1 %v7170_v1 }
 0x383   :  { %8620 = vmatprep.subr.mxu0 %v7165_v2  ;;  %8634 = vmatprep.subr.mxu1 %v7169_v3 }
 0x384   :  { %8621 = vmatpush3.msra.mxu0 %v7165_v2  ;;  %8635 = vmatpush3.msra.mxu1 %v7169_v3 }
 0x385   :  { %8602 = vmatmul.mubr.msk.f32.gmra.mxu0 %vm329_vm8, %v10026_v46  ;;  %8616 = vmatmul.mubr.msk.f32.gmra.mxu1 %vm329_vm8, %v10026_v46 }
 0x386   :  { %8622 = vmatprep.subr.mxu0 %v7164_v8  ;;  %8636 = vmatprep.subr.mxu1 %v7168_v11 }
 0x387   :  { %8623 = vmatpush3.msra.mxu0 %v7164_v8  ;;  %8626 = vmatprep.mubr.msk.f32.mxu0 %vm329_vm8, %v10009_v7 }
 0x388   :  { %8637 = vmatpush3.msra.mxu1 %v7168_v11  ;;  %8640 = vmatprep.mubr.msk.f32.mxu1 %vm329_vm8, %v10009_v7 }
 0x389   :  { %8624 = vmatprep.subr.mxu0 %v7163_v14  ;;  %8638 = vmatprep.subr.mxu1 %v7167_v61 }
 0x38a   :  { %8625 = vmatpush3.msra.mxu0 %v7163_v14  ;;  %8639 = vmatpush3.msra.mxu1 %v7167_v61  ;;  %v10219_v14 = vld [vmem:[%s11516_s6 + $0x2] ss:$0 sm:$0xff] }
 0x38b   :  { %8627 = vmatmul.mubr.msk.f32.vlgmr.msra.gmra.mxu0 %vm329_vm8, %v9991_v43  ;;  %8641 = vmatmul.mubr.msk.f32.vlgmr.msra.gmra.mxu1 %vm329_vm8, %v9991_v43  ;;  %v7232_v43 = vld [vmem:[%s11513_s3 + $0xe8] sm:$0xff] }
 0x38c   :  { %8646 = vmatprep.subr.msk.mxu0 %vm109_vm0, %v7218_v15  ;;  %8675 = vmatprep.subr.msk.mxu1 %vm109_vm0, %v7218_v15 }
 0x38d   :  { %8629 = vmatprep.mubr.msk.f32.mxu0 %vm329_vm8, %v10038_v62  ;;  %8643 = vmatprep.mubr.msk.f32.mxu1 %vm329_vm8, %v10038_v62 }
 0x38e   :  { %8647 = vmatpush3.msk.msra.mxu0 %vm109_vm0, %v7218_v15  ;;  %8676 = vmatpush3.msk.msra.mxu1 %vm109_vm0, %v7218_v15 }
 0x38f   :  { %8648 = vmatprep.subr.mxu0 %v7217_v16  ;;  %8677 = vmatprep.subr.mxu1 %v7217_v16 }
 0x390   :  { %8649 = vmatpush3.msra.mxu0 %v7217_v16  ;;  %8678 = vmatpush3.msra.mxu1 %v7217_v16 }
 0x391   :  { %8630 = vmatmul.mubr.msk.f32.gmra.mxu0 %vm329_vm8, %v10026_v46  ;;  %8644 = vmatmul.mubr.msk.f32.gmra.mxu1 %vm329_vm8, %v10026_v46 }
 0x392   :  { %8650 = vmatprep.subr.mxu0 %v7216_v19  ;;  %8679 = vmatprep.subr.mxu1 %v7216_v19 }
 0x393   :  { %8651 = vmatpush3.msra.mxu0 %v7216_v19  ;;  %8672 = vmatprep.mubr.msk.f32.mxu0 %vm102_vm1, %v9327_v27 }
 0x394   :  { %8680 = vmatpush3.msra.mxu1 %v7216_v19  ;;  %8701 = vmatprep.mubr.msk.f32.mxu1 %vm102_vm1, %v9330_v28 }
 0x395   :  { %8652 = vmatprep.subr.mxu0 %v7215_v48  ;;  %8681 = vmatprep.subr.mxu1 %v7215_v48 }
 0x396   :  { %8653 = vmatpush3.msra.mxu0 %v7215_v48  ;;  %8682 = vmatpush3.msra.mxu1 %v7215_v48 }
 0x397   :  { %8654 = vmatprep.subr.mxu0 %v7214_v20  ;;  %8683 = vmatprep.subr.mxu1 %v7214_v20 }
 0x398   :  { %8655 = vmatpush3.msra.mxu0 %v7214_v20  ;;  %8684 = vmatpush3.msra.mxu1 %v7214_v20 }
 0x399   :  { %8656 = vmatprep.subr.mxu0 %v7213_v21  ;;  %8685 = vmatprep.subr.mxu1 %v7213_v21 }
 0x39a   :  { %8657 = vmatpush3.msra.mxu0 %v7213_v21  ;;  %8686 = vmatpush3.msra.mxu1 %v7213_v21 }
 0x39b   :  { %8658 = vmatprep.subr.mxu0 %v7212_v22  ;;  %8687 = vmatprep.subr.mxu1 %v7212_v22 }
 0x39c   :  { %8659 = vmatpush3.msra.mxu0 %v7212_v22  ;;  %8688 = vmatpush3.msra.mxu1 %v7212_v22 }
 0x39d   :  { %8660 = vmatprep.subr.mxu0 %v7211_v23  ;;  %8689 = vmatprep.subr.mxu1 %v7211_v23 }
 0x39e   :  { %8661 = vmatpush3.msra.mxu0 %v7211_v23  ;;  %8690 = vmatpush3.msra.mxu1 %v7211_v23 }
 0x39f   :  { %8662 = vmatprep.subr.mxu0 %v7210_v24  ;;  %8691 = vmatprep.subr.mxu1 %v7210_v24 }
 0x3a0   :  { %8663 = vmatpush3.msra.mxu0 %v7210_v24  ;;  %8692 = vmatpush3.msra.mxu1 %v7210_v24 }
 0x3a1   :  { %8664 = vmatprep.subr.mxu0 %v7209_v29  ;;  %8693 = vmatprep.subr.mxu1 %v7209_v29 }
 0x3a2   :  { %8665 = vmatpush3.msra.mxu0 %v7209_v29  ;;  %8694 = vmatpush3.msra.mxu1 %v7209_v29 }
 0x3a3   :  { %8666 = vmatprep.subr.mxu0 %v7208_v18  ;;  %8695 = vmatprep.subr.mxu1 %v7208_v18 }
 0x3a4   :  { %8667 = vmatpush3.msra.mxu0 %v7208_v18  ;;  %8696 = vmatpush3.msra.mxu1 %v7208_v18  ;;  %v7192_v18 = vld [vmem:[%s11518_s8 + $0x2] ss:$0 sm:$0xff] }
 0x3a5   :  { %8668 = vmatprep.subr.mxu0 %v7207_v30  ;;  %8697 = vmatprep.subr.mxu1 %v7207_v30 }
 0x3a6   :  { %8669 = vmatpush3.msra.mxu0 %v7207_v30  ;;  %8698 = vmatpush3.msra.mxu1 %v7207_v30 }
 0x3a7   :  { %8670 = vmatprep.subr.mxu0 %v7206_v4  ;;  %8699 = vmatprep.subr.mxu1 %v7206_v4 }
 0x3a8   :  { %8671 = vmatpush3.msra.mxu0 %v7206_v4  ;;  %8700 = vmatpush3.msra.mxu1 %v7206_v4 }
 0x3a9   :  { %8673 = vmatmul.mubr.msk.f32.vlgmr.msra.gmra.mxu0 %vm102_vm1, %v9337_v31  ;;  %8702 = vmatmul.mubr.msk.f32.vlgmr.msra.gmra.mxu1 %vm102_vm1, %v9340_v32 }
 0x3aa   :  { %8704 = vmatprep.mubr.msk.f32.mxu1 %vm102_vm1, %v9359_v39  ;;  %8707 = vmatprep.subr.mxu0 %v7230_v33 }
 0x3ab   :  { %8718 = vmatprep.subr.mxu1 %v7234_v37  ;;  %8708 = vmatpush3.msra.mxu0 %v7230_v33 }
 0x3ac   :  { %8719 = vmatpush3.msra.mxu1 %v7234_v37  ;;  %8709 = vmatprep.subr.mxu0 %v7229_v41 }
 0x3ad   :  { %8705 = vmatmul.mubr.msk.f32.gmra.mxu1 %vm102_vm1, %v9362_v40  ;;  %8720 = vmatprep.subr.mxu1 %v7233_v58 }
 0x3ae   :  { %8710 = vmatpush3.msra.mxu0 %v7229_v41  ;;  %8721 = vmatpush3.msra.mxu1 %v7233_v58 }
 0x3af   :  { %8711 = vmatprep.subr.mxu0 %v7228_v59  ;;  %8722 = vmatprep.subr.mxu1 %v7232_v43 }
 0x3b0   :  { %8712 = vmatpush3.msra.mxu0 %v7228_v59  ;;  %8723 = vmatpush3.msra.mxu1 %v7232_v43 }
 0x3b1   :  { %8713 = vmatprep.subr.mxu0 %v7227_v44  ;;  %8724 = vmatprep.subr.mxu1 %v7231_v50 }
 0x3b2   :  { %8714 = vmatpush3.msra.mxu0 %v7227_v44  ;;  %8725 = vmatpush3.msra.mxu1 %v7231_v50 }
 0x3b3   :  { %8729 = vmatprep.subr.mxu0 %v10200_v38  ;;  %8740 = vmatprep.subr.mxu1 %v10205_v47 }
 0x421   :  { %v8531_v7 = vpop.f32.mrf.mxu0  ;;  %v8542_v49 = vpop.f32.mrf.mxu1 }
 0x422   :  { %v2984_v51 = vrot.slane %v8542_v49, 1 }
 0x423   :  { %v2955_v54 = vpop.f32.mrf.mxu1  ;;  %v2880_v60 = vpop.f32.mrf.mxu0 }
 0x424   :  { %v2986_v46 = vadd.f32 %v8531_v7, %v2984_v51  ;;  %v2965_v57 = vrot.slane %v2955_v54, 1 }
 0x426   :  { %v10212_v62 = vadd.f32 %v7176_v52, %v2986_v46  ;;  %v10214_v63 = vadd.f32 %v2965_v57, %v2880_v60 }
 0x428   :  { %11563 = vst [vmem:[#allocation7_spill] sm:$0xff] %v10212_v62 }
 0x42a   :  { %v8553_v25 = vpop.f32.mrf.mxu0  ;;  %v8564_v53 = vpop.f32.mrf.mxu1 }
 0x42b   :  { %v3245_v17 = vrot.slane %v8564_v53, 1 }
 0x42c   :  { %v3137_v42 = vpop.f32.mrf.mxu1  ;;  %v3062_v1 = vpop.f32.mrf.mxu0 }
 0x42d   :  { %v3247_v0 = vadd.f32 %v8553_v25, %v3245_v17  ;;  %v3222_v35 = vrot.slane %v3137_v42, 1 }
 0x42f   :  { %v3224_v2 = vadd.f32 %v3222_v35, %v3062_v1 }
 0x434   :  { %v8575_v3 = vpop.f32.mrf.mxu0  ;;  %v8586_v8 = vpop.f32.mrf.mxu1 }
 0x435   :  { %v3249_v11 = vrot.slane %v8575_v3, 2 }
 0x436   :  { %v3212_v61 = vpop.f32.mrf.mxu0  ;;  %v3339_v15 = vpop.f32.mrf.mxu1 }
 0x437   :  { %v3251_v16 = vadd.f32 %v3249_v11, %v3247_v0  ;;  %v3226_v19 = vrot.slane %v3212_v61, 2 }
 0x439   :  { %v10222_v48 = vadd.f32 %v10219_v14, %v3251_v16  ;;  %v10224_v20 = vadd.f32 %v3226_v19, %v3224_v2 }
 0x43a   :  { %v8589_v21 = vpop.f32.mrf.mxu1 }
 0x43c   :  { %v3349_v22 = vpop.f32.mrf.mxu1 }
 0x43f   :  { %v8600_v23 = vpop.f32.mrf.mxu0  ;;  %v8614_v24 = vpop.f32.mrf.mxu1 }
 0x440   :  { %v3446_v29 = vrot.slane %v8600_v23, 1 }
 0x441   :  { %v3424_v30 = vpop.f32.mrf.mxu0  ;;  %v3559_v4 = vpop.f32.mrf.mxu1 }
 0x442   :  { %v3451_v33 = vadd.f32 %v8586_v8, %v3446_v29  ;;  %v3445_v37 = vrot.slane %v3424_v30, 1 }
 0x444   :  { %v3459_v41 = vadd.f32 %v7192_v18, %v3451_v33  ;;  %v3447_v58 = vsel %vm969_vm9, %v3445_v37, %v3446_v29  ;;  %v7205_v29 = vld [vmem:[%s11520_s10 + $0x2] ss:$0 sm:$0xff] }
 0x445   :  { %v3450_v59 = vadd.f32 %v3447_v58, %v3339_v15  ;;  %v8603_v43 = vpop.f32.mrf.mxu0  ;;  %v8617_v44 = vpop.f32.mrf.mxu1 }
 0x446   :  { %v3474_v50 = vrot.slane %v8603_v43, 1  ;;  %v3461_v7 = vmax.f32 %v3459_v41, 0.0 }
 0x447   :  { %v3458_v49 = vadd.f32 %v7192_v18, %v3450_v59  ;;  %v3434_v51 = vpop.f32.mrf.mxu0  ;;  %v3569_v52 = vpop.f32.mrf.mxu1 }
 0x448   :  { %v3479_v54 = vadd.f32 %v8589_v21, %v3474_v50  ;;  %v3473_v46 = vrot.slane %v3434_v51, 1  ;;  %v3463_v53 = vsel %vm498_vm10, %v3461_v7, -inf }
 0x449   :  { %v3460_v57 = vmax.f32 %v3458_v49, 0.0 }
 0x44a   :  { %v3481_v60 = vadd.f32 %v7192_v18, %v3479_v54  ;;  %v3475_v25 = vsel %vm969_vm9, %v3473_v46, %v3474_v50 }
 0x44b   :  { %v3462_v17 = vsel %vm329_vm8, %v3460_v57, -inf  ;;  %v3478_v42 = vadd.f32 %v3475_v25, %v3349_v22  ;;  %v8628_v0 = vpop.f32.mrf.mxu0  ;;  %v8642_v35 = vpop.f32.mrf.mxu1 }
 0x44c   :  { %v10233_v1 = vmax.f32 %v3462_v17, %v3463_v53  ;;  %v3751_v2 = vrot.slane %v8628_v0, 1  ;;  %v3483_v3 = vmax.f32 %v3481_v60, 0.0  ;;  %v3760_v16 = vrot.slane %v8642_v35, 2 }
 0x44d   :  { %v3480_v8 = vadd.f32 %v7192_v18, %v3478_v42  ;;  %v3644_v11 = vpop.f32.mrf.mxu0  ;;  %v3729_v61 = vpop.f32.mrf.mxu1 }
 0x44e   :  { %v3756_v15 = vadd.f32 %v8614_v24, %v3751_v2  ;;  %v3750_v19 = vrot.slane %v3644_v11, 1  ;;  %v3759_v21 = vrot.slane %v3729_v61, 2  ;;  %v3485_v37 = vsel %vm498_vm10, %v3483_v3, -inf }
 0x44f   :  { %v3482_v23 = vmax.f32 %v3480_v8, 0.0 }
 0x450   :  { %v3765_v30 = vadd.f32 %v3760_v16, %v3756_v15  ;;  %v3752_v22 = vsel %vm969_vm9, %v3750_v19, %v3751_v2  ;;  %v3761_v33 = vsel %vm1284_vm11, %v3759_v21, %v3760_v16 }
 0x451   :  { %v3484_v18 = vsel %vm329_vm8, %v3482_v23, -inf  ;;  %v3755_v41 = vadd.f32 %v3752_v22, %v3559_v4  ;;  %v8631_v58 = vpop.f32.mrf.mxu0  ;;  %v8645_v24 = vpop.f32.mrf.mxu1 }
 0x452   :  { %v10242_v59 = vmax.f32 %v3484_v18, %v3485_v37  ;;  %v3773_v43 = vadd.f32 %v7205_v29, %v3765_v30  ;;  %v3788_v50 = vrot.slane %v8631_v58, 1  ;;  %v3797_v46 = vrot.slane %v8645_v24, 2  ;;  %v7241_v37 = vld [vmem:[%s11515_s5 + $0x148] sm:$0xff]  ;;  %v7252_v58 = vld [vmem:[%s11517_s7 + $0xd8] sm:$0xff]  ;;  %v7246_v24 = vld [vmem:[%s11515_s5 + $0x170] sm:$0xff] }
 0x453   :  { %v3764_v7 = vadd.f32 %v3761_v33, %v3755_v41  ;;  %v3654_v49 = vpop.f32.mrf.mxu0  ;;  %v3739_v51 = vpop.f32.mrf.mxu1  ;;  %v7237_v33 = vld [vmem:[%s11515_s5 + $0x128] sm:$0xff]  ;;  %v7247_v41 = vld [vmem:[%s11515_s5 + $0x178] sm:$0xff] }
 0x454   :  { %v3793_v54 = vadd.f32 %v8617_v44, %v3788_v50  ;;  %v3787_v57 = vrot.slane %v3654_v49, 1  ;;  %v3796_v60 = vrot.slane %v3739_v51, 2  ;;  %v3775_v25 = vmax.f32 %v3773_v43, 0.0  ;;  %v7251_v43 = vld [vmem:[%s11517_s7 + $0xd0] sm:$0xff]  ;;  %v7250_v49 = vld [vmem:[%s11517_s7 + $0xc8] sm:$0xff]  ;;  %v7244_v51 = vld [vmem:[%s11515_s5 + $0x160] sm:$0xff] }
 0x455   :  { %v3772_v53 = vadd.f32 %v7205_v29, %v3764_v7  ;;  %v7245_v7 = vld [vmem:[%s11515_s5 + $0x168] sm:$0xff] }
 0x456   :  { %v3802_v17 = vadd.f32 %v3797_v46, %v3793_v54  ;;  %v3789_v42 = vsel %vm969_vm9, %v3787_v57, %v3788_v50  ;;  %v3798_v4 = vsel %vm1284_vm11, %v3796_v60, %v3797_v46  ;;  %v3777_v3 = vsel %vm760_vm12, %v3775_v25, -inf  ;;  %v7249_v54 = vld [vmem:[%s11517_s7 + $0xc0] sm:$0xff]  ;;  %v7256_v57 = vld [vmem:[%s11517_s7 + $0xf8] sm:$0xff] }
 0x457   :  { %v3774_v0 = vmax.f32 %v3772_v53, 0.0  ;;  %v3792_v35 = vadd.f32 %v3789_v42, %v3569_v52  ;;  %v7238_v52 = vld [vmem:[%s11515_s5 + $0x130] sm:$0xff]  ;;  %v7261_v60 = vld [vmem:[%s11519_s9 + $0x138] sm:$0xff]  ;;  %v7254_v42 = vld [vmem:[%s11517_s7 + $0xe8] sm:$0xff] }
 0x458   :  { %v3804_v2 = vadd.f32 %v7205_v29, %v3802_v17  ;;  %v7255_v53 = vld [vmem:[%s11517_s7 + $0xf0] sm:$0xff] }
 0x459   :  { %v3776_v8 = vsel %vm329_vm8, %v3774_v0, -inf  ;;  %v3801_v11 = vadd.f32 %v3798_v4, %v3792_v35  ;;  %v7260_v17 = vld [vmem:[%s11519_s9 + $0x130] sm:$0xff]  ;;  %v7259_v4 = vld [vmem:[%s11519_s9 + $0x128] sm:$0xff]  ;;  %v7253_v0 = vld [vmem:[%s11517_s7 + $0xe0] sm:$0xff] }
 0x45a   :  { %v10248_v61 = vmax.f32 %v3776_v8, %v3777_v3  ;;  %v3806_v44 = vmax.f32 %v3804_v2, 0.0  ;;  %v7258_v35 = vld [vmem:[%s11519_s9 + $0x120] sm:$0xff]  ;;  %v7265_v2 = vld [vmem:[%s11519_s9 + $0x158] sm:$0xff]  ;;  %v7264_v8 = vld [vmem:[%s11519_s9 + $0x150] sm:$0xff] }
 0x45b   :  { %v3803_v15 = vadd.f32 %v7205_v29, %v3801_v11  ;;  %v7242_v29 = vld [vmem:[%s11515_s5 + $0x150] sm:$0xff]  ;;  %v7269_v3 = vld [vmem:[%s11519_s9 + $0x178] sm:$0xff] }
 0x45c   :  { %v3808_v19 = vsel %vm760_vm12, %v3806_v44, -inf  ;;  %v7268_v11 = vld [vmem:[%s11519_s9 + $0x170] sm:$0xff]  ;;  %v7263_v44 = vld [vmem:[%s11519_s9 + $0x148] sm:$0xff] }
 0x45d   :  { %v3805_v16 = vmax.f32 %v3803_v15, 0.0  ;;  %v7267_v15 = vld [vmem:[%s11519_s9 + $0x168] sm:$0xff] }
 0x45f   :  { %v3807_v21 = vsel %vm329_vm8, %v3805_v16, -inf  ;;  %v7262_v16 = vld [vmem:[%s11519_s9 + $0x140] sm:$0xff] }
 0x460   :  { %v10252_v23 = vmax.f32 %v3807_v21, %v3808_v19  ;;  %v7266_v19 = vld [vmem:[%s11519_s9 + $0x160] sm:$0xff] }
 0x461   :  { %v7317_v21 = vld [vmem:[%s11512_s2 + $0x200] sm:$0xf] }
 0x469   :  { %v8674_v30 = vpop.f32.mrf.mxu0  ;;  %v10280_v18 = vpop.f32.mrf.mxu1 }
 0x46b   :  { %v3899_v22 = vpop.f32.mrf.mxu0  ;;  %v10296_v50 = vpop.f32.mrf.mxu1 }
 0x46c   :  { %8715 = vmatprep.mubr.msk.f32.mxu0 %vm329_vm8, %v3899_v22  ;;  %8726 = vmatprep.mubr.msk.f32.mxu1 %vm329_vm8, %v3899_v22 }
 0x46d   :  { %8716 = vmatmul.mubr.msk.f32.vlgmr.msra.gmra.mxu0 %vm329_vm8, %v8674_v30  ;;  %8727 = vmatmul.mubr.msk.f32.vlgmr.msra.gmra.mxu1 %vm329_vm8, %v8674_v30  ;;  %v10313_v46 = vpop.f32.mrf.mxu1 }
 0x46e   :  { %8730 = vmatpush3.msra.mxu0 %v10200_v38  ;;  %8741 = vmatpush3.msra.mxu1 %v10205_v47  ;;  %v7236_v38 = vld [vmem:[%s11515_s5 + $0x120] sm:$0xff] }
 0x46f   :  { %8731 = vmatprep.subr.mxu0 %v7238_v52  ;;  %8737 = vmatprep.mubr.msk.f32.mxu0 %vm329_vm8, %v3899_v22  ;;  %v7240_v47 = vld [vmem:[%s11515_s5 + $0x140] sm:$0xff]  ;;  %v10324_v25 = vpop.f32.mrf.mxu1 }
 0x470   :  { %8742 = vmatprep.subr.mxu1 %v7242_v29  ;;  %8748 = vmatprep.mubr.msk.f32.mxu1 %vm329_vm8, %v3899_v22 }
 0x471   :  { %8732 = vmatpush3.msra.mxu0 %v7238_v52  ;;  %8743 = vmatpush3.msra.mxu1 %v7242_v29  ;;  %v7314_v52 = vld [vmem:[%s11512_s2 + $0x1e8] sm:$0xff]  ;;  %v7313_v29 = vld [vmem:[%s11512_s2 + $0x1e0] sm:$0xff] }
 0x472   :  { %8733 = vmatprep.subr.mxu0 %v7237_v33  ;;  %8744 = vmatprep.subr.mxu1 %v7241_v37 }
 0x473   :  { %8734 = vmatpush3.msra.mxu0 %v7237_v33  ;;  %8745 = vmatpush3.msra.mxu1 %v7241_v37  ;;  %v7312_v33 = vld [vmem:[%s11512_s2 + $0x1d8] sm:$0xff]  ;;  %v7309_v37 = vld [vmem:[%s11512_s2 + $0x1c0] sm:$0xff] }
 0x474   :  { %8735 = vmatprep.subr.mxu0 %v7236_v38  ;;  %8746 = vmatprep.subr.mxu1 %v7240_v47 }
 0x475   :  { %8736 = vmatpush3.msra.mxu0 %v7236_v38  ;;  %8747 = vmatpush3.msra.mxu1 %v7240_v47  ;;  %v7308_v38 = vld [vmem:[%s11512_s2 + $0x1b8] sm:$0xff]  ;;  %v7307_v47 = vld [vmem:[%s11512_s2 + $0x1b0] sm:$0xff] }
 0x476   :  { %8738 = vmatmul.mubr.msk.f32.vlgmr.msra.gmra.mxu0 %vm329_vm8, %v8674_v30  ;;  %8749 = vmatmul.mubr.msk.f32.vlgmr.msra.gmra.mxu1 %vm329_vm8, %v8674_v30 }
 0x477   :  { %8751 = vmatprep.subr.mxu0 %v7247_v41  ;;  %8762 = vmatprep.subr.mxu1 %v7252_v58 }
 0x478   :  { %8752 = vmatpush3.msra.mxu0 %v7247_v41  ;;  %8759 = vmatprep.mubr.msk.f32.mxu0 %vm329_vm8, %v3899_v22  ;;  %v7315_v22 = vld [vmem:[%s11512_s2 + $0x1f0] sm:$0xff]  ;;  %v7305_v41 = vld [vmem:[%s11512_s2 + $0x1a0] sm:$0xff] }
 0x479   :  { %8763 = vmatpush3.msra.mxu1 %v7252_v58  ;;  %8770 = vmatprep.mubr.msk.f32.mxu1 %vm329_vm8, %v10296_v50  ;;  %v7329_v58 = vld [vmem:[%s11513_s3 + $0x118] sm:$0xff] }
 0x47a   :  { %8753 = vmatprep.subr.mxu0 %v7246_v24  ;;  %8764 = vmatprep.subr.mxu1 %v7251_v43 }
 0x47b   :  { %8754 = vmatpush3.msra.mxu0 %v7246_v24  ;;  %8765 = vmatpush3.msra.mxu1 %v7251_v43  ;;  %v7333_v24 = vld [vmem:[%s11513_s3 + $0x138] sm:$0xff]  ;;  %v7326_v43 = vld [vmem:[%s11513_s3 + $0x100] sm:$0xff] }
 0x47c   :  { %8755 = vmatprep.subr.mxu0 %v7245_v7  ;;  %8766 = vmatprep.subr.mxu1 %v7250_v49 }
 0x47d   :  { %8756 = vmatpush3.msra.mxu0 %v7245_v7  ;;  %8767 = vmatpush3.msra.mxu1 %v7250_v49  ;;  %v10486_v7 = vld [vmem:[%s11515_s5 + $0x198] sm:$0xff] }
 0x47e   :  { %8757 = vmatprep.subr.mxu0 %v7244_v51  ;;  %8768 = vmatprep.subr.mxu1 %v7249_v54  ;;  %v10491_v49 = vld [vmem:[%s11515_s5 + $0x1b8] sm:$0xff] }
 0x47f   :  { %8758 = vmatpush3.msra.mxu0 %v7244_v51  ;;  %8769 = vmatpush3.msra.mxu1 %v7249_v54 }
 0x480   :  { %8760 = vmatmul.mubr.msk.f32.vlgmr.msra.gmra.mxu0 %vm329_vm8, %v8674_v30  ;;  %8771 = vmatmul.mubr.msk.f32.vlgmr.msra.gmra.mxu1 %vm329_vm8, %v10280_v18  ;;  %v7316_v30 = vld [vmem:[%s11512_s2 + $0x1f8] sm:$0xff] }
 0x481   :  { %8776 = vmatprep.subr.mxu0 %v7256_v57  ;;  %8790 = vmatprep.subr.mxu1 %v7261_v60 }
 0x482   :  { %8773 = vmatprep.mubr.msk.f32.mxu1 %vm329_vm8, %v10324_v25  ;;  %8777 = vmatpush3.msra.mxu0 %v7256_v57  ;;  %v10498_v57 = vld [vmem:[%s11514_s4 + $0x3] ss:$0 sm:$0xff] }
 0x483   :  { %8784 = vmatprep.mubr.msk.f32.mxu0 %vm329_vm8, %v10296_v50  ;;  %8791 = vmatpush3.msra.mxu1 %v7261_v60 }
 0x484   :  { %8778 = vmatprep.subr.mxu0 %v7255_v53  ;;  %8792 = vmatprep.subr.mxu1 %v7260_v17 }
 0x485   :  { %8779 = vmatpush3.msra.mxu0 %v7255_v53  ;;  %8793 = vmatpush3.msra.mxu1 %v7260_v17 }
 0x486   :  { %8774 = vmatmul.mubr.msk.f32.gmra.mxu1 %vm329_vm8, %v10313_v46  ;;  %8780 = vmatprep.subr.mxu0 %v7254_v42 }
 0x487   :  { %8794 = vmatprep.subr.mxu1 %v7259_v4  ;;  %8781 = vmatpush3.msra.mxu0 %v7254_v42 }
 0x488   :  { %8795 = vmatpush3.msra.mxu1 %v7259_v4  ;;  %8798 = vmatprep.mubr.msk.f32.mxu1 %vm329_vm8, %v10296_v50 }
 0x489   :  { %8782 = vmatprep.subr.mxu0 %v7253_v0  ;;  %8796 = vmatprep.subr.mxu1 %v7258_v35 }
 0x48a   :  { %8783 = vmatpush3.msra.mxu0 %v7253_v0  ;;  %8797 = vmatpush3.msra.mxu1 %v7258_v35  ;;  %v3235_v0 = vadd.f32 %v10219_v14, %v10224_v20  ;;  %v7282_v14 = vld [vmem:[%s11516_s6 + $0x3] ss:$0 sm:$0xff] }
 0x48b   :  { %8785 = vmatmul.mubr.msk.f32.vlgmr.msra.gmra.mxu0 %vm329_vm8, %v10280_v18  ;;  %8799 = vmatmul.mubr.msk.f32.vlgmr.msra.gmra.mxu1 %vm329_vm8, %v10280_v18 }
 0x48c   :  { %8804 = vmatprep.subr.mxu0 %v7265_v2  ;;  %8818 = vmatprep.subr.mxu1 %v7269_v3 }
 0x48d   :  { %8787 = vmatprep.mubr.msk.f32.mxu0 %vm329_vm8, %v10324_v25  ;;  %8801 = vmatprep.mubr.msk.f32.mxu1 %vm329_vm8, %v10324_v25 }
 0x48e   :  { %8805 = vmatpush3.msra.mxu0 %v7265_v2  ;;  %8819 = vmatpush3.msra.mxu1 %v7269_v3 }
 0x48f   :  { %8806 = vmatprep.subr.mxu0 %v7264_v8  ;;  %8820 = vmatprep.subr.mxu1 %v7268_v11 }
 0x490   :  { %8807 = vmatpush3.msra.mxu0 %v7264_v8  ;;  %8821 = vmatpush3.msra.mxu1 %v7268_v11  ;;  %v3253_v11 = vmax.f32 %v10222_v48, 0.0 }
 0x491   :  { %8788 = vmatmul.mubr.msk.f32.gmra.mxu0 %vm329_vm8, %v10313_v46  ;;  %8802 = vmatmul.mubr.msk.f32.gmra.mxu1 %vm329_vm8, %v10313_v46 }
 0x492   :  { %8808 = vmatprep.subr.mxu0 %v7263_v44  ;;  %8822 = vmatprep.subr.mxu1 %v7267_v15 }
 0x493   :  { %8809 = vmatpush3.msra.mxu0 %v7263_v44  ;;  %8812 = vmatprep.mubr.msk.f32.mxu0 %vm329_vm8, %v10296_v50  ;;  %v3236_v44 = vmax.f32 %v3235_v0, 0.0 }
 0x494   :  { %8823 = vmatpush3.msra.mxu1 %v7267_v15  ;;  %8826 = vmatprep.mubr.msk.f32.mxu1 %vm329_vm8, %v10296_v50  ;;  %v7330_v50 = vld [vmem:[%s11513_s3 + $0x120] sm:$0xff] }
 0x495   :  { %8810 = vmatprep.subr.mxu0 %v7262_v16  ;;  %8824 = vmatprep.subr.mxu1 %v7266_v19 }
 0x496   :  { %8811 = vmatpush3.msra.mxu0 %v7262_v16  ;;  %8825 = vmatpush3.msra.mxu1 %v7266_v19  ;;  %v3254_v16 = vsel %vm760_vm12, %v3253_v11, -inf  ;;  %v3237_v19 = vsel %vm760_vm12, %v3236_v44, -inf  ;;  %v3465_v11 = vrot.slane %v10233_v1, 4 }
 0x497   :  { %8813 = vmatmul.mubr.msk.f32.vlgmr.msra.gmra.mxu0 %vm329_vm8, %v10280_v18  ;;  %8827 = vmatmul.mubr.msk.f32.vlgmr.msra.gmra.mxu1 %vm329_vm8, %v10280_v18  ;;  %v7306_v18 = vld [vmem:[%s11512_s2 + $0x1a8] sm:$0xff] }
 0x498   :  { %8832 = vmatprep.subr.msk.mxu0 %vm109_vm0, %v7317_v21  ;;  %8861 = vmatprep.subr.msk.mxu1 %vm109_vm0, %v7317_v21 }
 0x499   :  { %8815 = vmatprep.mubr.msk.f32.mxu0 %vm329_vm8, %v10324_v25  ;;  %8829 = vmatprep.mubr.msk.f32.mxu1 %vm329_vm8, %v10324_v25 }
 0x49a   :  { %8833 = vmatpush3.msk.msra.mxu0 %vm109_vm0, %v7317_v21  ;;  %8862 = vmatpush3.msk.msra.mxu1 %vm109_vm0, %v7317_v21  ;;  %vm6658_vm0 = vcmask 57344  }
 0x49b   :  { %8834 = vmatprep.subr.mxu0 %v7316_v30  ;;  %8863 = vmatprep.subr.mxu1 %v7316_v30 }
 0x49c   :  { %8835 = vmatpush3.msra.mxu0 %v7316_v30  ;;  %8864 = vmatpush3.msra.mxu1 %v7316_v30 }
 0x49d   :  { %8816 = vmatmul.mubr.msk.f32.gmra.mxu0 %vm329_vm8, %v10313_v46  ;;  %8830 = vmatmul.mubr.msk.f32.gmra.mxu1 %vm329_vm8, %v10313_v46 }
 0x49e   :  { %8836 = vmatprep.subr.mxu0 %v7315_v22  ;;  %8865 = vmatprep.subr.mxu1 %v7315_v22 }
 0x49f   :  { %8837 = vmatpush3.msra.mxu0 %v7315_v22  ;;  %8858 = vmatprep.mubr.msk.f32.mxu0 %vm102_vm1, %v9327_v27  ;;  %v7311_v27 = vld [vmem:[%s11512_s2 + $0x1d0] sm:$0xff] }
 0x4a0   :  { %8866 = vmatpush3.msra.mxu1 %v7315_v22  ;;  %8887 = vmatprep.mubr.msk.f32.mxu1 %vm102_vm1, %v9330_v28  ;;  %v7310_v28 = vld [vmem:[%s11512_s2 + $0x1c8] sm:$0xff] }
 0x4a1   :  { %8838 = vmatprep.subr.mxu0 %v7314_v52  ;;  %8867 = vmatprep.subr.mxu1 %v7314_v52 }
 0x4a2   :  { %8839 = vmatpush3.msra.mxu0 %v7314_v52  ;;  %8868 = vmatpush3.msra.mxu1 %v7314_v52 }
 0x4a3   :  { %8840 = vmatprep.subr.mxu0 %v7313_v29  ;;  %8869 = vmatprep.subr.mxu1 %v7313_v29 }
 0x4a4   :  { %8841 = vmatpush3.msra.mxu0 %v7313_v29  ;;  %8870 = vmatpush3.msra.mxu1 %v7313_v29  ;;  %v3255_v29 = vrot.slane %v3254_v16, 4 }
 0x4a5   :  { %8842 = vmatprep.subr.mxu0 %v7312_v33  ;;  %8871 = vmatprep.subr.mxu1 %v7312_v33 }
 0x4a6   :  { %8843 = vmatpush3.msra.mxu0 %v7312_v33  ;;  %8872 = vmatpush3.msra.mxu1 %v7312_v33  ;;  %v3238_v33 = vrot.slane %v3237_v19, 4 }
 0x4a7   :  { %8844 = vmatprep.subr.mxu0 %v7311_v27  ;;  %8873 = vmatprep.subr.mxu1 %v7311_v27 }
 0x4a8   :  { %8845 = vmatpush3.msra.mxu0 %v7311_v27  ;;  %8874 = vmatpush3.msra.mxu1 %v7311_v27 }
 0x4a9   :  { %8846 = vmatprep.subr.mxu0 %v7310_v28  ;;  %8875 = vmatprep.subr.mxu1 %v7310_v28 }
 0x4aa   :  { %8847 = vmatpush3.msra.mxu0 %v7310_v28  ;;  %8876 = vmatpush3.msra.mxu1 %v7310_v28 }
 0x4ab   :  { %8848 = vmatprep.subr.mxu0 %v7309_v37  ;;  %8877 = vmatprep.subr.mxu1 %v7309_v37 }
 0x4ac   :  { %8849 = vmatpush3.msra.mxu0 %v7309_v37  ;;  %8878 = vmatpush3.msra.mxu1 %v7309_v37 }
 0x4ad   :  { %8850 = vmatprep.subr.mxu0 %v7308_v38  ;;  %8879 = vmatprep.subr.mxu1 %v7308_v38 }
 0x4ae   :  { %8851 = vmatpush3.msra.mxu0 %v7308_v38  ;;  %8880 = vmatpush3.msra.mxu1 %v7308_v38 }
 0x4af   :  { %8852 = vmatprep.subr.mxu0 %v7307_v47  ;;  %8881 = vmatprep.subr.mxu1 %v7307_v47 }
 0x4b0   :  { %8853 = vmatpush3.msra.mxu0 %v7307_v47  ;;  %8882 = vmatpush3.msra.mxu1 %v7307_v47  ;;  %v3256_v47 = vmax.f32 %v3254_v16, %v3255_v29 }
 0x4b1   :  { %8854 = vmatprep.subr.mxu0 %v7306_v18  ;;  %8883 = vmatprep.subr.mxu1 %v7306_v18 }
 0x4b2   :  { %8855 = vmatpush3.msra.mxu0 %v7306_v18  ;;  %8884 = vmatpush3.msra.mxu1 %v7306_v18  ;;  %v3239_v18 = vmax.f32 %v3237_v19, %v3238_v33 }
 0x4b3   :  { %8856 = vmatprep.subr.mxu0 %v7305_v41  ;;  %8885 = vmatprep.subr.mxu1 %v7305_v41 }
 0x4b4   :  { %8857 = vmatpush3.msra.mxu0 %v7305_v41  ;;  %8886 = vmatpush3.msra.mxu1 %v7305_v41 }
 0x4b5   :  { %8859 = vmatmul.mubr.msk.f32.vlgmr.msra.gmra.mxu0 %vm102_vm1, %v9337_v31  ;;  %8888 = vmatmul.mubr.msk.f32.vlgmr.msra.gmra.mxu1 %vm102_vm1, %v9340_v32  ;;  %v7328_v31 = vld [vmem:[%s11513_s3 + $0x110] sm:$0xff] }
 0x4b6   :  { %8890 = vmatprep.mubr.msk.f32.mxu1 %vm102_vm1, %v9359_v39  ;;  %8893 = vmatprep.subr.mxu0 %v7329_v58  ;;  %v7332_v32 = vld [vmem:[%s11513_s3 + $0x130] sm:$0xff]  ;;  %v7327_v39 = vld [vmem:[%s11513_s3 + $0x108] sm:$0xff] }
 0x4b7   :  { %8904 = vmatprep.subr.mxu1 %v7333_v24  ;;  %8894 = vmatpush3.msra.mxu0 %v7329_v58 }
 0x4b8   :  { %8905 = vmatpush3.msra.mxu1 %v7333_v24  ;;  %8895 = vmatprep.subr.mxu0 %v7328_v31 }
 0x4b9   :  { %8891 = vmatmul.mubr.msk.f32.gmra.mxu1 %vm102_vm1, %v9362_v40  ;;  %v7331_v40 = vld [vmem:[%s11513_s3 + $0x128] sm:$0xff]  ;;  %8906 = vmatprep.subr.mxu1 %v7332_v32 }
 0x4ba   :  { %8896 = vmatpush3.msra.mxu0 %v7328_v31  ;;  %8907 = vmatpush3.msra.mxu1 %v7332_v32 }
 0x4bb   :  { %8897 = vmatprep.subr.mxu0 %v7327_v39  ;;  %8908 = vmatprep.subr.mxu1 %v7331_v40 }
 0x4bc   :  { %8898 = vmatpush3.msra.mxu0 %v7327_v39  ;;  %8909 = vmatpush3.msra.mxu1 %v7331_v40 }
 0x4bd   :  { %8899 = vmatprep.subr.mxu0 %v7326_v43  ;;  %8910 = vmatprep.subr.mxu1 %v7330_v50 }
 0x4be   :  { %8900 = vmatpush3.msra.mxu0 %v7326_v43  ;;  %8911 = vmatpush3.msra.mxu1 %v7330_v50  ;;  %v3240_v50 = vrot.slane %v3239_v18, 2 }
 0x4bf   :  { %8915 = vmatprep.subr.mxu0 %v10486_v7  ;;  %8926 = vmatprep.subr.mxu1 %v10491_v49 }
 0x52d   :  { %v8717_v51 = vpop.f32.mrf.mxu0  ;;  %v8728_v54 = vpop.f32.mrf.mxu1 }
 0x52e   :  { %v4221_v46 = vrot.slane %v8728_v54, 1 }
 0x52f   :  { %v4192_v60 = vpop.f32.mrf.mxu1  ;;  %v4117_v17 = vpop.f32.mrf.mxu0 }
 0x530   :  { %v4223_v25 = vadd.f32 %v8717_v51, %v4221_v46  ;;  %v4202_v53 = vrot.slane %v4192_v60, 1  ;;  %v3257_v51 = vrot.slane %v3256_v47, 2 }
 0x532   :  { %v10501_v42 = vadd.f32 %v10498_v57, %v4223_v25  ;;  %v10503_v4 = vadd.f32 %v4202_v53, %v4117_v17  ;;  %v3258_v44 = vmax.f32 %v3256_v47, %v3257_v51 }
 0x534   :  { %11564 = vst [vmem:[#allocation8_spill] sm:$0xff] %v10501_v42 }
 0x536   :  { %v8750_v35 = vpop.f32.mrf.mxu1  ;;  %v8739_v3 = vpop.f32.mrf.mxu0 }
 0x537   :  { %v4482_v2 = vrot.slane %v8750_v35, 1  ;;  %v7291_v35 = vld [vmem:[%s11518_s8 + $0x3] ss:$0 sm:$0xff] }
 0x538   :  { %v4374_v15 = vpop.f32.mrf.mxu1  ;;  %v4299_v21 = vpop.f32.mrf.mxu0 }
 0x539   :  { %v4484_v8 = vadd.f32 %v8739_v3, %v4482_v2  ;;  %v4459_v30 = vrot.slane %v4374_v15, 1 }
 0x53b   :  { %v4461_v48 = vadd.f32 %v4459_v30, %v4299_v21 }
 0x540   :  { %v8761_v22 = vpop.f32.mrf.mxu0  ;;  %v8772_v52 = vpop.f32.mrf.mxu1 }
 0x541   :  { %v4486_v27 = vrot.slane %v8761_v22, 2 }
 0x542   :  { %v4449_v20 = vpop.f32.mrf.mxu0  ;;  %v4576_v28 = vpop.f32.mrf.mxu1 }
 0x543   :  { %v4488_v37 = vadd.f32 %v4486_v27, %v4484_v8  ;;  %v4463_v38 = vrot.slane %v4449_v20, 2  ;;  %v3241_v8 = vmax.f32 %v3239_v18, %v3240_v50 }
 0x545   :  { %v4489_v41 = vadd.f32 %v7282_v14, %v4488_v37  ;;  %v4465_v58 = vadd.f32 %v4463_v38, %v4461_v48  ;;  %v3242_v48 = vrot.slane %v3241_v8, 1  ;;  %v3259_v37 = vrot.slane %v3258_v44, 1 }
 0x546   :  { %v8775_v24 = vpop.f32.mrf.mxu1 }
 0x547   :  { %v4490_v31 = vmax.f32 %v4489_v41, 0.0  ;;  %v4472_v32 = vadd.f32 %v7282_v14, %v4465_v58  ;;  %v3466_v41 = vmax.f32 %v10233_v1, %v3465_v11 }
 0x548   :  { %v4586_v39 = vpop.f32.mrf.mxu1 }
 0x549   :  { %v4491_v40 = vsel %vm760_vm12, %v4490_v31, -inf  ;;  %v4473_v43 = vmax.f32 %v4472_v32, 0.0 }
 0x54a   :  { %v4492_v54 = vrot.slane %v4491_v40, 4 }
 0x54b   :  { %v4474_v46 = vsel %vm760_vm12, %v4473_v43, -inf  ;;  %v8786_v60 = vpop.f32.mrf.mxu0  ;;  %v8800_v25 = vpop.f32.mrf.mxu1 }
 0x54c   :  { %v4493_v53 = vmax.f32 %v4491_v40, %v4492_v54  ;;  %v4475_v17 = vrot.slane %v4474_v46, 4  ;;  %v4683_v0 = vrot.slane %v8786_v60, 1  ;;  %v3243_v54 = vmax.f32 %v3241_v8, %v3242_v48 }
 0x54d   :  { %v4661_v2 = vpop.f32.mrf.mxu0  ;;  %v10518_v3 = vpop.f32.mrf.mxu1 }
 0x54e   :  { %v4476_v15 = vmax.f32 %v4474_v46, %v4475_v17  ;;  %v4688_v16 = vadd.f32 %v8772_v52, %v4683_v0  ;;  %v4682_v19 = vrot.slane %v4661_v2, 1  ;;  %v4494_v21 = vrot.slane %v4493_v53, 2 }
 0x54f   :  { %v10528_v46 = vmax.f32 %v3258_v44, %v3259_v37 }
 0x550   :  { %v4696_v30 = vadd.f32 %v7291_v35, %v4688_v16  ;;  %v4684_v22 = vsel %vm969_vm9, %v4682_v19, %v4683_v0  ;;  %v4477_v29 = vrot.slane %v4476_v15, 2  ;;  %v4495_v33 = vmax.f32 %v4493_v53, %v4494_v21  ;;  %v10966_v19 = vld [vmem:[%s11521_s11 + $0x140] sm:$0xff] }
 0x551   :  { %v4687_v27 = vadd.f32 %v4684_v22, %v4576_v28  ;;  %v8789_v14 = vpop.f32.mrf.mxu0  ;;  %v10522_v20 = vpop.f32.mrf.mxu1  ;;  %v3487_v28 = vrot.slane %v10242_v59, 4  ;;  %11565 = vst [vmem:[#allocation9_spill] sm:$0xff] %v10528_v46  ;;  %v3467_v0 = vrot.slane %v3466_v41, 2  ;;  %11583 = vst [vmem:[#allocation27_spill] sm:$0xff] %v10966_v19 }
 0x552   :  { %v4711_v38 = vrot.slane %v8789_v14, 1  ;;  %v4478_v18 = vmax.f32 %v4476_v15, %v4477_v29  ;;  %v4496_v47 = vrot.slane %v4495_v33, 1  ;;  %v4698_v58 = vmax.f32 %v4696_v30, 0.0 }
 0x553   :  { %v4695_v52 = vadd.f32 %v7291_v35, %v4687_v27  ;;  %v4671_v31 = vpop.f32.mrf.mxu0  ;;  %v10525_v32 = vpop.f32.mrf.mxu1  ;;  %v3488_v21 = vmax.f32 %v10242_v59, %v3487_v28 }
 0x554   :  { %v4716_v40 = vadd.f32 %v8775_v24, %v4711_v38  ;;  %v4710_v43 = vrot.slane %v4671_v31, 1  ;;  %v4479_v50 = vrot.slane %v4478_v18, 1  ;;  %v10530_v60 = vmax.f32 %v4495_v33, %v4496_v47 }
 0x555   :  { %v4697_v51 = vmax.f32 %v4695_v52, 0.0  ;;  %v4700_v2 = vsel %vm498_vm10, %v4698_v58, -inf  ;;  %v3468_v47 = vmax.f32 %v3466_v41, %v3467_v0  ;;  %v3489_v31 = vrot.slane %v3488_v21, 2 }
 0x556   :  { %11566 = vst [vmem:[#allocation10_spill] sm:$0xff] %v10530_v60  ;;  %v4718_v53 = vadd.f32 %v7291_v35, %v4716_v40  ;;  %v4712_v1 = vsel %vm969_vm9, %v4710_v43, %v4711_v38  ;;  %v4480_v17 = vmax.f32 %v4478_v18, %v4479_v50 }
 0x557   :  { %v4699_v11 = vsel %vm329_vm8, %v4697_v51, -inf  ;;  %v4715_v24 = vadd.f32 %v4712_v1, %v4586_v39  ;;  %v8814_v15 = vpop.f32.mrf.mxu0  ;;  %v8828_v16 = vpop.f32.mrf.mxu1  ;;  %v7304_v39 = vld [vmem:[%s11520_s10 + $0x3] ss:$0 sm:$0xff] }
 0x558   :  { %v4701_v8 = vmax.f32 %v4699_v11, %v4700_v2  ;;  %v4988_v44 = vrot.slane %v8814_v15, 1  ;;  %v4720_v30 = vmax.f32 %v4718_v53, 0.0  ;;  %v9112_v27 = vpack.i.bf16 %v3243_v54, %v4480_v17 }
 0x559   :  { %v4717_v22 = vadd.f32 %v7291_v35, %v4715_v24  ;;  %v4881_v29 = vpop.f32.mrf.mxu0  ;;  %v4966_v33 = vpop.f32.mrf.mxu1  ;;  %v4997_v48 = vrot.slane %v8828_v16, 2  ;;  %v3779_v35 = vrot.slane %v10248_v61, 4  ;;  %v3469_v24 = vrot.slane %v3468_v47, 1 }
 0x55a   :  { %v4993_v14 = vadd.f32 %v8800_v25, %v4988_v44  ;;  %v4987_v37 = vrot.slane %v4881_v29, 1  ;;  %v4996_v38 = vrot.slane %v4966_v33, 2  ;;  %9113 = vrot.lane.b32.xlu1 %v9112_v27, %s9184_s27  ;;  %v4702_v58 = vrot.slane %v4701_v8, 4 }
 0x55b   :  { %v4719_v18 = vmax.f32 %v4717_v22, 0.0  ;;  %v4722_v25 = vsel %vm498_vm10, %v4720_v30, -inf  ;;  %v3490_v33 = vmax.f32 %v3488_v21, %v3489_v31 }
 0x55c   :  { %v5002_v52 = vadd.f32 %v4997_v48, %v4993_v14  ;;  %v4989_v59 = vsel %vm969_vm9, %v4987_v37, %v4988_v44  ;;  %v4703_v51 = vmax.f32 %v4701_v8, %v4702_v58  ;;  %v4998_v41 = vsel %vm1284_vm11, %v4996_v38, %v4997_v48 }
 0x55d   :  { %v4721_v40 = vsel %vm329_vm8, %v4719_v18, -inf  ;;  %v4992_v43 = vadd.f32 %v4989_v59, %v10518_v3  ;;  %v8817_v50 = vpop.f32.mrf.mxu0  ;;  %v8831_v28 = vpop.f32.mrf.mxu1  ;;  %v3780_v37 = vmax.f32 %v10248_v61, %v3779_v35 }
 0x55e   :  { %v4723_v54 = vmax.f32 %v4721_v40, %v4722_v25  ;;  %v5010_v53 = vadd.f32 %v7304_v39, %v5002_v52  ;;  %v5025_v1 = vrot.slane %v8817_v50, 1  ;;  %v5034_v0 = vrot.slane %v8831_v28, 2 }
 0x55f   :  { %v5001_v17 = vadd.f32 %v4998_v41, %v4992_v43  ;;  %v4891_v2 = vpop.f32.mrf.mxu0  ;;  %v4976_v11 = vpop.f32.mrf.mxu1  ;;  %v4704_v15 = vrot.slane %v4703_v51, 2  ;;  %v3470_v25 = vmax.f32 %v3468_v47, %v3469_v24  ;;  %v3810_v40 = vrot.slane %v10252_v23, 4 }
 0x560   :  { %v5012_v16 = vmax.f32 %v5010_v53, 0.0  ;;  %v5030_v44 = vadd.f32 %v10522_v20, %v5025_v1  ;;  %v5024_v30 = vrot.slane %v4891_v2, 1  ;;  %v5033_v22 = vrot.slane %v4976_v11, 2 }
 0x561   :  { %v5009_v3 = vadd.f32 %v7304_v39, %v5001_v17  ;;  %v4705_v29 = vmax.f32 %v4703_v51, %v4704_v15  ;;  %v4724_v8 = vrot.slane %v4723_v54, 4  ;;  %v3781_v51 = vrot.slane %v3780_v37, 2 }
 0x562   :  { %v5039_v27 = vadd.f32 %v5034_v0, %v5030_v44  ;;  %v5026_v14 = vsel %vm969_vm9, %v5024_v30, %v5025_v1  ;;  %v5035_v48 = vsel %vm1284_vm11, %v5033_v22, %v5034_v0  ;;  %v5014_v20 = vsel %vm760_vm12, %v5012_v16, -inf }
 0x563   :  { %v5011_v38 = vmax.f32 %v5009_v3, 0.0  ;;  %v5029_v18 = vadd.f32 %v5026_v14, %v10525_v32  ;;  %v4706_v58 = vrot.slane %v4705_v29, 1  ;;  %v4725_v52 = vmax.f32 %v4723_v54, %v4724_v8 }
 0x564   :  { %v5041_v59 = vadd.f32 %v7304_v39, %v5039_v27  ;;  %v3491_v53 = vrot.slane %v3490_v33, 1  ;;  %v3811_v54 = vmax.f32 %v10252_v23, %v3810_v40  ;;  %v3782_v0 = vmax.f32 %v3780_v37, %v3781_v51  ;;  %v10972_v23 = vld [vmem:[%s11521_s11 + $0x28] sm:$0xff] }
 0x565   :  { %v5013_v21 = vsel %vm329_vm8, %v5011_v38, -inf  ;;  %v5038_v31 = vadd.f32 %v5035_v48, %v5029_v18  ;;  %v4707_v43 = vmax.f32 %v4705_v29, %v4706_v58  ;;  %v4726_v50 = vrot.slane %v4725_v52, 2 }
 0x566   :  { %v5015_v28 = vmax.f32 %v5013_v21, %v5014_v20  ;;  %v5043_v61 = vmax.f32 %v5041_v59, 0.0  ;;  %v10560_v15 = vmax.f32 %v3490_v33, %v3491_v53  ;;  %v3812_v30 = vrot.slane %v3811_v54, 2  ;;  %v7346_v53 = vld [vmem:[%s11515_s5 + $0x1d8] sm:$0xff] }
 0x567   :  { %v5040_v35 = vadd.f32 %v7304_v39, %v5038_v31  ;;  %v9117_v41 = vpack.i.bf16 %v3470_v25, %v4707_v43  ;;  %v4727_v32 = vmax.f32 %v4725_v52, %v4726_v50  ;;  %v3783_v22 = vrot.slane %v3782_v0, 1  ;;  %v7337_v25 = vld [vmem:[%s11515_s5 + $0x190] sm:$0xff]  ;;  %v7336_v50 = vld [vmem:[%s11515_s5 + $0x188] sm:$0xff] }
 0x568   :  { %v5016_v1 = vrot.slane %v5015_v28, 4  ;;  %v5045_v11 = vsel %vm760_vm12, %v5043_v61, -inf  ;;  %v3813_v27 = vmax.f32 %v3811_v54, %v3812_v30  ;;  %v7341_v31 = vld [vmem:[%s11515_s5 + $0x1b0] sm:$0xff]  ;;  %v7351_v61 = vld [vmem:[%s11517_s7 + $0x118] sm:$0xff]  ;;  %v10960_v43 = vld [vmem:[%s11521_s11 + $0xa8] sm:$0xff] }
 0x569   :  { %v5042_v17 = vmax.f32 %v5040_v35, 0.0  ;;  %9118 = vrot.lane.b32.xlu0 %v9117_v41, %s9185_s28  ;;  %v4728_v47 = vrot.slane %v4727_v32, 1  ;;  %v3784_v48 = vmax.f32 %v3782_v0, %v3783_v22  ;;  %v7345_v35 = vld [vmem:[%s11515_s5 + $0x1d0] sm:$0xff]  ;;  %v7348_v0 = vld [vmem:[%s11517_s7 + $0x100] sm:$0xff] }
 0x56a   :  { %v5017_v2 = vmax.f32 %v5015_v28, %v5016_v1  ;;  %v3814_v33 = vrot.slane %v3813_v27, 1  ;;  %v7340_v28 = vld [vmem:[%s11515_s5 + $0x1a8] sm:$0xff]  ;;  %v7350_v41 = vld [vmem:[%s11517_s7 + $0x110] sm:$0xff]  ;;  %v9157_v1 = vld [vmem:[%s11514_s4 + $0x1] ss:$0 sm:$0xff] }
 0x56b   :  { %v5044_v24 = vsel %vm329_vm8, %v5042_v17, -inf  ;;  %v10562_v16 = vmax.f32 %v4727_v32, %v4728_v47  ;;  %v1737_v54 = vadd.f32 %v9157_v1, %v9910_v6  ;;  %v7344_v17 = vld [vmem:[%s11515_s5 + $0x1c8] sm:$0xff]  ;;  %v7343_v6 = vld [vmem:[%s11515_s5 + $0x1c0] sm:$0xff]  ;;  %v7354_v22 = vld [vmem:[%s11517_s7 + $0x130] sm:$0xff] }
 0x56c   :  { %v5046_v39 = vmax.f32 %v5044_v24, %v5045_v11  ;;  %v5018_v44 = vrot.slane %v5017_v2, 2  ;;  %v10574_v40 = vmax.f32 %v3813_v27, %v3814_v33  ;;  %v7349_v47 = vld [vmem:[%s11517_s7 + $0x108] sm:$0xff]  ;;  %v7355_v24 = vld [vmem:[%s11517_s7 + $0x138] sm:$0xff] }
 0x56d   :  { %v7358_v27 = vld [vmem:[%s11519_s9 + $0x188] sm:$0xff] }
 0x56e   :  { %v5019_v3 = vmax.f32 %v5017_v2, %v5018_v44  ;;  %v5047_v29 = vrot.slane %v5046_v39, 4  ;;  %11567 = vst [vmem:[#allocation11_spill] sm:$0xff] %v10574_v40  ;;  %v1738_v2 = vmax.f32 %v1737_v54, 0.0  ;;  %v10752_v54 = vld [vmem:[%s11521_s11 + $0xf0] sm:$0xff] }
 0x570   :  { %v5020_v8 = vrot.slane %v5019_v3, 1  ;;  %v5048_v14 = vmax.f32 %v5046_v39, %v5047_v29  ;;  %v7360_v39 = vld [vmem:[%s11519_s9 + $0x198] sm:$0xff]  ;;  %v1739_v44 = vsel %vm498_vm10, %v1738_v2, -inf  ;;  %v7353_v29 = vld [vmem:[%s11517_s7 + $0x128] sm:$0xff] }
 0x571   :  { %v10774_v2 = vld [vmem:[%s11521_s11 + $0xe8] sm:$0xff] }
 0x572   :  { %v5021_v37 = vmax.f32 %v5019_v3, %v5020_v8  ;;  %v5049_v38 = vrot.slane %v5048_v14, 2  ;;  %v7359_v3 = vld [vmem:[%s11519_s9 + $0x190] sm:$0xff]  ;;  %v1740_v8 = vrot.slane %v1739_v44, 4 }
 0x574   :  { %v9122_v18 = vpack.i.bf16 %v3784_v48, %v5021_v37  ;;  %v5050_v58 = vmax.f32 %v5048_v14, %v5049_v38  ;;  %v7352_v14 = vld [vmem:[%s11517_s7 + $0x120] sm:$0xff]  ;;  %v1741_v37 = vmax.f32 %v1739_v44, %v1740_v8  ;;  %v7364_v38 = vld [vmem:[%s11519_s9 + $0x1b8] sm:$0xff] }
 0x575   :  { %v10566_v52 = vpop.f32.mrf.mxu0  ;;  %v10603_v51 = vpop.f32.mrf.mxu1  ;;  %v7357_v48 = vld [vmem:[%s11519_s9 + $0x180] sm:$0xff] }
 0x576   :  { %9123 = vrot.lane.b32.xlu1 %v9122_v18, %s9186_s1  ;;  %v5051_v20 = vrot.slane %v5050_v58, 1  ;;  %v7368_v18 = vld [vmem:[%s11519_s9 + $0x1d8] sm:$0xff]  ;;  %v1742_v33 = vrot.slane %v1741_v37, 2  ;;  %v10806_v8 = vld [vmem:[%s11521_s11 + $0x60] sm:$0xff] }
 0x577   :  { %v5136_v59 = vpop.f32.mrf.mxu0  ;;  %v10621_v32 = vpop.f32.mrf.mxu1 }
 0x578   :  { %8901 = vmatprep.mubr.msk.f32.mxu0 %vm329_vm8, %v5136_v59  ;;  %8912 = vmatprep.mubr.msk.f32.mxu1 %vm329_vm8, %v5136_v59  ;;  %v10576_v21 = vmax.f32 %v5050_v58, %v5051_v20  ;;  %v7363_v58 = vld [vmem:[%s11519_s9 + $0x1b0] sm:$0xff]  ;;  %v7362_v20 = vld [vmem:[%s11519_s9 + $0x1a8] sm:$0xff] }
 0x579   :  { %8902 = vmatmul.mubr.msk.f32.vlgmr.msra.gmra.mxu0 %vm329_vm8, %v10566_v52  ;;  %8913 = vmatmul.mubr.msk.f32.vlgmr.msra.gmra.mxu1 %vm329_vm8, %v10566_v52  ;;  %v10642_v11 = vpop.f32.mrf.mxu1 }
 0x57a   :  { %11568 = vst [vmem:[#allocation12_spill] sm:$0xff] %v10576_v21  ;;  %8916 = vmatpush3.msra.mxu0 %v10486_v7  ;;  %8927 = vmatpush3.msra.mxu1 %v10491_v49  ;;  %v7335_v7 = vld [vmem:[%s11515_s5 + $0x180] sm:$0xff] }
 0x57b   :  { %8917 = vmatprep.subr.mxu0 %v7337_v25  ;;  %8923 = vmatprep.mubr.msk.f32.mxu0 %vm329_vm8, %v5136_v59  ;;  %v7339_v49 = vld [vmem:[%s11515_s5 + $0x1a0] sm:$0xff]  ;;  %v10655_v30 = vpop.f32.mrf.mxu1 }
 0x57c   :  { %8928 = vmatprep.subr.mxu1 %v7341_v31  ;;  %8934 = vmatprep.mubr.msk.f32.mxu1 %vm329_vm8, %v5136_v59 }
 0x57d   :  { %8918 = vmatpush3.msra.mxu0 %v7337_v25  ;;  %8929 = vmatpush3.msra.mxu1 %v7341_v31  ;;  %v1743_v25 = vmax.f32 %v1741_v37, %v1742_v33  ;;  %v10709_v31 = vpop.permute.xlu0 %9098  ;;  %v10834_v37 = vld [vmem:[%s11521_s11 + $0x1e8] sm:$0xff] }
 0x57e   :  { %8919 = vmatprep.subr.mxu0 %v7336_v50  ;;  %8930 = vmatprep.subr.mxu1 %v7340_v28  ;;  %v9100_v1 = vunpack.i.l.bf16 %v10709_v31  ;;  %11572 = vst [vmem:[#allocation16_spill] sm:$0xff] %v10834_v37  ;;  %v10846_v33 = vld [vmem:[%s11521_s11 + $0x168] sm:$0xff] }
 0x57f   :  { %8920 = vmatpush3.msra.mxu0 %v7336_v50  ;;  %8931 = vmatpush3.msra.mxu1 %v7340_v28  ;;  %v7361_v50 = vld [vmem:[%s11519_s9 + $0x1a0] sm:$0xff]  ;;  %11573 = vst [vmem:[#allocation17_spill] sm:$0xff] %v10846_v33 }
 0x580   :  { %8921 = vmatprep.subr.mxu0 %v7335_v7  ;;  %8932 = vmatprep.subr.mxu1 %v7339_v49  ;;  %v7365_v28 = vld [vmem:[%s11519_s9 + $0x1c0] sm:$0xff] }
 0x581   :  { %8922 = vmatpush3.msra.mxu0 %v7335_v7  ;;  %8933 = vmatpush3.msra.mxu1 %v7339_v49  ;;  %v9158_v7 = vld [vmem:[%s11514_s4] ss:$0 sm:$0xff] }
 0x582   :  { %8924 = vmatmul.mubr.msk.f32.vlgmr.msra.gmra.mxu0 %vm329_vm8, %v10566_v52  ;;  %8935 = vmatmul.mubr.msk.f32.vlgmr.msra.gmra.mxu1 %vm329_vm8, %v10566_v52  ;;  %v496_v49 = vadd.f32 %v9158_v7, %v9624_v56  ;;  %v10742_v56 = vld [vmem:[%s11521_s11 + $0x78] sm:$0xff]  ;;  %v10888_v7 = vld [vmem:[%s11521_s11 + $0xc0] sm:$0xff] }
 0x583   :  { %8937 = vmatprep.subr.mxu0 %v7346_v53  ;;  %8948 = vmatprep.subr.mxu1 %v7351_v61 }
 0x584   :  { %8938 = vmatpush3.msra.mxu0 %v7346_v53  ;;  %8945 = vmatprep.mubr.msk.f32.mxu0 %vm329_vm8, %v5136_v59  ;;  %v7366_v59 = vld [vmem:[%s11519_s9 + $0x1c8] sm:$0xff]  ;;  %v1744_v53 = vrot.slane %v1743_v25, 1 }
 0x585   :  { %8949 = vmatpush3.msra.mxu1 %v7351_v61  ;;  %8956 = vmatprep.mubr.msk.f32.mxu1 %vm329_vm8, %v10621_v32  ;;  %v10727_v61 = vpop.permute.xlu1 %9103 }
 0x586   :  { %8939 = vmatprep.subr.mxu0 %v7345_v35  ;;  %8950 = vmatprep.subr.mxu1 %v7350_v41 }
 0x587   :  { %8940 = vmatpush3.msra.mxu0 %v7345_v35  ;;  %8951 = vmatpush3.msra.mxu1 %v7350_v41  ;;  %v10731_v35 = vpop.permute.xlu0 %9108  ;;  %v10736_v41 = vld [vmem:[%s11521_s11 + $0xf8] sm:$0xff] }
 0x588   :  { %8941 = vmatprep.subr.mxu0 %v7344_v17  ;;  %8952 = vmatprep.subr.mxu1 %v7349_v47 }
 0x589   :  { %8942 = vmatpush3.msra.mxu0 %v7344_v17  ;;  %8953 = vmatpush3.msra.mxu1 %v7349_v47  ;;  %v10757_v17 = vld [vmem:[%s11521_s11 + $0x1f8] sm:$0xff]  ;;  %v497_v47 = vmax.f32 %v496_v49, 0.0 }
 0x58a   :  { %8943 = vmatprep.subr.mxu0 %v7343_v6  ;;  %8954 = vmatprep.subr.mxu1 %v7348_v0  ;;  %v10894_v49 = vld [vmem:[%s11521_s11 + $0x158] sm:$0xff] }
 0x58b   :  { %8944 = vmatpush3.msra.mxu0 %v7343_v6  ;;  %8955 = vmatpush3.msra.mxu1 %v7348_v0  ;;  %v9110_v6 = vunpack.i.l.bf16 %v10731_v35  ;;  %v1745_v0 = vmax.f32 %v1743_v25, %v1744_v53  ;;  %v10876_v25 = vld [vmem:[%s11521_s11 + $0x48] sm:$0xff]  ;;  %11577 = vst [vmem:[#allocation21_spill] sm:$0xff] %v10894_v49  ;;  %v10900_v53 = vld [vmem:[%s11521_s11 + $0x40] sm:$0xff] }
 0x58c   :  { %8946 = vmatmul.mubr.msk.f32.vlgmr.msra.gmra.mxu0 %vm329_vm8, %v10566_v52  ;;  %8957 = vmatmul.mubr.msk.f32.vlgmr.msra.gmra.mxu1 %vm329_vm8, %v10603_v51  ;;  %v7367_v52 = vld [vmem:[%s11519_s9 + $0x1d0] sm:$0xff] }
 0x58d   :  { %8962 = vmatprep.subr.mxu0 %v7355_v24  ;;  %8976 = vmatprep.subr.mxu1 %v7360_v39 }
 0x58e   :  { %8959 = vmatprep.mubr.msk.f32.mxu1 %vm329_vm8, %v10655_v30  ;;  %8963 = vmatpush3.msra.mxu0 %v7355_v24  ;;  %v10780_v24 = vld [vmem:[%s11521_s11 + $0x68] sm:$0xff] }
 0x58f   :  { %8970 = vmatprep.mubr.msk.f32.mxu0 %vm329_vm8, %v10621_v32  ;;  %8977 = vmatpush3.msra.mxu1 %v7360_v39  ;;  %v6424_v39 = vsel %vm329_vm8, %v1745_v0, %v9100_v1  ;;  %v10906_v1 = vld [vmem:[%s11521_s11 + $0x1d0] sm:$0xff]  ;;  %v10930_v0 = vld [vmem:[%s11521_s11 + $0x1c8] sm:$0xff] }
 0x590   :  { %8964 = vmatprep.subr.mxu0 %v7354_v22  ;;  %8978 = vmatprep.subr.mxu1 %v7359_v3  ;;  %11578 = vst [vmem:[#allocation22_spill] sm:$0xff] %v10906_v1  ;;  %11580 = vst [vmem:[#allocation24_spill] sm:$0xff] %v10930_v0 }
 0x591   :  { %8965 = vmatpush3.msra.mxu0 %v7354_v22  ;;  %8979 = vmatpush3.msra.mxu1 %v7359_v3  ;;  %v10796_v22 = vld [vmem:[%s11521_s11 + $0x178] sm:$0xff]  ;;  %v499_v3 = vsel %vm498_vm10, %v497_v47, -inf  ;;  %v10918_v47 = vld [vmem:[%s11521_s11 + $0x150] sm:$0xff] }
 0x592   :  { %8960 = vmatmul.mubr.msk.f32.gmra.mxu1 %vm329_vm8, %v10642_v11  ;;  %8966 = vmatprep.subr.mxu0 %v7353_v29  ;;  %11569 = vst [vmem:[#allocation13_spill] sm:$0xff] %v10796_v22  ;;  %11579 = vst [vmem:[#allocation23_spill] sm:$0xff] %v10918_v47 }
 0x593   :  { %8980 = vmatprep.subr.mxu1 %v7358_v27  ;;  %8967 = vmatpush3.msra.mxu0 %v7353_v29 }
 0x594   :  { %8981 = vmatpush3.msra.mxu1 %v7358_v27  ;;  %8984 = vmatprep.mubr.msk.f32.mxu1 %vm329_vm8, %v10621_v32  ;;  %v10811_v27 = vld [vmem:[%s11521_s11 + $0x1f0] sm:$0xff] }
 0x595   :  { %8968 = vmatprep.subr.mxu0 %v7352_v14  ;;  %8982 = vmatprep.subr.mxu1 %v7357_v48  ;;  %11570 = vst [vmem:[#allocation14_spill] sm:$0xff] %v10811_v27 }
 0x596   :  { %8969 = vmatpush3.msra.mxu0 %v7352_v14  ;;  %8983 = vmatpush3.msra.mxu1 %v7357_v48  ;;  %v10822_v14 = vld [vmem:[%s11521_s11 + $0x170] sm:$0xff]  ;;  %v10828_v48 = vld [vmem:[%s11521_s11 + $0x58] sm:$0xff] }
 0x597   :  { %8971 = vmatmul.mubr.msk.f32.vlgmr.msra.gmra.mxu0 %vm329_vm8, %v10603_v51  ;;  %8985 = vmatmul.mubr.msk.f32.vlgmr.msra.gmra.mxu1 %vm329_vm8, %v10603_v51  ;;  %11571 = vst [vmem:[#allocation15_spill] sm:$0xff] %v10822_v14 }
 0x598   :  { %8990 = vmatprep.subr.mxu0 %v7364_v38  ;;  %9004 = vmatprep.subr.mxu1 %v7368_v18 }
 0x599   :  { %8973 = vmatprep.mubr.msk.f32.mxu0 %vm329_vm8, %v10655_v30  ;;  %8987 = vmatprep.mubr.msk.f32.mxu1 %vm329_vm8, %v10655_v30 }
 0x59a   :  { %8991 = vmatpush3.msra.mxu0 %v7364_v38  ;;  %9005 = vmatpush3.msra.mxu1 %v7368_v18  ;;  %v500_v38 = vrot.slane %v499_v3, 4  ;;  %v10840_v18 = vld [vmem:[%s11521_s11 + $0xd0] sm:$0xff] }
 0x59b   :  { %8992 = vmatprep.subr.mxu0 %v7363_v58  ;;  %9006 = vmatprep.subr.mxu1 %v7367_v52 }
 0x59c   :  { %8993 = vmatpush3.msra.mxu0 %v7363_v58  ;;  %9007 = vmatpush3.msra.mxu1 %v7367_v52  ;;  %v10852_v58 = vld [vmem:[%s11521_s11 + $0x50] sm:$0xff]  ;;  %v10858_v52 = vld [vmem:[%s11521_s11 + $0x1e0] sm:$0xff] }
 0x59d   :  { %8974 = vmatmul.mubr.msk.f32.gmra.mxu0 %vm329_vm8, %v10642_v11  ;;  %8988 = vmatmul.mubr.msk.f32.gmra.mxu1 %vm329_vm8, %v10642_v11  ;;  %11574 = vst [vmem:[#allocation18_spill] sm:$0xff] %v10858_v52 }
 0x59e   :  { %8994 = vmatprep.subr.mxu0 %v7362_v20  ;;  %9008 = vmatprep.subr.mxu1 %v7366_v59 }
 0x59f   :  { %8995 = vmatpush3.msra.mxu0 %v7362_v20  ;;  %8998 = vmatprep.mubr.msk.f32.mxu0 %vm329_vm8, %v10621_v32  ;;  %v10864_v20 = vld [vmem:[%s11521_s11 + $0xc8] sm:$0xff] }
 0x5a0   :  { %9009 = vmatpush3.msra.mxu1 %v7366_v59  ;;  %9012 = vmatprep.mubr.msk.f32.mxu1 %vm329_vm8, %v10621_v32  ;;  %v9105_v32 = vunpack.i.l.bf16 %v10727_v61  ;;  %v10870_v59 = vld [vmem:[%s11521_s11 + $0x160] sm:$0xff] }
 0x5a1   :  { %8996 = vmatprep.subr.mxu0 %v7361_v50  ;;  %9010 = vmatprep.subr.mxu1 %v7365_v28  ;;  %11575 = vst [vmem:[#allocation19_spill] sm:$0xff] %v10870_v59 }
 0x5a2   :  { %8997 = vmatpush3.msra.mxu0 %v7361_v50  ;;  %9011 = vmatpush3.msra.mxu1 %v7365_v28  ;;  %v6425_v44 = vsel %vm6420_vm13, %v6424_v39, %v9105_v32  ;;  %v10882_v50 = vld [vmem:[%s11521_s11 + $0x1d8] sm:$0xff]  ;;  %v501_v28 = vmax.f32 %v499_v3, %v500_v38  ;;  %v10942_v3 = vld [vmem:[%s11521_s11 + $0x148] sm:$0xff]  ;;  %v10954_v38 = vld [vmem:[%s11521_s11 + $0x1c0] sm:$0xff] }
 0x5a3   :  { %8999 = vmatmul.mubr.msk.f32.vlgmr.msra.gmra.mxu0 %vm329_vm8, %v10603_v51  ;;  %9013 = vmatmul.mubr.msk.f32.vlgmr.msra.gmra.mxu1 %vm329_vm8, %v10603_v51  ;;  %v10766_v51 = vld [vmem:[%s11521_s11 + $0x70] sm:$0xff]  ;;  %v6426_v29 = vsel %vm6422_vm14, %v6425_v44, %v9110_v6  ;;  %11576 = vst [vmem:[#allocation20_spill] sm:$0xff] %v10882_v50  ;;  %v10912_v32 = vld [vmem:[%s11521_s11 + $0xb8] sm:$0xff]  ;;  %11581 = vst [vmem:[#allocation25_spill] sm:$0xff] %v10942_v3 }
 0x5a4   :  { %7914 = vmatprep.subr.mxu0 %v10736_v41  ;;  %9001 = vmatprep.mubr.msk.f32.mxu0 %vm329_vm8, %v10655_v30  ;;  %v10924_v6 = vld [vmem:[%s11521_s11 + $0x38] sm:$0xff]  ;;  %v502_v39 = vrot.slane %v501_v28, 2  ;;  %v10936_v44 = vld [vmem:[%s11521_s11 + $0xb0] sm:$0xff]  ;;  %11582 = vst [vmem:[#allocation26_spill] sm:$0xff] %v10954_v38 }
 0x5a5   :  { %9015 = vmatprep.mubr.msk.f32.mxu1 %vm329_vm8, %v10655_v30  ;;  %7915 = vmatpush3.msra.mxu0 %v10742_v56  ;;  %v10791_v30 = vld [vmem:[%s11521_s11 + $0xe0] sm:$0xff] }
 0x5a6   :  { %7916 = vmatprep.subr.mxu0 %v10752_v54  ;;  %7949 = vmatprep.subr.mxu1 %v10757_v17  ;;  %v503_v26 = vmax.f32 %v501_v28, %v502_v39  ;;  %v10996_v28 = vld [vmem:[%s11521_s11 + $0x20] sm:$0xff]  ;;  %v11002_v39 = vld [vmem:[%s11521_s11 + $0x1b0] sm:$0xff] }
 0x5a7   :  { %7917 = vmatpush3.msra.mxu0 %v10766_v51  ;;  %9016 = vmatmul.mubr.msk.f32.gmra.mxu1 %vm329_vm8, %v10642_v11  ;;  %11586 = vst [vmem:[#allocation30_spill] sm:$0xff] %v11002_v39 }
 0x5a8   :  { %9002 = vmatmul.mubr.msk.f32.gmra.mxu0 %vm329_vm8, %v10642_v11  ;;  %7918 = vmatprep.subr.mxu0 %v10774_v2  ;;  %v10817_v11 = vld [vmem:[%s11521_s11 + $0xd8] sm:$0xff] }
 0x5a9   :  { %7919 = vmatpush3.msra.mxu0 %v10780_v24  ;;  %6512 = vmatprep.mubr.f32.mxu0 %v6426_v29  ;;  %v10948_v29 = vld [vmem:[%s11521_s11 + $0x30] sm:$0xff] }
 0x5aa   :  { %7920 = vmatprep.subr.mxu0 %v10791_v30  ;;  %7950 = vmatpush3.msra.mxu1 %v10796_v22 }
 0x5ab   :  { %7921 = vmatpush3.msra.mxu0 %v10806_v8  ;;  %7951 = vmatprep.subr.mxu1 %v10811_v27 }
 0x5ac   :  { %7922 = vmatprep.subr.mxu0 %v10817_v11  ;;  %7952 = vmatpush3.msra.mxu1 %v10822_v14  ;;  %v9111_v14 = vunpack.i.h.bf16 %v10731_v35 }
 0x5ad   :  { %7923 = vmatpush3.msra.mxu0 %v10828_v48  ;;  %7953 = vmatprep.subr.mxu1 %v10834_v37 }
 0x5ae   :  { %7924 = vmatprep.subr.mxu0 %v10840_v18  ;;  %7954 = vmatpush3.msra.mxu1 %v10846_v33  ;;  %v9106_v33 = vunpack.i.h.bf16 %v10727_v61  ;;  %v11083_v61 = vld [vmem:[%s11521_s11 + $0x80] sm:$0xff] }
 0x5af   :  { %7925 = vmatpush3.msra.mxu0 %v10852_v58  ;;  %7955 = vmatprep.subr.mxu1 %v10858_v52  ;;  %v11057_v52 = vld [vmem:[%s11521_s11 + $0x88] sm:$0xff] }
 0x5b0   :  { %7926 = vmatprep.subr.mxu0 %v10864_v20  ;;  %7956 = vmatpush3.msra.mxu1 %v10870_v59  ;;  %v11050_v59 = vld [vmem:[%s11521_s11 + $0x1a0] sm:$0xff] }
 0x5b1   :  { %7927 = vmatpush3.msra.mxu0 %v10876_v25  ;;  %7957 = vmatprep.subr.mxu1 %v10882_v50  ;;  %v11038_v50 = vld [vmem:[%s11521_s11 + $0x128] sm:$0xff]  ;;  %11590 = vst [vmem:[#allocation34_spill] sm:$0xff] %v11050_v59 }
 0x5b2   :  { %7928 = vmatprep.subr.mxu0 %v10888_v7  ;;  %7958 = vmatpush3.msra.mxu1 %v10894_v49  ;;  %v11032_v49 = vld [vmem:[%s11521_s11 + $0x90] sm:$0xff]  ;;  %11589 = vst [vmem:[#allocation33_spill] sm:$0xff] %v11038_v50 }
 0x5b3   :  { %7929 = vmatpush3.msra.mxu0 %v10900_v53  ;;  %7959 = vmatprep.subr.mxu1 %v10906_v1  ;;  %v11026_v1 = vld [vmem:[%s11521_s11 + $0x1a8] sm:$0xff] }
 0x5b4   :  { %7930 = vmatprep.subr.mxu0 %v10912_v32  ;;  %7960 = vmatpush3.msra.mxu1 %v10918_v47  ;;  %v10990_v47 = vld [vmem:[%s11521_s11 + $0x138] sm:$0xff]  ;;  %11588 = vst [vmem:[#allocation32_spill] sm:$0xff] %v11026_v1 }
 0x5b5   :  { %7931 = vmatpush3.msra.mxu0 %v10924_v6  ;;  %7961 = vmatprep.subr.mxu1 %v10930_v0  ;;  %v10984_v0 = vld [vmem:[%s11521_s11 + $0xa0] sm:$0xff]  ;;  %11585 = vst [vmem:[#allocation29_spill] sm:$0xff] %v10990_v47 }
 0x5b6   :  { %7932 = vmatprep.subr.mxu0 %v10936_v44  ;;  %7962 = vmatpush3.msra.mxu1 %v10942_v3  ;;  %v11014_v3 = vld [vmem:[%s11521_s11 + $0x130] sm:$0xff] }
 0x5b7   :  { %7933 = vmatpush3.msra.mxu0 %v10948_v29  ;;  %7963 = vmatprep.subr.mxu1 %v10954_v38  ;;  %v11008_v38 = vld [vmem:[%s11521_s11 + $0x98] sm:$0xff]  ;;  %11587 = vst [vmem:[#allocation31_spill] sm:$0xff] %v11014_v3 }
 0x5b8   :  { %7934 = vmatprep.subr.mxu0 %v10960_v43  ;;  %7964 = vmatpush3.msra.mxu1 %v10966_v19  ;;  %v11020_v19 = vld [vmem:[%s11521_s11 + $0x18] sm:$0xff] }
 0x5b9   :  { %7935 = vmatpush3.msra.mxu0 %v10972_v23  ;;  %7965 = vmatprep.subr.mxu1 %v10978_v36  ;;  %v504_v36 = vrot.slane %v503_v26, 1 }
 0x5ba   :  { %7936 = vmatprep.subr.mxu0 %v10984_v0  ;;  %7966 = vmatpush3.msra.mxu1 %v10990_v47  ;;  %v11044_v47 = vld [vmem:[%s11521_s11 + $0x10] sm:$0xff] }
 0x5bb   :  { %7937 = vmatpush3.msra.mxu0 %v10996_v28  ;;  %7967 = vmatprep.subr.mxu1 %v11002_v39  ;;  %v9101_v39 = vunpack.i.h.bf16 %v10709_v31  ;;  %v11070_v31 = vld [vmem:[%s11521_s11 + $0x8] sm:$0xff]  ;;  %v505_v37 = vmax.f32 %v503_v26, %v504_v36  ;;  %v11095_v26 = vld [vmem:[%s11521_s11] sm:$0xff]  ;;  %v11101_v36 = vld [vmem:[%s11521_s11 + $0x190] sm:$0xff] }
 0x5bc   :  { %7938 = vmatprep.subr.mxu0 %v11008_v38  ;;  %7968 = vmatpush3.msra.mxu1 %v11014_v3  ;;  %v11063_v3 = vld [vmem:[%s11521_s11 + $0x120] sm:$0xff]  ;;  %11594 = vst [vmem:[#allocation38_spill] sm:$0xff] %v11101_v36 }
 0x5bd   :  { %7939 = vmatpush3.msra.mxu0 %v11020_v19  ;;  %7969 = vmatprep.subr.mxu1 %v11026_v1  ;;  %11591 = vst [vmem:[#allocation35_spill] sm:$0xff] %v11063_v3  ;;  %v11076_v1 = vld [vmem:[%s11521_s11 + $0x198] sm:$0xff]  ;;  %v6419_v35 = vsel %vm329_vm8, %v505_v37, %v9101_v39  ;;  %v11125_v39 = vld [vmem:[%s11521_s11 + $0x108] sm:$0xff] }
 0x5be   :  { %7940 = vmatprep.subr.mxu0 %v11032_v49  ;;  %7970 = vmatpush3.msra.mxu1 %v11038_v50  ;;  %11592 = vst [vmem:[#allocation36_spill] sm:$0xff] %v11076_v1  ;;  %v11089_v50 = vld [vmem:[%s11521_s11 + $0x118] sm:$0xff]  ;;  %v6421_v27 = vsel %vm6420_vm13, %v6419_v35, %v9106_v33  ;;  %11597 = vst [vmem:[#allocation41_spill] sm:$0xff] %v11125_v39  ;;  %v11131_v33 = vld [vmem:[%s11521_s11 + $0x180] sm:$0xff] }
 0x5bf   :  { %7941 = vmatpush3.msra.mxu0 %v11044_v47  ;;  %7971 = vmatprep.subr.mxu1 %v11050_v59  ;;  %11593 = vst [vmem:[#allocation37_spill] sm:$0xff] %v11089_v50  ;;  %v11109_v59 = vld [vmem:[%s11521_s11 + $0x110] sm:$0xff]  ;;  %v6423_v37 = vsel %vm6422_vm14, %v6421_v27, %v9111_v14  ;;  %11598 = vst [vmem:[#allocation42_spill] sm:$0xff] %v11131_v33  ;;  %v11137_v27 = vld [vmem:[%s11521_s11 + $0x100] sm:$0xff]  ;;  %v11600_v14 = vmov 0.0  }
 0x5c0   :  { %7942 = vmatprep.subr.mxu0 %v11057_v52  ;;  %7972 = vmatpush3.msra.mxu1 %v11063_v3  ;;  %11595 = vst [vmem:[#allocation39_spill] sm:$0xff] %v11109_v59  ;;  %v11117_v3 = vld [vmem:[%s11521_s11 + $0x188] sm:$0xff]  ;;  %11599 = vst [vmem:[#allocation43_spill] sm:$0xff] %v11137_v27  ;;  %v9159_v35 = vld [vmem:[%s11514_s4 + $0x2] ss:$0 sm:$0xff] }
 0x5c1   :  { %7943 = vmatpush3.msra.mxu0 %v11070_v31  ;;  %7973 = vmatprep.subr.mxu1 %v11076_v1  ;;  %11596 = vst [vmem:[#allocation40_spill] sm:$0xff] %v11117_v3 }
 0x5c2   :  { %7944 = vmatprep.subr.mxu0 %v11083_v61  ;;  %7974 = vmatpush3.msra.mxu1 %v11089_v50 }
 0x5c3   :  { %7945 = vmatpush3.msra.mxu0 %v11095_v26  ;;  %7975 = vmatprep.subr.mxu1 %v11101_v36 }
 0x5c4   :  { %6513 = vmatmul.mubr.f32.vlgmr.msra.gmra.mxu0 %v6423_v37  ;;  %7976 = vmatpush3.msra.mxu1 %v11109_v59  ;;  %v2974_v37 = vadd.f32 %v9159_v35, %v10214_v63 }
 0x5c5   :  { %7977 = vmatprep.subr.mxu1 %v11117_v3  ;;  %9018 = vmatprep.subr.mxu0 %v11600_v14  ;;  %v4211_v3 = vadd.f32 %v10498_v57, %v10503_v4 }
 0x5c6   :  { %7978 = vmatpush3.msra.mxu1 %v11125_v39  ;;  %v2975_v59 = vmax.f32 %v2974_v37, 0.0  ;;  %9050 = vmatprep.mubr.msk.f32.mxu0 %vm9187_vm15, %v11600_v14 }
 0x5c7   :  { %7979 = vmatprep.subr.mxu1 %v11131_v33  ;;  %v4212_v36 = vmax.f32 %v4211_v3, 0.0 }
 0x5c8   :  { %7980 = vmatpush3.msra.mxu1 %v11137_v27  ;;  %v2976_v50 = vsel %vm498_vm10, %v2975_v59, -inf }
 0x5c9   :  { %8001 = vmatprep.subr.mxu1 %v10736_v41  ;;  %v4213_v39 = vsel %vm498_vm10, %v4212_v36, -inf  ;;  %v2977_v33 = vrot.slane %v2976_v50, 4 }
 0x5ca   :  { %v4214_v1 = vrot.slane %v4213_v39, 4 }
 0x5cb   :  { %v2978_v22 = vmax.f32 %v2976_v50, %v2977_v33 }
 0x5cc   :  { %v4215_v62 = vmax.f32 %v4213_v39, %v4214_v1  ;;  %v9114_v5 = vpop.permute.xlu1 %9113 }
 0x5cd   :  { %v2979_v42 = vrot.slane %v2978_v22, 2  ;;  %v9116_v21 = vunpack.i.h.bf16 %v9114_v5  ;;  %v9115_v41 = vunpack.i.l.bf16 %v9114_v5  ;;  %v11193_v5 = vld [vmem:[%s11521_s11 + $0x278] sm:$0xff] }
 0x5ce   :  { %v4216_v55 = vrot.slane %v4215_v62, 2  ;;  %9019 = vmatpush3.msra.mxu0 %v11193_v5 }
 0x5cf   :  { %v2980_v63 = vmax.f32 %v2978_v22, %v2979_v42  ;;  %9020 = vmatprep.subr.mxu0 %v11600_v14 }
 0x5d0   :  { %v4217_v35 = vmax.f32 %v4215_v62, %v4216_v55 }
 0x5d1   :  { %v2981_v57 = vrot.slane %v2980_v63, 1 }
 0x5d2   :  { %v4218_v4 = vrot.slane %v4217_v35, 1 }
 0x5d3   :  { %v2982_v40 = vmax.f32 %v2980_v63, %v2981_v57 }
 0x5d4   :  { %v4219_v59 = vmax.f32 %v4217_v35, %v4218_v4 }
 0x5d5   :  { %v6427_v36 = vsel %vm329_vm8, %v2982_v40, %v9116_v21  ;;  %v11226_v40 = vld [vmem:[%s11521_s11 + $0x250] sm:$0xff] }
 0x5d6   :  { %v6430_v1 = vsel %vm329_vm8, %v4219_v59, %v9115_v41  ;;  %v11252_v41 = vld [vmem:[%s11518_s8 + $0x4] ss:$0 sm:$0xff] }
 0x5db   :  { %v9119_v27 = vpop.permute.xlu0 %9118 }
 0x5dc   :  { %v9121_v37 = vunpack.i.h.bf16 %v9119_v27  ;;  %v9120_v3 = vunpack.i.l.bf16 %v9119_v27 }
 0x5de   :  { %v6428_v42 = vsel %vm6420_vm13, %v6427_v36, %v9121_v37  ;;  %v6431_v55 = vsel %vm6420_vm13, %v6430_v1, %v9120_v3  ;;  %v11259_v1 = vld [vmem:[%s11521_s11 + $0x248] sm:$0xff] }
 0x5e8   :  { %v9124_v60 = vpop.permute.xlu1 %9123 }
 0x5e9   :  { %v9126_v46 = vunpack.i.h.bf16 %v9124_v60  ;;  %v9125_v50 = vunpack.i.l.bf16 %v9124_v60  ;;  %v11205_v60 = vld [vmem:[%s11521_s11 + $0x268] sm:$0xff] }
 0x5eb   :  { %v6432_v62 = vsel %vm6422_vm14, %v6431_v55, %v9125_v50  ;;  %v6429_v22 = vsel %vm6422_vm14, %v6428_v42, %v9126_v46  ;;  %v11198_v46 = vld [vmem:[%s11521_s11 + $0x270] sm:$0xff]  ;;  %v11264_v42 = vld [vmem:[%s11521_s11 + $0x240] sm:$0xff] }
 0x5ec   :  { %6582 = vmatprep.mubr.f32.mxu1 %v6432_v62  ;;  %9021 = vmatpush3.msra.mxu0 %v11198_v46 }
 0x5ed   :  { %6583 = vmatmul.mubr.f32.vlgmr.msra.gmra.mxu1 %v6429_v22  ;;  %9022 = vmatprep.subr.mxu0 %v11600_v14  ;;  %v2250_v22 = vrot.slane %v9940_v12, 4 }
 0x5ee   :  { %8002 = vmatpush3.msra.mxu1 %v10742_v56  ;;  %9023 = vmatpush3.msra.mxu0 %v11205_v60 }
 0x5ef   :  { %8003 = vmatprep.subr.mxu1 %v10752_v54  ;;  %9024 = vmatprep.subr.mxu0 %v11600_v14 }
 0x5f0   :  { %8004 = vmatpush3.msra.mxu1 %v10766_v51 }
 0x5f1   :  { %8005 = vmatprep.subr.mxu1 %v10774_v2 }
 0x5f2   :  { %8006 = vmatpush3.msra.mxu1 %v10780_v24 }
 0x5f3   :  { %8007 = vmatprep.subr.mxu1 %v10791_v30 }
 0x5f4   :  { %8008 = vmatpush3.msra.mxu1 %v10806_v8 }
 0x5f5   :  { %8009 = vmatprep.subr.mxu1 %v10817_v11 }
 0x5f6   :  { %8010 = vmatpush3.msra.mxu1 %v10828_v48  ;;  %v2016_v48 = vmax.f32 %v9918_v34, 0.0 }
 0x5f7   :  { %8011 = vmatprep.subr.mxu1 %v10840_v18 }
 0x5f8   :  { %8012 = vmatpush3.msra.mxu1 %v10852_v58 }
 0x5f9   :  { %8013 = vmatprep.subr.mxu1 %v10864_v20  ;;  %v2017_v20 = vsel %vm760_vm12, %v2016_v48, -inf }
 0x5fa   :  { %8014 = vmatpush3.msra.mxu1 %v10876_v25 }
 0x5fb   :  { %8015 = vmatprep.subr.mxu1 %v10888_v7 }
 0x5fc   :  { %8016 = vmatpush3.msra.mxu1 %v10900_v53 }
 0x5fd   :  { %8017 = vmatprep.subr.mxu1 %v10912_v32  ;;  %v2018_v32 = vrot.slane %v2017_v20, 4 }
 0x5fe   :  { %8018 = vmatpush3.msra.mxu1 %v10924_v6 }
 0x5ff   :  { %8019 = vmatprep.subr.mxu1 %v10936_v44  ;;  %v7381_v44 = vld [vmem:[%s11516_s6 + $0x4] ss:$0 sm:$0xff]  ;;  %v2019_v34 = vmax.f32 %v2017_v20, %v2018_v32 }
 0x600   :  { %8020 = vmatpush3.msra.mxu1 %v10948_v29 }
 0x601   :  { %8021 = vmatprep.subr.mxu1 %v10960_v43  ;;  %v2020_v63 = vrot.slane %v2019_v34, 2 }
 0x602   :  { %8022 = vmatpush3.msra.mxu1 %v10972_v23  ;;  %v11219_v23 = vld [vmem:[%s11521_s11 + $0x258] sm:$0xff] }
 0x603   :  { %8023 = vmatprep.subr.mxu1 %v10984_v0  ;;  %v2021_v62 = vmax.f32 %v2019_v34, %v2020_v63  ;;  %v11295_v34 = vld [vmem:[%s11521_s11 + $0x228] sm:$0xff] }
 0x604   :  { %8024 = vmatpush3.msra.mxu1 %v10996_v28 }
 0x605   :  { %8025 = vmatprep.subr.mxu1 %v11008_v38 }
 0x606   :  { %8026 = vmatpush3.msra.mxu1 %v11020_v19  ;;  %v11212_v19 = vld [vmem:[%s11521_s11 + $0x260] sm:$0xff] }
 0x607   :  { %8027 = vmatprep.subr.mxu1 %v11032_v49  ;;  %9025 = vmatpush3.msra.mxu0 %v11212_v19 }
 0x608   :  { %8028 = vmatpush3.msra.mxu1 %v11044_v47  ;;  %9026 = vmatprep.subr.mxu0 %v11600_v14 }
 0x609   :  { %8029 = vmatprep.subr.mxu1 %v11057_v52  ;;  %9027 = vmatpush3.msra.mxu0 %v11219_v23 }
 0x60a   :  { %8030 = vmatpush3.msra.mxu1 %v11070_v31  ;;  %9028 = vmatprep.subr.mxu0 %v11600_v14 }
 0x60b   :  { %8031 = vmatprep.subr.mxu1 %v11083_v61  ;;  %9029 = vmatpush3.msra.mxu0 %v11226_v40 }
 0x60c   :  { %8032 = vmatpush3.msra.mxu1 %v11095_v26  ;;  %9030 = vmatprep.subr.mxu0 %v11600_v14  ;;  %v777_v26 = vmax.f32 %v9632_v9, 0.0 }
 0x60d   :  { %9053 = vmatprep.subr.mxu1 %v11600_v14  ;;  %9031 = vmatpush3.msra.mxu0 %v11259_v1 }
 0x60e   :  { %v778_v55 = vsel %vm760_vm12, %v777_v26, -inf  ;;  %9032 = vmatprep.subr.mxu0 %v11600_v14 }
 0x60f   :  { %9033 = vmatpush3.msra.mxu0 %v11264_v42  ;;  %v779_v48 = vrot.slane %v778_v55, 4 }
 0x610   :  { %9034 = vmatprep.subr.mxu0 %v11600_v14 }
 0x639   :  { %v8903_v21 = vpop.f32.mrf.mxu0  ;;  %v8914_v43 = vpop.f32.mrf.mxu1 }
 0x63a   :  { %v5458_v56 = vrot.slane %v8914_v43, 1 }
 0x63b   :  { %v5429_v54 = vpop.f32.mrf.mxu1  ;;  %v5354_v24 = vpop.f32.mrf.mxu0 }
 0x63c   :  { %v11231_v51 = vadd.f32 %v8903_v21, %v5458_v56  ;;  %v5439_v2 = vrot.slane %v5429_v54, 1 }
 0x63e   :  { %v11234_v30 = vadd.f32 %v5439_v2, %v5354_v24  ;;  %v11275_v2 = vld [vmem:[%s11521_s11 + $0x238] sm:$0xff] }
 0x63f   :  { %9035 = vmatpush3.msra.mxu0 %v11275_v2 }
 0x640   :  { %9036 = vmatprep.subr.mxu0 %v11600_v14 }
 0x642   :  { %v8936_v8 = vpop.f32.mrf.mxu1  ;;  %v8925_v11 = vpop.f32.mrf.mxu0 }
 0x643   :  { %v5719_v61 = vrot.slane %v8936_v8, 1 }
 0x644   :  { %v5611_v18 = vpop.f32.mrf.mxu1  ;;  %v5536_v58 = vpop.f32.mrf.mxu0 }
 0x645   :  { %v5696_v52 = vrot.slane %v5611_v18, 1  ;;  %v5721_v59 = vadd.f32 %v8925_v11, %v5719_v61 }
 0x647   :  { %v5698_v47 = vadd.f32 %v5696_v52, %v5536_v58  ;;  %v11284_v58 = vld [vmem:[%s11521_s11 + $0x230] sm:$0xff] }
 0x648   :  { %9037 = vmatpush3.msra.mxu0 %v11284_v58 }
 0x649   :  { %9038 = vmatprep.subr.mxu0 %v11600_v14 }
 0x64a   :  { %9039 = vmatpush3.msra.mxu0 %v11295_v34 }
 0x64b   :  { %9040 = vmatprep.subr.mxu0 %v11600_v14 }
 0x64c   :  { %v8947_v25 = vpop.f32.mrf.mxu0  ;;  %v8958_v7 = vpop.f32.mrf.mxu1 }
 0x64d   :  { %v5723_v35 = vrot.slane %v8947_v25, 2 }
 0x64e   :  { %v5686_v49 = vpop.f32.mrf.mxu0  ;;  %v5813_v53 = vpop.f32.mrf.mxu1 }
 0x64f   :  { %v5700_v6 = vrot.slane %v5686_v49, 2  ;;  %v5725_v21 = vadd.f32 %v5723_v35, %v5721_v59  ;;  %v2022_v49 = vrot.slane %v2021_v62, 1 }
 0x651   :  { %v5702_v0 = vadd.f32 %v5700_v6, %v5698_v47  ;;  %v5726_v32 = vadd.f32 %v7381_v44, %v5725_v21  ;;  %v2023_v63 = vmax.f32 %v2021_v62, %v2022_v49  ;;  %v7403_v62 = vld [vmem:[%s11520_s10 + $0x4] ss:$0 sm:$0xff] }
 0x652   :  { %v11241_v29 = vpop.f32.mrf.mxu1 }
 0x653   :  { %v5709_v38 = vadd.f32 %v7381_v44, %v5702_v0 }
 0x654   :  { %v11243_v28 = vpop.f32.mrf.mxu1 }
 0x655   :  { %v5710_v31 = vmax.f32 %v5709_v38, 0.0 }
 0x657   :  { %v5711_v39 = vsel %vm760_vm12, %v5710_v31, -inf  ;;  %v8972_v33 = vpop.f32.mrf.mxu0  ;;  %v11247_v27 = vpop.f32.mrf.mxu1 }
 0x658   :  { %v5712_v57 = vrot.slane %v5711_v39, 4  ;;  %v5920_v4 = vrot.slane %v8972_v33, 1 }
 0x659   :  { %v5898_v37 = vpop.f32.mrf.mxu0  ;;  %v11254_v3 = vpop.f32.mrf.mxu1 }
 0x65a   :  { %v5713_v36 = vmax.f32 %v5711_v39, %v5712_v57  ;;  %v5925_v9 = vadd.f32 %v8958_v7, %v5920_v4  ;;  %v5919_v50 = vrot.slane %v5898_v37, 1  ;;  %v5727_v57 = vmax.f32 %v5726_v32, 0.0 }
 0x65c   :  { %v5933_v43 = vadd.f32 %v11252_v41, %v5925_v9  ;;  %v5921_v56 = vsel %vm969_vm9, %v5919_v50, %v5920_v4  ;;  %v5714_v54 = vrot.slane %v5713_v36, 2 }
 0x65d   :  { %v5924_v24 = vadd.f32 %v5921_v56, %v5813_v53  ;;  %v8975_v8 = vpop.f32.mrf.mxu0  ;;  %v11277_v11 = vpop.f32.mrf.mxu1  ;;  %v2251_v53 = vmax.f32 %v9940_v12, %v2250_v22  ;;  %v11299_v12 = vmax.f32 %v778_v55, %v779_v48 }
 0x65e   :  { %v5715_v18 = vmax.f32 %v5713_v36, %v5714_v54  ;;  %v5935_v52 = vmax.f32 %v5933_v43, 0.0  ;;  %v5948_v47 = vrot.slane %v8975_v8, 1 }
 0x65f   :  { %v5932_v20 = vadd.f32 %v11252_v41, %v5924_v24  ;;  %v5908_v25 = vpop.f32.mrf.mxu0  ;;  %v11287_v7 = vpop.f32.mrf.mxu1  ;;  %v2252_v35 = vrot.slane %v2251_v53, 2  ;;  %v781_v8 = vrot.slane %v11299_v12, 2 }
 0x660   :  { %v5947_v6 = vrot.slane %v5908_v25, 1  ;;  %v5716_v0 = vrot.slane %v5715_v18, 1  ;;  %v5937_v44 = vsel %vm498_vm10, %v5935_v52, -inf  ;;  %v5953_v48 = vadd.f32 %v11241_v29, %v5948_v47  ;;  %v11324_v25 = vld [vmem:[%s11521_s11 + $0x218] sm:$0xff] }
 0x661   :  { %v5934_v38 = vmax.f32 %v5932_v20, 0.0  ;;  %v2253_v54 = vmax.f32 %v2251_v53, %v2252_v35  ;;  %v11319_v20 = vld [vmem:[%s11521_s11 + $0x220] sm:$0xff] }
 0x662   :  { %v5949_v31 = vsel %vm969_vm9, %v5947_v6, %v5948_v47  ;;  %v5717_v61 = vmax.f32 %v5715_v18, %v5716_v0  ;;  %9041 = vmatpush3.msra.mxu0 %v11319_v20 }
 0x663   :  { %v5936_v26 = vsel %vm329_vm8, %v5934_v38, -inf  ;;  %v9000_v39 = vpop.f32.mrf.mxu0  ;;  %v9014_v33 = vpop.f32.mrf.mxu1  ;;  %v5952_v59 = vadd.f32 %v5949_v31, %v11243_v28  ;;  %v5728_v28 = vsel %vm760_vm12, %v5727_v57, -inf  ;;  %9042 = vmatprep.subr.mxu0 %v11600_v14  ;;  %v2254_v35 = vrot.slane %v2253_v54, 1 }
 0x664   :  { %v5938_v4 = vmax.f32 %v5936_v26, %v5937_v44  ;;  %v6225_v37 = vrot.slane %v9000_v39, 1  ;;  %v9127_v50 = vpack.i.bf16 %v2023_v63, %v5717_v61  ;;  %v6234_v22 = vrot.slane %v9014_v33, 2  ;;  %9043 = vmatpush3.msra.mxu0 %v11324_v25 }
 0x665   :  { %v6118_v36 = vpop.f32.mrf.mxu0  ;;  %v6203_v9 = vpop.f32.mrf.mxu1  ;;  %v5954_v49 = vadd.f32 %v11252_v41, %v5952_v59  ;;  %v1012_v57 = vrot.slane %v9652_v13, 4  ;;  %9044 = vmatprep.subr.mxu0 %v11600_v14 }
 0x666   :  { %v6230_v55 = vadd.f32 %v11247_v27, %v6225_v37  ;;  %v6224_v21 = vrot.slane %v6118_v36, 1  ;;  %v6233_v43 = vrot.slane %v6203_v9, 2  ;;  %9128 = vrot.lane.b32.xlu0 %v9127_v50, %s9184_s27  ;;  %v5939_v24 = vrot.slane %v5938_v4, 4 }
 0x667   :  { %v9017_v56 = vpop.f32.mrf.mxu1  ;;  %v5729_v9 = vrot.slane %v5728_v28, 4  ;;  %v5956_v50 = vmax.f32 %v5954_v49, 0.0 }
 0x668   :  { %v6239_v18 = vadd.f32 %v6234_v22, %v6230_v55  ;;  %v6226_v27 = vsel %vm969_vm9, %v6224_v21, %v6225_v37  ;;  %v9003_v52 = vpop.f32.mrf.mxu0  ;;  %v5940_v47 = vmax.f32 %v5938_v4, %v5939_v24  ;;  %v6235_v0 = vsel %vm1284_vm11, %v6233_v43, %v6234_v22  ;;  %v11339_v4 = vld [vmem:[%s11521_s11 + $0x210] sm:$0xff] }
 0x669   :  { %v6229_v53 = vadd.f32 %v6226_v27, %v11254_v3  ;;  %v6262_v32 = vrot.slane %v9003_v52, 1  ;;  %v6213_v29 = vpop.f32.mrf.mxu1  ;;  %v6271_v38 = vrot.slane %v9017_v56, 2  ;;  %v5955_v3 = vadd.f32 %v11252_v41, %v5953_v48  ;;  %9045 = vmatpush3.msra.mxu0 %v11339_v4 }
 0x66a   :  { %v6247_v6 = vadd.f32 %v7403_v62, %v6239_v18  ;;  %v6128_v31 = vpop.f32.mrf.mxu0  ;;  %v6270_v61 = vrot.slane %v6213_v29, 2  ;;  %v5941_v33 = vrot.slane %v5940_v47, 2  ;;  %v782_v22 = vmax.f32 %v11299_v12, %v781_v8  ;;  %9046 = vmatprep.subr.mxu0 %v11600_v14 }
 0x66b   :  { %v6238_v44 = vadd.f32 %v6235_v0, %v6229_v53  ;;  %v6267_v26 = vadd.f32 %v11277_v11, %v6262_v32  ;;  %v6261_v39 = vrot.slane %v6128_v31, 1  ;;  %v11344_v11 = vld [vmem:[%s11521_s11 + $0x208] sm:$0xff]  ;;  %v2255_v18 = vmax.f32 %v2253_v54, %v2254_v35 }
 0x66c   :  { %v6249_v63 = vmax.f32 %v6247_v6, 0.0  ;;  %v5942_v36 = vmax.f32 %v5940_v47, %v5941_v33  ;;  %v6272_v56 = vsel %vm1284_vm11, %v6270_v61, %v6271_v38  ;;  %9047 = vmatpush3.msra.mxu0 %v11344_v11  ;;  %v1013_v27 = vmax.f32 %v9652_v13, %v1012_v57  ;;  %v11360_v47 = vld [vmem:[%s11521_s11 + $0x200] sm:$0xff] }
 0x66d   :  { %v6246_v37 = vadd.f32 %v7403_v62, %v6238_v44  ;;  %v6276_v59 = vadd.f32 %v6271_v38, %v6267_v26  ;;  %v6263_v41 = vsel %vm969_vm9, %v6261_v39, %v6262_v32  ;;  %9048 = vmatprep.subr.mxu0 %v11600_v14  ;;  %v5957_v52 = vmax.f32 %v5955_v3, 0.0 }
 0x66e   :  { %v6266_v55 = vadd.f32 %v6263_v41, %v11287_v7  ;;  %v5943_v24 = vrot.slane %v5942_v36, 1  ;;  %v6251_v7 = vsel %vm760_vm12, %v6249_v63, -inf  ;;  %v783_v32 = vrot.slane %v782_v22, 1  ;;  %9049 = vmatpush3.msra.mxu0 %v11360_v47 }
 0x66f   :  { %v6248_v21 = vmax.f32 %v6246_v37, 0.0  ;;  %v6278_v43 = vadd.f32 %v7403_v62, %v6276_v59  ;;  %v5958_v54 = vsel %vm329_vm8, %v5956_v50, -inf  ;;  %v5730_v6 = vmax.f32 %v5728_v28, %v5729_v9  ;;  %8036 = vmatprep.subr.mxu0 %v10757_v17 }
 0x670   :  { %v6275_v48 = vadd.f32 %v6272_v56, %v6266_v55  ;;  %v5944_v8 = vmax.f32 %v5942_v36, %v5943_v24  ;;  %v1014_v31 = vrot.slane %v1013_v27, 2  ;;  %v784_v39 = vmax.f32 %v782_v22, %v783_v32 }
 0x671   :  { %v6250_v12 = vsel %vm329_vm8, %v6248_v21, -inf  ;;  %v6280_v49 = vmax.f32 %v6278_v43, 0.0  ;;  %v5731_v33 = vrot.slane %v5730_v6, 2  ;;  %v11601_v9 = vpack.i.bf16 %v9962_v45, %v9964_v10 }
 0x672   :  { %v6277_v53 = vadd.f32 %v7403_v62, %v6275_v48  ;;  %v6252_v29 = vmax.f32 %v6250_v12, %v6251_v7  ;;  %v9132_v13 = vpack.i.bf16 %v2255_v18, %v5944_v8  ;;  %v5959_v62 = vsel %vm498_vm10, %v5957_v52, -inf  ;;  %v11603_v7 = vld [vmem:[#allocation9_spill] sm:$0xff]  ;;  %v11604_v12 = vld [vmem:[#allocation10_spill] sm:$0xff] }
 0x673   :  { %v6282_v61 = vsel %vm760_vm12, %v6280_v49, -inf  ;;  %v5960_v26 = vmax.f32 %v5958_v54, %v5959_v62  ;;  %v1015_v17 = vmax.f32 %v1013_v27, %v1014_v31  ;;  %v5732_v59 = vmax.f32 %v5730_v6, %v5731_v33  ;;  %v11610_v31 = vld [vmem:[#allocation5_spill] sm:$0xff] }
 0x674   :  { %v6279_v0 = vmax.f32 %v6277_v53, 0.0  ;;  %v6253_v38 = vrot.slane %v6252_v29, 4  ;;  %9133 = vrot.lane.b32.xlu1 %v9132_v13, %s9185_s28  ;;  %v11602_v24 = vpack.i.bf16 %v10560_v15, %v10562_v16  ;;  %v11605_v8 = vpack.i.bf16 %v11603_v7, %v11604_v12  ;;  %v11606_v15 = vld [vmem:[#allocation11_spill] sm:$0xff]  ;;  %v11607_v16 = vld [vmem:[#allocation12_spill] sm:$0xff]  ;;  %v11609_v13 = vld [vmem:[#allocation6_spill] sm:$0xff] }
 0x675   :  { %v5961_v37 = vrot.slane %v5960_v26, 4  ;;  %v1016_v22 = vrot.slane %v1015_v17, 1  ;;  %v5733_v43 = vrot.slane %v5732_v59, 1  ;;  %v11608_v53 = vpack.i.bf16 %v11606_v15, %v11607_v16 }
 0x676   :  { %v6281_v44 = vsel %vm329_vm8, %v6279_v0, -inf  ;;  %v6254_v28 = vmax.f32 %v6252_v29, %v6253_v38  ;;  %v7374_v29 = vld [vmem:[%s11514_s4 + $0x4] ss:$0 sm:$0xff]  ;;  %v1751_v6 = vmax.f32 %v11609_v13, 0.0 }
 0x677   :  { %v6283_v3 = vmax.f32 %v6281_v44, %v6282_v61  ;;  %v5962_v21 = vmax.f32 %v5960_v26, %v5961_v37  ;;  %v1017_v48 = vmax.f32 %v1015_v17, %v1016_v22  ;;  %v5734_v27 = vmax.f32 %v5732_v59, %v5733_v43 }
 0x678   :  { %v6255_v63 = vrot.slane %v6254_v28, 2  ;;  %6661 = vrot.lane.b32.xlu1 %v784_v39, %s9184_s27  ;;  %v5448_v54 = vadd.f32 %v7374_v29, %v11234_v30  ;;  %v1752_v38 = vsel %vm498_vm10, %v1751_v6, -inf  ;;  %v511_v61 = vmax.f32 %v11610_v31, 0.0 }
 0x679   :  { %v6284_v35 = vrot.slane %v6283_v3, 4  ;;  %v5963_v18 = vrot.slane %v5962_v21, 2  ;;  %v1753_v44 = vrot.slane %v1752_v38, 4  ;;  %v5461_v31 = vadd.f32 %v7374_v29, %v11231_v51 }
 0x67a   :  { %v6256_v57 = vmax.f32 %v6254_v28, %v6255_v63  ;;  %v5449_v0 = vmax.f32 %v5448_v54, 0.0  ;;  %v512_v26 = vsel %vm498_vm10, %v511_v61, -inf  ;;  %v11611_v63 = vld [vmem:[#allocation8_spill] sm:$0xff] }
 0x67b   :  { %v6285_v41 = vmax.f32 %v6283_v3, %v6284_v35  ;;  %v5964_v45 = vmax.f32 %v5962_v21, %v5963_v18  ;;  %v1754_v39 = vmax.f32 %v1752_v38, %v1753_v44  ;;  %v513_v3 = vrot.slane %v512_v26, 4  ;;  %v11613_v44 = vld [vmem:[#allocation13_spill] sm:$0xff] }
 0x67c   :  { %v6257_v36 = vrot.slane %v6256_v57, 1  ;;  %9138 = vrot.lane.b32.xlu1 %v11601_v9, %s9186_s1  ;;  %v5450_v62 = vsel %vm498_vm10, %v5449_v0, -inf  ;;  %v4225_v35 = vmax.f32 %v11611_v63, 0.0 }
 0x67d   :  { %v6286_v50 = vrot.slane %v6285_v41, 2  ;;  %v5965_v49 = vrot.slane %v5964_v45, 1  ;;  %v5451_v28 = vrot.slane %v5450_v62, 4  ;;  %v514_v17 = vmax.f32 %v512_v26, %v513_v3 }
 0x67e   :  { %v6258_v55 = vmax.f32 %v6256_v57, %v6257_v36  ;;  %v1755_v57 = vrot.slane %v1754_v39, 2  ;;  %v4226_v37 = vsel %vm498_vm10, %v4225_v35, -inf }
 0x67f   :  { %v6287_v56 = vmax.f32 %v6285_v41, %v6286_v50  ;;  %v5966_v32 = vmax.f32 %v5964_v45, %v5965_v49  ;;  %v5452_v33 = vmax.f32 %v5450_v62, %v5451_v28  ;;  %v4227_v41 = vrot.slane %v4226_v37, 4 }
 0x680   :  { %6442 = vrot.lane.b32.xlu0 %v6258_v55, %s9186_s1  ;;  %9148 = vrot.lane.b32.xlu1 %v11602_v24, %s9185_s28  ;;  %v1756_v59 = vmax.f32 %v1754_v39, %v1755_v57  ;;  %v515_v50 = vrot.slane %v514_v17, 2  ;;  %v11615_v57 = vld [vmem:[#allocation15_spill] sm:$0xff] }
 0x681   :  { %v6288_v52 = vrot.slane %v6287_v56, 1  ;;  %v5453_v30 = vrot.slane %v5452_v33, 2  ;;  %v4228_v21 = vmax.f32 %v4226_v37, %v4227_v41  ;;  %v11617_v37 = vld [vmem:[#allocation17_spill] sm:$0xff] }
 0x682   :  { %v1757_v22 = vrot.slane %v1756_v59, 1 }
 0x683   :  { %v6289_v10 = vmax.f32 %v6287_v56, %v6288_v52  ;;  %v5454_v36 = vmax.f32 %v5452_v33, %v5453_v30  ;;  %v11614_v33 = vld [vmem:[#allocation14_spill] sm:$0xff]  ;;  %v5462_v30 = vmax.f32 %v5461_v31, 0.0  ;;  %v11636_v31 = vld [vmem:[#allocation36_spill] sm:$0xff] }
 0x684   :  { %6665 = vrot.lane.b32.xlu0 %v1017_v48, %s9185_s28  ;;  %6721 = vrot.lane.b32.xlu1 %v5734_v27, %s9184_s27  ;;  %v516_v48 = vmax.f32 %v514_v17, %v515_v50  ;;  %v1758_v45 = vmax.f32 %v1756_v59, %v1757_v22  ;;  %v11616_v17 = vld [vmem:[#allocation16_spill] sm:$0xff]  ;;  %v11618_v59 = vld [vmem:[#allocation18_spill] sm:$0xff]  ;;  %v11619_v50 = vld [vmem:[#allocation19_spill] sm:$0xff] }
 0x685   :  { %v5455_v43 = vrot.slane %v5454_v36, 1  ;;  %v5463_v22 = vsel %vm498_vm10, %v5462_v30, -inf }
 0x687   :  { %v5456_v12 = vmax.f32 %v5454_v36, %v5455_v43 }
 0x688   :  { %9143 = vrot.lane.b32.xlu0 %v11605_v8, %s9184_s27  ;;  %6729 = vrot.lane.b32.xlu1 %v6289_v10, %s9186_s1  ;;  %v4229_v10 = vrot.slane %v4228_v21, 2  ;;  %v517_v8 = vrot.slane %v516_v48, 1 }
 0x68a   :  { %v4230_v38 = vmax.f32 %v4228_v21, %v4229_v10  ;;  %v518_v61 = vmax.f32 %v516_v48, %v517_v8  ;;  %v11620_v21 = vld [vmem:[#allocation20_spill] sm:$0xff]  ;;  %v11622_v48 = vld [vmem:[#allocation22_spill] sm:$0xff] }
 0x68b   :  { %v11626_v8 = vld [vmem:[#allocation26_spill] sm:$0xff] }
 0x68c   :  { %9153 = vrot.lane.b32.xlu0 %v11608_v53, %s9186_s1  ;;  %v4231_v63 = vrot.slane %v4230_v38, 1 }
 0x690   :  { %6725 = vrot.lane.b32.xlu0 %v5966_v32, %s9185_s28  ;;  %v11612_v32 = vld [vmem:[#allocation7_spill] sm:$0xff]  ;;  %s9188_s28 = smov [#allocation2]  }
 0x691   :  { %v2988_v54 = vmax.f32 %v11612_v32, 0.0  ;;  %v11630_v32 = vld [vmem:[#allocation30_spill] sm:$0xff]  ;;  %s6952_s1 = sshll.u32 %s9188_s28, 4  ;;  %s6953_s1 = int_to_ptr.vmem [resolvable:$true] %s6952_s1 }
 0x692   :  { %p9165_p1 = scmp.lt.s32.totalorder %s6953_s1, %s6953_s1 }
 0x693   :  { %v2989_v28 = vsel %vm498_vm10, %v2988_v54, -inf }
 0x694   :  { %v2990_v29 = vrot.slane %v2989_v28, 4 }
 0x696   :  { %v2991_v43 = vmax.f32 %v2989_v28, %v2990_v29 }
 0x6d8   :  { %v9129_v55 = vpop.permute.xlu0 %9128 }
 0x6d9   :  { %v9131_v24 = vunpack.i.h.bf16 %v9129_v55  ;;  %v9130_v18 = vunpack.i.l.bf16 %v9129_v55  ;;  %v4232_v55 = vmax.f32 %v4230_v38, %v4231_v63 }
 0x6db   :  { %v6711_v15 = vsel %vm329_vm8, %v1758_v45, %v9131_v24  ;;  %v6445_v16 = vsel %vm329_vm8, %v5456_v12, %v9130_v18  ;;  %v11623_v45 = vld [vmem:[#allocation23_spill] sm:$0xff]  ;;  %v11625_v12 = vld [vmem:[#allocation25_spill] sm:$0xff] }
 0x6e6   :  { %v9134_v9 = vpop.permute.xlu1 %9133 }
 0x6e7   :  { %v9136_v27 = vunpack.i.h.bf16 %v9134_v9  ;;  %v9135_v52 = vunpack.i.l.bf16 %v9134_v9 }
 0x6e9   :  { %v6712_v53 = vsel %vm6420_vm13, %v6711_v15, %v9136_v27  ;;  %v6446_v6 = vsel %vm6420_vm13, %v6445_v16, %v9135_v52  ;;  %v5464_v27 = vrot.slane %v5463_v22, 4  ;;  %v11627_v15 = vld [vmem:[#allocation27_spill] sm:$0xff] }
 0x6ea   :  { %v6662_v56 = vpop.permute.xlu1 %6661 }
 0x6eb   :  { %v6708_v26 = vsel %vm329_vm8, %v518_v61, %v6662_v56  ;;  %v11621_v56 = vld [vmem:[#allocation21_spill] sm:$0xff] }
 0x6ee   :  { %v9139_v7 = vpop.permute.xlu1 %9138 }
 0x6ef   :  { %v9140_v49 = vunpack.i.l.bf16 %v9139_v7  ;;  %v9141_v39 = vunpack.i.h.bf16 %v9139_v7  ;;  %v2992_v7 = vrot.slane %v2991_v43, 2 }
 0x6f1   :  { %v6713_v0 = vsel %vm6422_vm14, %v6712_v53, %v9140_v49  ;;  %v5465_v49 = vmax.f32 %v5463_v22, %v5464_v27  ;;  %v2993_v16 = vmax.f32 %v2991_v43, %v2992_v7  ;;  %v11629_v53 = vld [vmem:[#allocation29_spill] sm:$0xff] }
 0x6f2   :  { %v6443_v13 = vpop.permute.xlu0 %6442  ;;  %6799 = vmatprep.mubr.f32.mxu1 %v6713_v0  ;;  %v11425_v36 = vpop.permute.xlu1 %9148  ;;  %v11633_v0 = vld [vmem:[#allocation33_spill] sm:$0xff] }
 0x6f3   :  { %v6447_v62 = vsel %vm6422_vm14, %v6446_v6, %v6443_v13  ;;  %v9150_v24 = vunpack.i.l.bf16 %v11425_v36  ;;  %v5466_v54 = vrot.slane %v5465_v49, 2  ;;  %v11632_v13 = vld [vmem:[#allocation32_spill] sm:$0xff]  ;;  %v2994_v6 = vrot.slane %v2993_v16, 1 }
 0x6f4   :  { %9051 = vmatmul.mubr.f32.vlgmr.msra.gmra.mxu0 %v6447_v62 }
 0x6f5   :  { %8037 = vmatpush3.msra.mxu0 %v11613_v44  ;;  %v5467_v38 = vmax.f32 %v5465_v49, %v5466_v54  ;;  %v2995_v61 = vmax.f32 %v2993_v16, %v2994_v6  ;;  %v11638_v44 = vld [vmem:[#allocation38_spill] sm:$0xff] }
 0x6f6   :  { %8038 = vmatprep.subr.mxu0 %v11614_v33  ;;  %v6666_v3 = vpop.permute.xlu0 %6665  ;;  %v9151_v33 = vunpack.i.h.bf16 %v11425_v36  ;;  %v6722_v63 = vpop.permute.xlu1 %6721 }
 0x6f7   :  { %v6709_v35 = vsel %vm6420_vm13, %v6708_v26, %v6666_v3  ;;  %8039 = vmatpush3.msra.mxu0 %v11615_v57  ;;  %v5468_v28 = vrot.slane %v5467_v38, 1  ;;  %v11641_v3 = vld [vmem:[#allocation41_spill] sm:$0xff] }
 0x6f8   :  { %8040 = vmatprep.subr.mxu0 %v11616_v17  ;;  %v6710_v51 = vsel %vm6422_vm14, %v6709_v35, %v9141_v39  ;;  %v11639_v39 = vld [vmem:[#allocation39_spill] sm:$0xff]  ;;  %v11642_v35 = vld [vmem:[#allocation42_spill] sm:$0xff] }
 0x6f9   :  { %8041 = vmatpush3.msra.mxu0 %v11617_v37  ;;  %6800 = vmatmul.mubr.f32.vlgmr.msra.gmra.mxu1 %v6710_v51  ;;  %v11643_v17 = vld [vmem:[#allocation43_spill] sm:$0xff] }
 0x6fa   :  { %8042 = vmatprep.subr.mxu0 %v11618_v59  ;;  %9054 = vmatpush3.msra.mxu1 %v11193_v5  ;;  %v11423_v41 = vpop.permute.xlu0 %9143  ;;  %v7946_v59 = vpop.f32.mrf.mxu0 }
 0x6fb   :  { %v9145_v9 = vunpack.i.l.bf16 %v11423_v41  ;;  %8043 = vmatpush3.msra.mxu0 %v11619_v50  ;;  %9055 = vmatprep.subr.mxu1 %v11600_v14  ;;  %v9146_v62 = vunpack.i.h.bf16 %v11423_v41  ;;  %v7981_v41 = vpop.f32.mrf.mxu1  ;;  %v6370_v50 = vld [vmem:[%s11522_s12] sm:$0x1]  ;;  %s9160_s12 = scalar_lea.vmem %s6953_s1, 32 }
 0x6fc   :  { %8044 = vmatprep.subr.mxu0 %v11620_v21  ;;  %9056 = vmatpush3.msra.mxu1 %v11198_v46  ;;  %v11624_v46 = vld [vmem:[#allocation24_spill] sm:$0xff]  ;;  %p9161_p0 = scmp.ne.s32.totalorder %s6953_s1, %s9160_s12  ;;  %p9166_p2 = scmp.lt.s32.totalorder %s9160_s12, %s9160_s12 }
 0x6fd   :  { %8045 = vmatpush3.msra.mxu0 %v11621_v56  ;;  %9057 = vmatprep.subr.mxu1 %v11600_v14  ;;  %v6717_v5 = vsel %vm329_vm8, %v4232_v55, %v9145_v9  ;;  %v6714_v26 = vsel %vm329_vm8, %v2995_v61, %v9146_v62  ;;  %v7982_v36 = vpop.f32.mrf.mxu1 }
 0x6fe   :  { %8046 = vmatprep.subr.mxu0 %v11622_v48  ;;  %9058 = vmatpush3.msra.mxu1 %v11205_v60  ;;  %v11439_v18 = vpop.permute.xlu0 %9153  ;;  %v6718_v10 = vsel %vm6420_vm13, %v6717_v5, %v9150_v24  ;;  %v6715_v57 = vsel %vm6420_vm13, %v6714_v26, %v9151_v33  ;;  %v7983_v55 = vadd.f32 %v7982_v36, %v7981_v41  ;;  %p9167_p3 = por %p9166_p2, %p9165_p1 }
 0x6ff   :  { %v9155_v52 = vunpack.i.l.bf16 %v11439_v18  ;;  %8047 = vmatpush3.msra.mxu0 %v11623_v45  ;;  %9059 = vmatprep.subr.mxu1 %v11600_v14 }
 0x700   :  { %8048 = vmatprep.subr.mxu0 %v11624_v46  ;;  %9060 = vmatpush3.msra.mxu1 %v11212_v19  ;;  %v11628_v19 = vld [vmem:[#allocation28_spill] sm:$0xff]  ;;  %p9168_p4 = pnand %p9167_p3, %p9161_p0 }
 0x701   :  { %8049 = vmatpush3.msra.mxu0 %v11625_v12  ;;  %9061 = vmatprep.subr.mxu1 %v11600_v14  ;;  %v6719_v60 = vsel %vm6422_vm14, %v6718_v10, %v9155_v52 }
 0x702   :  { %8050 = vmatprep.subr.mxu0 %v11626_v8  ;;  %9062 = vmatpush3.msra.mxu1 %v11219_v23  ;;  %v11631_v23 = vld [vmem:[#allocation31_spill] sm:$0xff]  ;;  %v6726_v30 = vpop.permute.xlu0 %6725 }
 0x703   :  { %8051 = vmatpush3.msra.mxu0 %v11627_v15  ;;  %6869 = vmatprep.mubr.f32.mxu0 %v6719_v60 }
 0x704   :  { %9063 = vmatprep.subr.mxu1 %v11600_v14  ;;  %8052 = vmatprep.subr.mxu0 %v11628_v19 }
 0x705   :  { %9064 = vmatpush3.msra.mxu1 %v11226_v40  ;;  %8053 = vmatpush3.msra.mxu0 %v11629_v53  ;;  %v11634_v40 = vld [vmem:[#allocation34_spill] sm:$0xff] }
 0x706   :  { %9065 = vmatprep.subr.mxu1 %v11600_v14  ;;  %8054 = vmatprep.subr.mxu0 %v11630_v32 }
 0x707   :  { %9066 = vmatpush3.msra.mxu1 %v11259_v1  ;;  %8055 = vmatpush3.msra.mxu0 %v11631_v23  ;;  %v11635_v1 = vld [vmem:[#allocation35_spill] sm:$0xff] }
 0x708   :  { %9067 = vmatprep.subr.mxu1 %v11600_v14  ;;  %8056 = vmatprep.subr.mxu0 %v11632_v13 }
 0x709   :  { %9068 = vmatpush3.msra.mxu1 %v11264_v42  ;;  %8057 = vmatpush3.msra.mxu0 %v11633_v0  ;;  %v11637_v42 = vld [vmem:[#allocation37_spill] sm:$0xff] }
 0x70a   :  { %9069 = vmatprep.subr.mxu1 %v11600_v14  ;;  %8058 = vmatprep.subr.mxu0 %v11634_v40 }
 0x70b   :  { %9070 = vmatpush3.msra.mxu1 %v11275_v2  ;;  %8059 = vmatpush3.msra.mxu0 %v11635_v1  ;;  %v9156_v2 = vunpack.i.h.bf16 %v11439_v18 }
 0x70c   :  { %9071 = vmatprep.subr.mxu1 %v11600_v14  ;;  %8060 = vmatprep.subr.mxu0 %v11636_v31 }
 0x70d   :  { %9072 = vmatpush3.msra.mxu1 %v11284_v58  ;;  %8061 = vmatpush3.msra.mxu0 %v11637_v42  ;;  %v11640_v58 = vld [vmem:[#allocation40_spill] sm:$0xff]  ;;  %v6716_v51 = vsel %vm6422_vm14, %v6715_v57, %v9156_v2 }
 0x70e   :  { %9073 = vmatprep.subr.mxu1 %v11600_v14  ;;  %8062 = vmatprep.subr.mxu0 %v11638_v44 }
 0x70f   :  { %9074 = vmatpush3.msra.mxu1 %v11295_v34  ;;  %8063 = vmatpush3.msra.mxu0 %v11639_v39  ;;  %v5469_v34 = vmax.f32 %v5467_v38, %v5468_v28 }
 0x710   :  { %9075 = vmatprep.subr.mxu1 %v11600_v14  ;;  %8064 = vmatprep.subr.mxu0 %v11640_v58 }
 0x711   :  { %9076 = vmatpush3.msra.mxu1 %v11319_v20  ;;  %8065 = vmatpush3.msra.mxu0 %v11641_v3  ;;  %v6732_v20 = vsel %vm329_vm8, %v5469_v34, %v6722_v63 }
 0x712   :  { %9077 = vmatprep.subr.mxu1 %v11600_v14  ;;  %8066 = vmatprep.subr.mxu0 %v11642_v35  ;;  %v6733_v29 = vsel %vm6420_vm13, %v6732_v20, %v6726_v30 }
 0x713   :  { %9078 = vmatpush3.msra.mxu1 %v11324_v25  ;;  %8067 = vmatpush3.msra.mxu0 %v11643_v17  ;;  %v6730_v25 = vpop.permute.xlu1 %6729 }
 0x714   :  { %9079 = vmatprep.subr.mxu1 %v11600_v14  ;;  %6870 = vmatmul.mubr.f32.vlgmr.msra.gmra.mxu0 %v6716_v51  ;;  %v6734_v37 = vsel %vm6422_vm14, %v6733_v29, %v6730_v25 }
 0x715   :  { %9080 = vmatpush3.msra.mxu1 %v11339_v4  ;;  %9085 = vmatprep.mubr.msk.f32.mxu1 %vm9187_vm15, %v11600_v14  ;;  %v7947_v4 = vpop.f32.mrf.mxu0 }
 0x716   :  { %9081 = vmatprep.subr.mxu1 %v11600_v14  ;;  %v7948_v9 = vadd.f32 %v7947_v4, %v7946_v59 }
 0x717   :  { %9082 = vmatpush3.msra.mxu1 %v11344_v11 }
 0x718   :  { %9083 = vmatprep.subr.mxu1 %v11600_v14  ;;  %v6515_v22 = vadd.f32 %v7948_v9, %v6370_v50 }
 0x719   :  { %9084 = vmatpush3.msra.mxu1 %v11360_v47 }
 0x71a   :  { %9086 = vmatmul.mubr.f32.vlgmr.msra.gmra.mxu1 %v6734_v37  ;;  %v6585_v11 = vadd.f32 %v7983_v55, %v6515_v22 }
 0x7b4   :  { %v6654_v21 = vpop.f32.mrf.mxu0 }
 0x7b5   :  { %v6655_v14 = vadd.f32 %v6654_v21, %v6585_v11 }
 0x7b6   :  { %v9052_v43 = vpop.f32.mrf.mxu0 }
 0x7b7   :  { %6659 = vst.msk [vmem:[#allocation2] sm:$0x1] %vm6658_vm0, %v6655_v14 }
 0x7b9   :  { %v8033_v47 = vpop.f32.mrf.mxu1 }
 0x7bb   :  { %v8034_v56 = vpop.f32.mrf.mxu1 }
 0x7bc   :  { %v8035_v5 = vadd.f32 %v8034_v56, %v8033_v47 }
 0x7be   :  { %v6802_v18 = vadd.f32 %v8035_v5, %v6370_v50 }
 0x7d4   :  { %v8068_v24 = vpop.f32.mrf.mxu0 }
 0x7d6   :  { %v8069_v48 = vpop.f32.mrf.mxu0 }
 0x7d7   :  { %v8070_v27 = vadd.f32 %v8069_v48, %v8068_v24 }
 0x7d9   :  { %v6872_v52 = vadd.f32 %v8070_v27, %v6802_v18 }
 0x7da   :  { %v6941_v45 = vpop.f32.mrf.mxu1 }
 0x7db   :  { %v6942_v46 = vadd.f32 %v6941_v45, %v6872_v52 }
 0x7dc   :  { %v9087_v10 = vpop.f32.mrf.mxu1 }
 0x7dd   :  { %6945 = vst.msk [vmem:[#allocation2 + $0x1] sm:$0x1] %vm6658_vm0, %v6942_v46 }
 0x7de   :  { %9171 = shalt.err (!%p9168_p4)
}
 0x7df   :  { %6955 = dma.vmem_to_hbm [thread:$0]  %s6953_s1, 32, %s11523_s13, [#allocation3]  }
 0x7e0   :  { %9180 = dma.done.wait [#allocation3], 32  }
 0x7e1   :  { %9181 = vsyncadd [#allocation3], 4294967264 }
 0x7e2   :  { %6959 = vsyncpa [#allocation3], 1 }

</bundles_post_ra>
